<compile_context>
chip_gen: v6e
topology: v6e:2x2x1
jax: 0.10.0
libtpu: 0.0.40
codegen_flags: <defaults>
</compile_context>

<pallas_src>
import functools
import math

import jax
import jax.numpy as jnp
import numpy as np
from jax.experimental import pallas as pl
from jax.experimental.pallas import tpu as pltpu

LANE = 128
SUBLANE_BF16 = 16

# feat stays VMEM-resident (f32) when its conservative double-buffered footprint plus the rest of
# the working set stays under this budget (sized for v7x's 64 MiB physical VMEM).
_RESIDENT_FEAT_VMEM_BUDGET = 40 * 1024 * 1024


def _cdiv(a, b):
    return (a + b - 1) // b


def _round_up(x, m):
    return ((x + m - 1) // m) * m


# ----------------------------------------------------------------------------- kernels


def _fused_mlp_logsoftmax(nclass, eps, x_self, acc,
                          w2_ref, b2_ref, w3_ref, b3_ref, out_ref):
    # GINConv(apply_func=None): (1 + eps) * h_i + sum_j A_ij h_j   (f32)
    x = (1.0 + eps) * x_self + acc
    # Linear(nfeat, nhid) + ReLU
    h = jnp.dot(x, w2_ref[...], preferred_element_type=jnp.float32) + b2_ref[...]
    h = jnp.maximum(h, 0.0)
    # Linear(nhid, nclass); dropout is identity in eval mode
    logits = jnp.dot(h, w3_ref[...], preferred_element_type=jnp.float32) + b3_ref[...]
    # mask the lane-padded class columns so they do not perturb log_softmax
    col = jax.lax.broadcasted_iota(jnp.int32, logits.shape, 1)
    logits = jnp.where(col < nclass, logits, -1e30)
    m = jnp.max(logits, axis=1, keepdims=True)
    z = logits - m
    lse = jnp.log(jnp.sum(jnp.exp(z), axis=1, keepdims=True))
    out_ref[...] = z - lse


def gin_kernel_resident(nclass, tm, tk, max_nb,
                        col_idx_ref, counts_ref,            # scalar prefetch (SMEM)
                        eps_ref, adj_ref, feat_ref,
                        w2_ref, b2_ref, w3_ref, b3_ref,
                        out_ref, acc_ref):
    i = pl.program_id(0)
    k = pl.program_id(1)

    @pl.when(k == 0)
    def _init():
        acc_ref[...] = jnp.zeros_like(acc_ref)

    # block-sparse sum-aggregation: only nonzero adjacency blocks contribute
    @pl.when(k < counts_ref[i])
    def _accumulate():
        off = pl.multiple_of(col_idx_ref[i * max_nb + k] * tk, tk)
        fk = feat_ref[pl.ds(off, tk), :].astype(jnp.bfloat16)
        acc_ref[...] += jnp.dot(adj_ref[...], fk, preferred_element_type=jnp.float32)

    @pl.when(k == pl.num_programs(1) - 1)
    def _epilogue():
        row = pl.multiple_of(i * tm, tm)
        x_self = feat_ref[pl.ds(row, tm), :]                # exact f32 self term
        _fused_mlp_logsoftmax(nclass, eps_ref[0], x_self, acc_ref[...],
                              w2_ref, b2_ref, w3_ref, b3_ref, out_ref)


def gin_kernel_streamed(nclass,
                        col_idx_ref, counts_ref,            # scalar prefetch (SMEM)
                        eps_ref, adj_ref, featk_ref, feati_ref,
                        w2_ref, b2_ref, w3_ref, b3_ref,
                        out_ref, acc_ref):
    del col_idx_ref  # consumed by the index_maps only
    i = pl.program_id(0)
    k = pl.program_id(1)

    @pl.when(k == 0)
    def _init():
        acc_ref[...] = jnp.zeros_like(acc_ref)

    @pl.when(k < counts_ref[i])
    def _accumulate():
        fk = featk_ref[...].astype(jnp.bfloat16)
        acc_ref[...] += jnp.dot(adj_ref[...], fk, preferred_element_type=jnp.float32)

    @pl.when(k == pl.num_programs(1) - 1)
    def _epilogue():
        _fused_mlp_logsoftmax(nclass, eps_ref[0], feati_ref[...], acc_ref[...],
                              w2_ref, b2_ref, w3_ref, b3_ref, out_ref)


# ----------------------------------------------------------------------------- host wrappers


def _pick_tiles(n_nodes, tm, tk):
    # Bigger tiles amortize the ~0.35us per-grid-step overhead; clamp so the "parallel" row axis
    # keeps >= 4 tiles (v7x megacore occupancy) and tiles never exceed the (padded) graph.
    if tm is None:
        tm = min(512, _round_up(max(_cdiv(n_nodes, 4), SUBLANE_BF16), SUBLANE_BF16))
    tm = max(SUBLANE_BF16, _round_up(min(tm, _round_up(n_nodes, SUBLANE_BF16)), SUBLANE_BF16))
    if tk is None:
        tk = 1024
    tk = max(LANE, _round_up(min(tk, _round_up(n_nodes, LANE)), LANE))
    return tm, tk


def preprocess_graph(adj, *, tm=None, tk=None):
    """One-time graph preprocessing (hoisted out of the per-forward jit).

    Pads the adjacency independently along rows (multiple of tm) and columns (multiple of tk),
    casts it to bf16, and builds a block-sparse skip list: for each row tile, the column-block
    indices containing at least one nonzero (padded by repeating the last valid index so Pallas
    skips the redundant DMA) plus the per-row-tile count.
    """
    adj_np = np.asarray(adj, dtype=np.float32)
    n_nodes = adj_np.shape[0]
    tm, tk = _pick_tiles(n_nodes, tm, tk)
    n_i = _cdiv(n_nodes, tm)
    n_k = _cdiv(n_nodes, tk)
    n_pm, n_pk = n_i * tm, n_k * tk

    adj_p = np.zeros((n_pm, n_pk), np.float32)
    adj_p[:n_nodes, :n_nodes] = adj_np

    nz = np.any(adj_p.reshape(n_i, tm, n_k, tk) != 0.0, axis=(1, 3))      # (n_i, n_k)
    counts = nz.sum(axis=1).astype(np.int32)
    max_nb = max(int(counts.max()), 1)
    col_idx = np.zeros((n_i, max_nb), np.int32)
    for i in range(n_i):
        nzi = np.nonzero(nz[i])[0].astype(np.int32)
        if nzi.size:
            col_idx[i, :nzi.size] = nzi
            col_idx[i, nzi.size:] = nzi[-1]   # repeat last valid -> DMA skipped on padded steps

    # TODO(synk): per-generation adjacency dtype narrowing (int8 + per-row scale on v5e/v6e,
    # fp8 e4m3 on v7x) would halve the dominant HBM stream again on top of the block-sparse skip.
    return {
        "adj": jnp.asarray(adj_p, dtype=jnp.bfloat16),
        "col_idx": jnp.asarray(col_idx.reshape(-1)),   # flat (n_i*max_nb,) keeps SMEM padding small
        "counts": jnp.asarray(counts),
        "tm": tm,
        "tk": tk,
        "n_nodes": n_nodes,
    }


def _vmem_plan(n_feat_pad, f_p, h_p, c_p, tm, tk):
    weights = (f_p * h_p + h_p + h_p * c_p + c_p) * 4 * 2      # resident, assume 2 buffers
    adj_buf = tm * tk * 2 * 2                                  # bf16, double-buffered
    out_buf = tm * c_p * 4 * 2
    acc_buf = tm * f_p * 4
    common = weights + adj_buf + out_buf + acc_buf
    resident = common + n_feat_pad * f_p * 4 * 2               # conservative: assume 2 buffers
    streamed = common + (tk + tm) * f_p * 4 * 2
    return resident, streamed


@functools.partial(jax.jit, static_argnames=("tm", "tk", "feat_resident"))
def _gin_forward_jit(adj_p, col_idx, counts, feat, w2, b2, w3, b3, eps,
                     *, tm, tk, feat_resident):
    n_nodes, nfeat = feat.shape
    nhid = w2.shape[1]
    nclass = w3.shape[1]
    n_pm, n_pk = adj_p.shape
    n_i = counts.shape[0]
    max_nb = col_idx.shape[0] // n_i

    f_p = _round_up(nfeat, LANE)
    h_p = _round_up(nhid, LANE)
    c_p = _round_up(nclass, LANE)
    n_feat_pad = max(n_pm, n_pk)

    resident_bytes, streamed_bytes = _vmem_plan(n_feat_pad, f_p, h_p, c_p, tm, tk)
    if feat_resident is None:
        feat_resident = resident_bytes <= _RESIDENT_FEAT_VMEM_BUDGET
    need = resident_bytes if feat_resident else streamed_bytes
    vmem_limit = int(min(max(int(need * 1.3) + (2 << 20), 32 << 20), 56 << 20))

    # lane-padded operands (zero padding is exact: contributes nothing to any matmul / sum)
    feat_p = jnp.zeros((n_feat_pad, f_p), jnp.float32).at[:n_nodes, :nfeat].set(
        feat.astype(jnp.float32))
    w2_p = jnp.zeros((f_p, h_p), jnp.float32).at[:nfeat, :nhid].set(w2)
    b2_p = jnp.zeros((1, h_p), jnp.float32).at[:, :nhid].set(b2.reshape(1, -1))
    w3_p = jnp.zeros((h_p, c_p), jnp.float32).at[:nhid, :nclass].set(w3)
    b3_p = jnp.zeros((1, c_p), jnp.float32).at[:, :nclass].set(b3.reshape(1, -1))

    eps_spec = pl.BlockSpec((1,), lambda i, k, ci, cnt: (0,),
                            memory_space=pltpu.MemorySpace.SMEM)
    # adjacency stream: block-sparse via scalar-prefetched column-block indices.
    adj_spec = pl.BlockSpec((tm, tk), lambda i, k, ci, cnt: (i, ci[i * max_nb + k]))
    weight_specs = [
        pl.BlockSpec((f_p, h_p), lambda i, k, ci, cnt: (0, 0)),    # W2^T (resident)
        pl.BlockSpec((1, h_p), lambda i, k, ci, cnt: (0, 0)),      # b2
        pl.BlockSpec((h_p, c_p), lambda i, k, ci, cnt: (0, 0)),    # W3^T (resident)
        pl.BlockSpec((1, c_p), lambda i, k, ci, cnt: (0, 0)),      # b3
    ]
    out_spec = pl.BlockSpec((tm, c_p), lambda i, k, ci, cnt: (i, 0))

    if feat_resident:
        kernel = functools.partial(gin_kernel_resident, nclass, tm, tk, max_nb)
        in_specs = ([eps_spec, adj_spec,
                     pl.BlockSpec((n_feat_pad, f_p), lambda i, k, ci, cnt: (0, 0))]
                    + weight_specs)
        operands = (eps, adj_p, feat_p, w2_p, b2_p, w3_p, b3_p)
    else:
        kernel = functools.partial(gin_kernel_streamed, nclass)
        in_specs = ([eps_spec, adj_spec,
                     pl.BlockSpec((tk, f_p), lambda i, k, ci, cnt: (ci[i * max_nb + k], 0)),
                     pl.BlockSpec((tm, f_p), lambda i, k, ci, cnt: (i, 0))]
                    + weight_specs)
        operands = (eps, adj_p, feat_p, feat_p, w2_p, b2_p, w3_p, b3_p)

    flops = (2 * n_i * max_nb * tm * tk * f_p
             + 2 * n_pm * f_p * h_p
             + 2 * n_pm * h_p * c_p)
    bytes_accessed = (n_i * max_nb * tm * tk * 2
                      + n_feat_pad * f_p * 4
                      + 4 * (f_p * h_p + h_p + h_p * c_p + c_p)
                      + n_pm * c_p * 4)
    cost = pl.CostEstimate(flops=flops, transcendentals=2 * n_pm * c_p,
                           bytes_accessed=bytes_accessed)

    out_p = pl.pallas_call(
        kernel,
        out_shape=jax.ShapeDtypeStruct((n_pm, c_p), jnp.float32),
        grid_spec=pltpu.PrefetchScalarGridSpec(
            num_scalar_prefetch=2,
            grid=(n_i, max_nb),
            in_specs=in_specs,
            out_specs=out_spec,
            scratch_shapes=[pltpu.VMEM((tm, f_p), jnp.float32)],   # aggregation accumulator
        ),
        compiler_params=pltpu.CompilerParams(
            dimension_semantics=("parallel", "arbitrary"),
            vmem_limit_bytes=vmem_limit),
        cost_estimate=cost,
    )(col_idx, counts, *operands)

    # slice away node / class padding
    return out_p[:n_nodes, :nclass]


def gin_forward(graph, feat, w2, b2, w3, b3, eps, *, feat_resident=None):
    """GIN forward (eval mode). `graph` is the dict returned by preprocess_graph."""
    return _gin_forward_jit(graph["adj"], graph["col_idx"], graph["counts"],
                            feat, w2, b2, w3, b3, eps,
                            tm=graph["tm"], tk=graph["tk"], feat_resident=feat_resident)


# ----------------------------------------------------------------------------- references / demo


def _torch_linear_init(key, fan_in, fan_out):
    """Deterministic init matching nn.Linear's U(-1/sqrt(fan_in), 1/sqrt(fan_in))."""
    kw, kb = jax.random.split(key)
    bound = 1.0 / math.sqrt(fan_in)
    # stored as (in, out) == W^T so the kernel computes x @ W^T directly
    w = jax.random.uniform(kw, (fan_in, fan_out), jnp.float32, -bound, bound)
    b = jax.random.uniform(kb, (1, fan_out), jnp.float32, -bound, bound)
    return w, b


def reference_forward(adj, feat, w2, b2, w3, b3, eps):
    """Mirrors the kernel numerics: bf16 adjacency matmul with f32 accumulation, rest in f32."""
    agg = jnp.dot(adj.astype(jnp.bfloat16), feat.astype(jnp.bfloat16),
                  preferred_element_type=jnp.float32)
    x = (1.0 + eps[0]) * feat + agg
    h = jnp.maximum(x @ w2 + b2, 0.0)
    logits = h @ w3 + b3
    return jax.nn.log_softmax(logits, axis=1)


def reference_forward_f32(adj, feat, w2, b2, w3, b3, eps):
    """True float32 reference (close to PyTorch f32 numerics)."""
    hp = jax.lax.Precision.HIGHEST
    x = (1.0 + eps[0]) * feat + jnp.dot(adj, feat, precision=hp)
    h = jnp.maximum(jnp.dot(x, w2, precision=hp) + b2, 0.0)
    logits = jnp.dot(h, w3, precision=hp) + b3
    return jax.nn.log_softmax(logits, axis=1)


if __name__ == "__main__":
    # Small GIN: N nodes, nfeat -> nhid -> nclass (Cora-like class count)
    N, nfeat, nhid, nclass = 1024, 64, 32, 7

    key = jax.random.PRNGKey(0)
    k_adj, k_feat, k_l2, k_l3 = jax.random.split(key, 4)

    # synthetic normalized adjacency: sparse, banded (so some adjacency blocks are all-zero and
    # the block-sparse skip path gets exercised), symmetric, self-loops, row-normalized
    idx = jnp.arange(N)
    band = jnp.abs(idx[:, None] - idx[None, :]) <= 192
    a = jnp.where((jax.random.uniform(k_adj, (N, N)) < 0.02) & band, 1.0, 0.0)
    a = jnp.maximum(a, a.T) + jnp.eye(N, dtype=jnp.float32)
    adj = a / jnp.sum(a, axis=1, keepdims=True)

    feat = jax.random.normal(k_feat, (N, nfeat), jnp.float32)

    # parameters (deterministic in-script init; GINConv init_eps = 0.03)
    eps = jnp.array([0.03], dtype=jnp.float32)
    w2, b2 = _torch_linear_init(k_l2, nfeat, nhid)
    w3, b3 = _torch_linear_init(k_l3, nhid, nclass)

    ref = reference_forward(adj, feat, w2, b2, w3, b3, eps)
    ref_f32 = reference_forward_f32(adj, feat, w2, b2, w3, b3, eps)

    # Config 1: auto tiles, VMEM-resident feature path (default for graphs this size).
    graph = preprocess_graph(adj)
    out = gin_forward(graph, feat, w2, b2, w3, b3, eps)
    jax.block_until_ready(out)
    assert out.shape == (N, nclass)
    err = float(jnp.max(jnp.abs(out - ref)))
    assert jnp.allclose(out, ref, atol=2e-3, rtol=2e-3), f"resident path mismatch (max err {err})"
    err32 = float(jnp.max(jnp.abs(out - ref_f32)))
    assert jnp.allclose(out, ref_f32, atol=3e-2, rtol=3e-2), (
        f"resident path vs f32 reference mismatch (max err {err32})")

    # Config 2: explicit small tiles + forced streamed-feat fallback; exercises the block-sparse
    # skip (all-zero adjacency blocks per row tile) and the second kernel variant.
    graph_s = preprocess_graph(adj, tm=128, tk=256)
    out_s = gin_forward(graph_s, feat, w2, b2, w3, b3, eps, feat_resident=False)
    jax.block_until_ready(out_s)
    err_s = float(jnp.max(jnp.abs(out_s - ref)))
    assert jnp.allclose(out_s, ref, atol=2e-3, rtol=2e-3), (
        f"streamed path mismatch (max err {err_s})")

    print("KERNEL_OK")
</pallas_src>

<mosaic_0001>
module attributes {stable_mosaic.version = 11 : i64} {
  func.func @gin_kernel_resident(%arg0: i32, %arg1: i32, %arg2: memref<4xi32, #tpu.memory_space<smem>>, %arg3: memref<4xi32, #tpu.memory_space<smem>>, %arg4: memref<1xf32, #tpu.memory_space<smem>>, %arg5: memref<256x1024xbf16, #tpu.memory_space<vmem>>, %arg6: memref<1024x128xf32, #tpu.memory_space<vmem>>, %arg7: memref<128x128xf32, #tpu.memory_space<vmem>>, %arg8: memref<1x128xf32, #tpu.memory_space<vmem>>, %arg9: memref<128x128xf32, #tpu.memory_space<vmem>>, %arg10: memref<1x128xf32, #tpu.memory_space<vmem>>, %arg11: memref<256x128xf32, #tpu.memory_space<vmem>>, %arg12: memref<256x128xf32, #tpu.memory_space<vmem>>) attributes {dimension_semantics = [#tpu.dimension_semantics<parallel>, #tpu.dimension_semantics<arbitrary>], iteration_bounds = array<i64: 4, 1>, scalar_prefetch = 2 : i64, scratch_operands = 1 : i64, tpu.core_type = #tpu.core_type<tc>, window_params = [{transform_indices = @transform_0, window_bounds = array<i64: 1>}, {transform_indices = @transform_1, window_bounds = array<i64: 256, 1024>}, {pipeline_mode = #tpu.pipeline_mode<synchronous>, transform_indices = @transform_2, window_bounds = array<i64: 1024, 128>}, {pipeline_mode = #tpu.pipeline_mode<synchronous>, transform_indices = @transform_3, window_bounds = array<i64: 128, 128>}, {pipeline_mode = #tpu.pipeline_mode<synchronous>, transform_indices = @transform_4, window_bounds = array<i64: 1, 128>}, {pipeline_mode = #tpu.pipeline_mode<synchronous>, transform_indices = @transform_5, window_bounds = array<i64: 128, 128>}, {pipeline_mode = #tpu.pipeline_mode<synchronous>, transform_indices = @transform_6, window_bounds = array<i64: 1, 128>}, {transform_indices = @transform_7, window_bounds = array<i64: 256, 128>}]} {
    %c0_i32 = arith.constant 0 : i32
    %0 = arith.cmpi eq, %arg1, %c0_i32 : i32
    %1 = arith.extui %0 : i1 to i32
    %c0_i32_0 = arith.constant 0 : i32
    %2 = arith.cmpi ne, %1, %c0_i32_0 : i32
    scf.if %2 {
      %cst = arith.constant 0.000000e+00 : f32
      %11 = vector.broadcast %cst : f32 to vector<256x128xf32>
      %c0 = arith.constant 0 : index
      %c0_4 = arith.constant 0 : index
      %12 = vector.load %arg12[%c0, %c0_4] : memref<256x128xf32, #tpu.memory_space<vmem>>, vector<256x128xf32>
      tpu.vector_store %arg12[%c0, %c0_4], %11 {strides = array<i32>} : memref<256x128xf32, #tpu.memory_space<vmem>>, vector<256x128xf32>,
    } else {
    }
    %3 = arith.index_cast %arg0 : i32 to index
    %4 = memref.load %arg3[%3] : memref<4xi32, #tpu.memory_space<smem>>
    %5 = arith.cmpi slt, %arg1, %4 : i32
    %6 = arith.extui %5 : i1 to i32
    %c0_i32_1 = arith.constant 0 : i32
    %7 = arith.cmpi ne, %6, %c0_i32_1 : i32
    scf.if %7 {
      %c1_i32 = arith.constant 1 : i32
      %11 = arith.muli %arg0, %c1_i32 : i32
      %12 = arith.addi %11, %arg1 : i32
      %13 = arith.index_cast %12 : i32 to index
      %14 = memref.load %arg2[%13] : memref<4xi32, #tpu.memory_space<smem>>
      %c1024_i32 = arith.constant 1024 : i32
      %15 = arith.muli %14, %c1024_i32 : i32
      %16 = tpu.assume_multiple %15, 1024 : i32
      %17 = arith.index_cast %16 : i32 to index
      %c0 = arith.constant 0 : index
      %18 = vector.load %arg6[%17, %c0] : memref<1024x128xf32, #tpu.memory_space<vmem>>, vector<1024x128xf32>
      %19 = arith.truncf %18 : vector<1024x128xf32> to vector<1024x128xbf16>
      %c0_4 = arith.constant 0 : index
      %c0_5 = arith.constant 0 : index
      %20 = vector.load %arg12[%c0_4, %c0_5] : memref<256x128xf32, #tpu.memory_space<vmem>>, vector<256x128xf32>
      %c0_6 = arith.constant 0 : index
      %c0_7 = arith.constant 0 : index
      %21 = vector.load %arg5[%c0_6, %c0_7] : memref<256x1024xbf16, #tpu.memory_space<vmem>>, vector<256x1024xbf16>
      %cst = arith.constant dense<0.000000e+00> : vector<256x128xf32>
      %22 = tpu.matmul %21, %19, %cst {dimension_numbers = #tpu.dot_dimension_numbers<[1], [0], [0], [1], [0, 0, 1, 1], [], []>} : vector<256x1024xbf16>, vector<1024x128xbf16>, vector<256x128xf32> -> vector<256x128xf32>
      %23 = arith.addf %20, %22 : vector<256x128xf32>
      %c0_8 = arith.constant 0 : index
      %c0_9 = arith.constant 0 : index
      %24 = vector.load %arg12[%c0_8, %c0_9] : memref<256x128xf32, #tpu.memory_space<vmem>>, vector<256x128xf32>
      tpu.vector_store %arg12[%c0_8, %c0_9], %23 {strides = array<i32>} : memref<256x128xf32, #tpu.memory_space<vmem>>, vector<256x128xf32>,
    } else {
    }
    %c0_i32_2 = arith.constant 0 : i32
    %8 = arith.cmpi eq, %arg1, %c0_i32_2 : i32
    %9 = arith.extui %8 : i1 to i32
    %c0_i32_3 = arith.constant 0 : i32
    %10 = arith.cmpi ne, %9, %c0_i32_3 : i32
    scf.if %10 {
      %c256_i32 = arith.constant 256 : i32
      %11 = arith.muli %arg0, %c256_i32 : i32
      %12 = tpu.assume_multiple %11, 256 : i32
      %13 = arith.index_cast %12 : i32 to index
      %c0 = arith.constant 0 : index
      %14 = vector.load %arg6[%13, %c0] : memref<1024x128xf32, #tpu.memory_space<vmem>>, vector<256x128xf32>
      %c0_4 = arith.constant 0 : index
      %15 = memref.load %arg4[%c0_4] : memref<1xf32, #tpu.memory_space<smem>>
      %c0_5 = arith.constant 0 : index
      %c0_6 = arith.constant 0 : index
      %16 = vector.load %arg12[%c0_5, %c0_6] : memref<256x128xf32, #tpu.memory_space<vmem>>, vector<256x128xf32>
      %cst = arith.constant 1.000000e+00 : f32
      %17 = arith.addf %cst, %15 : f32
      %18 = vector.broadcast %17 : f32 to vector<256x128xf32>
      %19 = arith.mulf %18, %14 : vector<256x128xf32>
      %20 = arith.addf %19, %16 : vector<256x128xf32>
      %c0_7 = arith.constant 0 : index
      %c0_8 = arith.constant 0 : index
      %21 = vector.load %arg7[%c0_7, %c0_8] : memref<128x128xf32, #tpu.memory_space<vmem>>, vector<128x128xf32>
      %cst_9 = arith.constant dense<0.000000e+00> : vector<256x128xf32>
      %22 = tpu.matmul %20, %21, %cst_9 {dimension_numbers = #tpu.dot_dimension_numbers<[1], [0], [0], [1], [0, 0, 1, 1], [], []>} : vector<256x128xf32>, vector<128x128xf32>, vector<256x128xf32> -> vector<256x128xf32>
      %c0_10 = arith.constant 0 : index
      %c0_11 = arith.constant 0 : index
      %23 = vector.load %arg8[%c0_10, %c0_11] : memref<1x128xf32, #tpu.memory_space<vmem>>, vector<1x128xf32>
      %24 = vector.broadcast %23 : vector<1x128xf32> to vector<256x128xf32>
      %25 = arith.addf %22, %24 : vector<256x128xf32>
      %cst_12 = arith.constant 0.000000e+00 : f32
      %26 = vector.broadcast %cst_12 : f32 to vector<256x128xf32>
      %27 = arith.maximumf %25, %26 : vector<256x128xf32>
      %c0_13 = arith.constant 0 : index
      %c0_14 = arith.constant 0 : index
      %28 = vector.load %arg9[%c0_13, %c0_14] : memref<128x128xf32, #tpu.memory_space<vmem>>, vector<128x128xf32>
      %cst_15 = arith.constant dense<0.000000e+00> : vector<256x128xf32>
      %29 = tpu.matmul %27, %28, %cst_15 {dimension_numbers = #tpu.dot_dimension_numbers<[1], [0], [0], [1], [0, 0, 1, 1], [], []>} : vector<256x128xf32>, vector<128x128xf32>, vector<256x128xf32> -> vector<256x128xf32>
      %c0_16 = arith.constant 0 : index
      %c0_17 = arith.constant 0 : index
      %30 = vector.load %arg10[%c0_16, %c0_17] : memref<1x128xf32, #tpu.memory_space<vmem>>, vector<1x128xf32>
      %31 = vector.broadcast %30 : vector<1x128xf32> to vector<256x128xf32>
      %32 = arith.addf %29, %31 : vector<256x128xf32>
      %33 = tpu.iota {dimensions = array<i32: 1>} : vector<256x128xi32>
      %c7_i32 = arith.constant 7 : i32
      %34 = vector.broadcast %c7_i32 : i32 to vector<256x128xi32>
      %35 = arith.cmpi slt, %33, %34 : vector<256x128xi32>
      %cst_18 = arith.constant -1.000000e+30 : f32
      %36 = vector.broadcast %cst_18 : f32 to vector<256x128xf32>
      %37 = arith.select %35, %32, %36 : vector<256x128xi1>, vector<256x128xf32>
      %cst_19 = arith.constant dense<0xFF800000> : vector<256xf32>
      %38 = vector.multi_reduction <maximumf>, %37, %cst_19 [1] : vector<256x128xf32> to vector<256xf32>
      %39 = vector.shape_cast %38 : vector<256xf32> to vector<256x1xf32>
      %40 = vector.broadcast %39 : vector<256x1xf32> to vector<256x128xf32>
      %41 = arith.subf %37, %40 : vector<256x128xf32>
      %42 = math.exp %41 : vector<256x128xf32>
      %cst_20 = arith.constant dense<0.000000e+00> : vector<256xf32>
      %43 = vector.multi_reduction <add>, %42, %cst_20 [1] : vector<256x128xf32> to vector<256xf32>
      %44 = vector.shape_cast %43 : vector<256xf32> to vector<256x1xf32>
      %45 = math.log %44 : vector<256x1xf32>
      %46 = vector.broadcast %45 : vector<256x1xf32> to vector<256x128xf32>
      %47 = arith.subf %41, %46 : vector<256x128xf32>
      %c0_21 = arith.constant 0 : index
      %c0_22 = arith.constant 0 : index
      %48 = vector.load %arg11[%c0_21, %c0_22] : memref<256x128xf32, #tpu.memory_space<vmem>>, vector<256x128xf32>
      tpu.vector_store %arg11[%c0_21, %c0_22], %47 {strides = array<i32>} : memref<256x128xf32, #tpu.memory_space<vmem>>, vector<256x128xf32>,
    } else {
    }
    return
  }
  func.func @transform_0(%arg0: i32, %arg1: i32, %arg2: memref<4xi32, #tpu.memory_space<smem>>, %arg3: memref<4xi32, #tpu.memory_space<smem>>) -> i32 {
    %c0_i32 = arith.constant 0 : i32
    %c0_i32_0 = arith.constant 0 : i32
    return %c0_i32 : i32
  }
  func.func @transform_1(%arg0: i32, %arg1: i32, %arg2: memref<4xi32, #tpu.memory_space<smem>>, %arg3: memref<4xi32, #tpu.memory_space<smem>>) -> (i32, i32) {
    %c1_i32 = arith.constant 1 : i32
    %0 = arith.muli %arg0, %c1_i32 : i32
    %1 = arith.addi %0, %arg1 : i32
    %2 = arith.index_cast %1 : i32 to index
    %3 = memref.load %arg2[%2] : memref<4xi32, #tpu.memory_space<smem>>
    %c0_i32 = arith.constant 0 : i32
    return %arg0, %3 : i32, i32
  }
  func.func @transform_2(%arg0: i32, %arg1: i32, %arg2: memref<4xi32, #tpu.memory_space<smem>>, %arg3: memref<4xi32, #tpu.memory_space<smem>>) -> (i32, i32) {
    %c0_i32 = arith.constant 0 : i32
    %c0_i32_0 = arith.constant 0 : i32
    %c0_i32_1 = arith.constant 0 : i32
    return %c0_i32, %c0_i32_0 : i32, i32
  }
  func.func @transform_3(%arg0: i32, %arg1: i32, %arg2: memref<4xi32, #tpu.memory_space<smem>>, %arg3: memref<4xi32, #tpu.memory_space<smem>>) -> (i32, i32) {
    %c0_i32 = arith.constant 0 : i32
    %c0_i32_0 = arith.constant 0 : i32
    %c0_i32_1 = arith.constant 0 : i32
    return %c0_i32, %c0_i32_0 : i32, i32
  }
  func.func @transform_4(%arg0: i32, %arg1: i32, %arg2: memref<4xi32, #tpu.memory_space<smem>>, %arg3: memref<4xi32, #tpu.memory_space<smem>>) -> (i32, i32) {
    %c0_i32 = arith.constant 0 : i32
    %c0_i32_0 = arith.constant 0 : i32
    %c0_i32_1 = arith.constant 0 : i32
    return %c0_i32, %c0_i32_0 : i32, i32
  }
  func.func @transform_5(%arg0: i32, %arg1: i32, %arg2: memref<4xi32, #tpu.memory_space<smem>>, %arg3: memref<4xi32, #tpu.memory_space<smem>>) -> (i32, i32) {
    %c0_i32 = arith.constant 0 : i32
    %c0_i32_0 = arith.constant 0 : i32
    %c0_i32_1 = arith.constant 0 : i32
    return %c0_i32, %c0_i32_0 : i32, i32
  }
  func.func @transform_6(%arg0: i32, %arg1: i32, %arg2: memref<4xi32, #tpu.memory_space<smem>>, %arg3: memref<4xi32, #tpu.memory_space<smem>>) -> (i32, i32) {
    %c0_i32 = arith.constant 0 : i32
    %c0_i32_0 = arith.constant 0 : i32
    %c0_i32_1 = arith.constant 0 : i32
    return %c0_i32, %c0_i32_0 : i32, i32
  }
  func.func @transform_7(%arg0: i32, %arg1: i32, %arg2: memref<4xi32, #tpu.memory_space<smem>>, %arg3: memref<4xi32, #tpu.memory_space<smem>>) -> (i32, i32) {
    %c0_i32 = arith.constant 0 : i32
    %c0_i32_0 = arith.constant 0 : i32
    return %arg0, %c0_i32 : i32, i32
  }
}

</mosaic_0001>

<bundles_post_ra>
// kernel: _gin_forward_jit.1
= control target key start
LH: loop header
LB: loop body
LE: loop exit
PB: predicated region body
PF: predicated region fallthrough
CT: control target
= control target key end

     0   :  { %s5431_s0 = inlined_call_operand.vmem [shape: s32[4], index: 0, kind: input, shape index: {}]   ;;  %s5432_s3 = inlined_call_operand.vmem [shape: bf16[1024,1024], index: 3, kind: input, shape index: {}]   ;;  %s5433_s4 = inlined_call_operand.vmem [shape: f32[1024,128], index: 4, kind: input, shape index: {}]   ;;  %s5434_s5 = inlined_call_operand.vmem [shape: f32[128,128], index: 5, kind: input, shape index: {}]   ;;  %s5435_s6 = inlined_call_operand.vmem [shape: f32[1,128], index: 6, kind: input, shape index: {}]   ;;  %s5436_s7 = inlined_call_operand.vmem [shape: f32[128,128], index: 7, kind: input, shape index: {}]   ;;  %s5437_s8 = inlined_call_operand.vmem [shape: f32[1,128], index: 8, kind: input, shape index: {}]   ;;  %s5438_s9 = inlined_call_operand.vmem [shape: f32[1024,128], index: 9, kind: output, shape index: {}]   ;;  %s5439_s1 = inlined_call_operand.vmem [shape: s32[4], index: 1, kind: input, shape index: {}]   ;;  %s5440_s2 = inlined_call_operand.<no memory space> [shape: f32[1], index: 2, kind: input, shape index: {}]  }
   0x1   :  { %s14_s11 = sshll.u32 %s5431_s0, 4  ;;  %s18_s14 = sshll.u32 %s5439_s1, 4  ;;  %s15_s11 = int_to_ptr.vmem [resolvable:$true] %s14_s11  ;;  %s19_s14 = int_to_ptr.vmem [resolvable:$true] %s18_s14 }
   0x2   :  { %s4218_s15 = scalar_lea.vmem %s15_s11, 16  ;;  %p4223_p1 = scmp.lt.s32.totalorder %s15_s11, %s15_s11 }
   0x3   :  { %p4219_p0 = scmp.ne.s32.totalorder %s15_s11, %s4218_s15  ;;  %p4224_p2 = scmp.lt.s32.totalorder %s4218_s15, %s4218_s15 }
   0x5   :  { %p4225_p3 = por %p4224_p2, %p4223_p1 }
   0x7   :  { %p4226_p4 = pnand %p4225_p3, %p4219_p0 }
   0x9   :  { %4229 = shalt.err (!%p4226_p4)  }
   0xa   :  { %s4268_s16 = smov [#allocation4]   ;;  %s4230_s17 = scalar_lea.vmem %s19_s14, 16 }
   0xb   :  { %17 = dma.vmem_to_smem %s15_s11, 16, %s4268_s16, [#allocation3] }
   0xc   :  { %p4231_p5 = scmp.ne.s32.totalorder %s19_s14, %s4230_s17  ;;  %p4235_p6 = scmp.lt.s32.totalorder %s19_s14, %s19_s14 }
   0xd   :  { %p4236_p7 = scmp.lt.s32.totalorder %s4230_s17, %s4230_s17 }
   0xf   :  { %p4237_p8 = por %p4236_p7, %p4235_p6 }
  0x11   :  { %p4238_p9 = pnand %p4237_p8, %p4231_p5 }
  0x13   :  { %4241 = shalt.err (!%p4238_p9)  }
  0x14   :  { %s4269_s0 = smov [#allocation5]   ;;  %22 = sst [smem:[#allocation6]] %s5440_s2 }
  0x15   :  { %21 = dma.vmem_to_smem %s19_s14, 16, %s4269_s0, [#allocation3] }
  0x16   :  { %4254 = dma.done.wait [#allocation3], 32 }
  0x17   :  { %4255 = vsyncadd [#allocation3], 4294967264 }
  0x18   :  { %24 = sfence }
  0x19   :  { %s4330_s19 = smov 0   ;;  %s4332_s20 = smov 0  }
  0x1a   :  { %s4334_s21 = smov 0  }
  0x1b LB: > { %s42_s2 = sadd.s32 1, %s4262_s20  ;;  %p3216_p10 = scmp.ge.s32.totalorder %s4266_s21, 1  ;;  %s4266_s21 = sphi %s4334_s21, %s30_s21   ;;  %s4262_s20 = sphi %s4332_s20, %s5443_s20   ;;  %s4258_s19 = sphi %s4330_s19, %s5442_s19  }
  0x1c   : > { %p44_p11 = scmp.ge.s32.totalorder %s42_s2, 4  ;;  %p279_p12 = scmp.lt.s32.totalorder %s4266_s21, 5 }
  0x1e   : > { %s5445_s2 = smov (%p44_p11, %s42_s2), 0  ;;  %p280_p13 = pnand %p3216_p10, %p279_p12 }
  0x1f   : > { %s4351_s22 = sld [smem:[#allocation4 + %s4258_s19]] (!%p280_p13)  ;;  %s3217_s23 = sshll.u32 (!%p280_p13), %s4258_s19, 5 }
  0x20   : > { %283 = sbr.rel (%p280_p13) target bundleno = 1354 (0x54a), region = 48  ;;  %p4356_p0 = scmp.lt.s32.totalorder (!%p280_p13), %s3217_s23, 127 }
  0x21   : > { %s377_s25 = sld [smem:[#allocation5 + %s4258_s19]] (!%p280_p13) }
  0x25   : > { %v4270_v0 = vmov 0.0   ;;  %s5447_s23 = smov (!%p4356_p0, %s3217_s23), 127  ;;  %s3218_s27 = sshll.u32 %s4351_s22, 3 }
  0x26   : > { %345 = vst [vmem:[#allocation2 + $0xb0] sm:$0xff] %v4270_v0  ;;  %346 = vst [vmem:[#allocation2] sm:$0xff] %v4270_v0  ;;  %s3219_s26 = sshll.u32 %s5447_s23, 3  ;;  %p324_p1 = scmp.lt.s32.totalorder %s3218_s27, 7 }
  0x27   : > { %347 = vst [vmem:[#allocation2 + $0xd8] sm:$0xff] %v4270_v0  ;;  %348 = vst [vmem:[#allocation2 + $0x18] sm:$0xff] %v4270_v0  ;;  %s4369_s30 = scalar_lea.vmem %s5438_s9, %s3219_s26  ;;  %p3224_p2 = scmp.le.s32.totalorder %s377_s25, 0 }
  0x28   : > { %349 = vst [vmem:[#allocation2 + $0x50] sm:$0xff] %v4270_v0  ;;  %350 = vst [vmem:[#allocation2 + $0x68] sm:$0xff] %v4270_v0  ;;  %s5449_s27 = smov (!%p324_p1, %s3218_s27), 7  ;;  %s383_s15 = sld [smem:[#allocation4 + %s4258_s19]] (!%p3224_p2) }
  0x29   : > { %351 = vst [vmem:[#allocation2 + $0x30] sm:$0xff] %v4270_v0  ;;  %352 = vst [vmem:[#allocation2 + $0x48] sm:$0xff] %v4270_v0  ;;  %s327_s10 = sadd.s32 %s3219_s26, %s5449_s27 }
  0x2a   : > { %353 = vst [vmem:[#allocation2 + $0x80] sm:$0xff] %v4270_v0  ;;  %354 = vst [vmem:[#allocation2 + $0x88] sm:$0xff] %v4270_v0  ;;  %s3220_s11 = sshll.u32 %s327_s10, 2 }
  0x2b   : > { %355 = vst [vmem:[#allocation2 + $0xe8] sm:$0xff] %v4270_v0  ;;  %356 = vst [vmem:[#allocation2 + $0xb8] sm:$0xff] %v4270_v0  ;;  %s4374_s14 = scalar_lea.vmem %s5432_s3, %s3220_s11 }
  0x2c   : > { %357 = vst [vmem:[#allocation2 + $0x60] sm:$0xff] %v4270_v0  ;;  %358 = vst [vmem:[#allocation2 + $0xf0] sm:$0xff] %v4270_v0 }
  0x2d   : > { %359 = vst [vmem:[#allocation2 + $0x8] sm:$0xff] %v4270_v0  ;;  %360 = vst [vmem:[#allocation2 + $0x78] sm:$0xff] %v4270_v0 }
  0x2e   : > { %361 = vst [vmem:[#allocation2 + $0x38] sm:$0xff] %v4270_v0  ;;  %362 = vst [vmem:[#allocation2 + $0x58] sm:$0xff] %v4270_v0  ;;  %s3225_s16 = sshll.u32 (!%p3224_p2), %s383_s15, 10 }
  0x2f   : > { %363 = vst [vmem:[#allocation2 + $0x40] sm:$0xff] %v4270_v0  ;;  %364 = vst [vmem:[#allocation2 + $0xc8] sm:$0xff] %v4270_v0  ;;  %s4396_s1 = scalar_lea.vmem (!%p3224_p2), %s5433_s4, %s3225_s16 }
  0x30   : > { %365 = vst [vmem:[#allocation2 + $0xe0] sm:$0xff] %v4270_v0  ;;  %366 = vst [vmem:[#allocation2 + $0x90] sm:$0xff] %v4270_v0 }
  0x31   : > { %367 = vst [vmem:[#allocation2 + $0x70] sm:$0xff] %v4270_v0  ;;  %368 = vst [vmem:[#allocation2 + $0xc0] sm:$0xff] %v4270_v0  ;;  %381 = sbr.rel (%p3224_p2) target bundleno = 547 (0x223), region = 56 }
  0x32   : > { %369 = vst [vmem:[#allocation2 + $0xa8] sm:$0xff] %v4270_v0  ;;  %370 = vst [vmem:[#allocation2 + $0xd0] sm:$0xff] %v4270_v0 }
  0x33   : > { %371 = vst [vmem:[#allocation2 + $0x10] sm:$0xff] %v4270_v0  ;;  %372 = vst [vmem:[#allocation2 + $0x28] sm:$0xff] %v4270_v0 }
  0x34   : > { %373 = vst [vmem:[#allocation2 + $0xa0] sm:$0xff] %v4270_v0  ;;  %374 = vst [vmem:[#allocation2 + $0xf8] sm:$0xff] %v4270_v0 }
  0x35   : > { %375 = vst [vmem:[#allocation2 + $0x20] sm:$0xff] %v4270_v0  ;;  %376 = vst [vmem:[#allocation2 + $0x98] sm:$0xff] %v4270_v0 }
  0x36   : > { %v4378_v1 = vld [vmem:[%s4374_s14] sm:$0xff]  ;;  %v4384_v3 = vld [vmem:[%s4374_s14 + $0x8] sm:$0xff]  ;;  %v416_v7 = vld [vmem:[%s4396_s1 + $0xf0] sm:$0xff] }
  0x37   : > { %v4381_v2 = vld [vmem:[%s4374_s14 + $0x20] sm:$0xff]  ;;  %v4389_v5 = vld [vmem:[%s4374_s14 + $0x28] sm:$0xff]  ;;  %v417_v8 = vld [vmem:[%s4396_s1 + $0xf8] sm:$0xff] }
  0x38   : > { %v3227_v4 = vcombine.high %v4378_v1, %v4381_v2  ;;  %v3229_v6 = vcombine.high %v4384_v3, %v4389_v5  ;;  %v448_v9 = vld [vmem:[%s4396_s1 + $0x1f0] sm:$0xff]  ;;  %v529_v10 = vpack.c.bf16 %v417_v8, %v416_v7  ;;  %v449_v11 = vld [vmem:[%s4396_s1 + $0x1f8] sm:$0xff]  ;;  %v414_v18 = vld [vmem:[%s4396_s1 + $0xe0] sm:$0xff] }
  0x39   : > { %v400_v12 = vld [vmem:[%s4396_s1 + $0x70] sm:$0xff]  ;;  %v401_v13 = vld [vmem:[%s4396_s1 + $0x78] sm:$0xff]  ;;  %v545_v14 = vpack.c.bf16 %v449_v11, %v448_v9  ;;  %v415_v20 = vld [vmem:[%s4396_s1 + $0xe8] sm:$0xff] }
  0x3a   : > { %1410 = vmatprep.mubr.bf16.mxu0 %v3227_v4  ;;  %1571 = vmatprep.mubr.bf16.mxu1 %v3229_v6  ;;  %v521_v15 = vpack.c.bf16 %v401_v13, %v400_v12  ;;  %v432_v16 = vld [vmem:[%s4396_s1 + $0x170] sm:$0xff]  ;;  %v433_v17 = vld [vmem:[%s4396_s1 + $0x178] sm:$0xff]  ;;  %v446_v21 = vld [vmem:[%s4396_s1 + $0x1e0] sm:$0xff]  ;;  %v528_v23 = vpack.c.bf16 %v415_v20, %v414_v18 }
  0x3b   : > { %3359 = vmatprep.subr.bf16.mxu0 %v529_v10  ;;  %v537_v19 = vpack.c.bf16 %v433_v17, %v432_v16  ;;  %v447_v22 = vld [vmem:[%s4396_s1 + $0x1e8] sm:$0xff]  ;;  %3471 = vmatprep.subr.bf16.mxu1 %v545_v14  ;;  %v398_v25 = vld [vmem:[%s4396_s1 + $0x60] sm:$0xff]  ;;  %v412_v30 = vld [vmem:[%s4396_s1 + $0xd0] sm:$0xff] }
  0x3c   : > { %3360 = vmatpush3.bf16.msra.mxu0 %v521_v15  ;;  %v544_v24 = vpack.c.bf16 %v447_v22, %v446_v21  ;;  %v399_v26 = vld [vmem:[%s4396_s1 + $0x68] sm:$0xff]  ;;  %v430_v27 = vld [vmem:[%s4396_s1 + $0x160] sm:$0xff]  ;;  %v413_v31 = vld [vmem:[%s4396_s1 + $0xd8] sm:$0xff] }
  0x3d   : > { %3472 = vmatpush3.bf16.msra.mxu1 %v537_v19  ;;  %v520_v28 = vpack.c.bf16 %v399_v26, %v398_v25  ;;  %v431_v29 = vld [vmem:[%s4396_s1 + $0x168] sm:$0xff]  ;;  %3361 = vmatprep.subr.bf16.mxu0 %v528_v23  ;;  %v527_v33 = vpack.c.bf16 %v413_v31, %v412_v30  ;;  %v444_v34 = vld [vmem:[%s4396_s1 + $0x1d0] sm:$0xff]  ;;  %v445_v35 = vld [vmem:[%s4396_s1 + $0x1d8] sm:$0xff] }
  0x3e   : > { %3473 = vmatprep.subr.bf16.mxu1 %v544_v24  ;;  %v536_v32 = vpack.c.bf16 %v431_v29, %v430_v27  ;;  %v396_v36 = vld [vmem:[%s4396_s1 + $0x50] sm:$0xff]  ;;  %v543_v37 = vpack.c.bf16 %v445_v35, %v444_v34  ;;  %v397_v38 = vld [vmem:[%s4396_s1 + $0x58] sm:$0xff]  ;;  %v410_v42 = vld [vmem:[%s4396_s1 + $0xc0] sm:$0xff] }
  0x3f   : > { %v428_v39 = vld [vmem:[%s4396_s1 + $0x150] sm:$0xff]  ;;  %v429_v40 = vld [vmem:[%s4396_s1 + $0x158] sm:$0xff]  ;;  %v519_v41 = vpack.c.bf16 %v397_v38, %v396_v36  ;;  %v411_v43 = vld [vmem:[%s4396_s1 + $0xc8] sm:$0xff] }
  0x40   : > { %3362 = vmatpush3.bf16.msra.mxu0 %v520_v28  ;;  %v442_v44 = vld [vmem:[%s4396_s1 + $0x1c0] sm:$0xff]  ;;  %v535_v45 = vpack.c.bf16 %v429_v40, %v428_v39  ;;  %v526_v46 = vpack.c.bf16 %v411_v43, %v410_v42  ;;  %v443_v47 = vld [vmem:[%s4396_s1 + $0x1c8] sm:$0xff]  ;;  %v408_v53 = vld [vmem:[%s4396_s1 + $0xb0] sm:$0xff] }
  0x41   : > { %3474 = vmatpush3.bf16.msra.mxu1 %v536_v32  ;;  %3363 = vmatprep.subr.bf16.mxu0 %v527_v33  ;;  %v394_v48 = vld [vmem:[%s4396_s1 + $0x40] sm:$0xff]  ;;  %v395_v49 = vld [vmem:[%s4396_s1 + $0x48] sm:$0xff]  ;;  %v542_v50 = vpack.c.bf16 %v443_v47, %v442_v44  ;;  %v409_v54 = vld [vmem:[%s4396_s1 + $0xb8] sm:$0xff] }
  0x42   : > { %3475 = vmatprep.subr.bf16.mxu1 %v543_v37  ;;  %v426_v51 = vld [vmem:[%s4396_s1 + $0x140] sm:$0xff]  ;;  %v427_v52 = vld [vmem:[%s4396_s1 + $0x148] sm:$0xff]  ;;  %v440_v55 = vld [vmem:[%s4396_s1 + $0x1b0] sm:$0xff]  ;;  %v518_v57 = vpack.c.bf16 %v395_v49, %v394_v48  ;;  %v525_v59 = vpack.c.bf16 %v409_v54, %v408_v53 }
  0x43   : > { %v441_v56 = vld [vmem:[%s4396_s1 + $0x1b8] sm:$0xff]  ;;  %v534_v58 = vpack.c.bf16 %v427_v52, %v426_v51  ;;  %v392_v60 = vld [vmem:[%s4396_s1 + $0x30] sm:$0xff]  ;;  %v406_v4 = vld [vmem:[%s4396_s1 + $0xa0] sm:$0xff] }
  0x44   : > { %3364 = vmatpush3.bf16.msra.mxu0 %v519_v41  ;;  %v393_v61 = vld [vmem:[%s4396_s1 + $0x38] sm:$0xff]  ;;  %v424_v62 = vld [vmem:[%s4396_s1 + $0x130] sm:$0xff]  ;;  %v541_v63 = vpack.c.bf16 %v441_v56, %v440_v55  ;;  %v407_v6 = vld [vmem:[%s4396_s1 + $0xa8] sm:$0xff]  ;;  %v3226_v56 = vcombine.low %v4378_v1, %v4381_v2 }
  0x45   : > { %3476 = vmatpush3.bf16.msra.mxu1 %v535_v45  ;;  %3365 = vmatprep.subr.bf16.mxu0 %v526_v46  ;;  %v425_v0 = vld [vmem:[%s4396_s1 + $0x138] sm:$0xff]  ;;  %v438_v7 = vld [vmem:[%s4396_s1 + $0x1a0] sm:$0xff]  ;;  %v439_v8 = vld [vmem:[%s4396_s1 + $0x1a8] sm:$0xff]  ;;  %v517_v9 = vpack.c.bf16 %v393_v61, %v392_v60  ;;  %v524_v11 = vpack.c.bf16 %v407_v6, %v406_v4  ;;  %v3228_v60 = vcombine.low %v4384_v3, %v4389_v5 }
  0x46   : > { %3477 = vmatprep.subr.bf16.mxu1 %v542_v50  ;;  %v533_v10 = vpack.c.bf16 %v425_v0, %v424_v62  ;;  %v390_v12 = vld [vmem:[%s4396_s1 + $0x20] sm:$0xff]  ;;  %v391_v13 = vld [vmem:[%s4396_s1 + $0x28] sm:$0xff]  ;;  %v540_v15 = vpack.c.bf16 %v439_v8, %v438_v7  ;;  %v404_v17 = vld [vmem:[%s4396_s1 + $0x90] sm:$0xff] }
  0x47   : > { %v422_v14 = vld [vmem:[%s4396_s1 + $0x120] sm:$0xff]  ;;  %v423_v16 = vld [vmem:[%s4396_s1 + $0x128] sm:$0xff]  ;;  %v405_v18 = vld [vmem:[%s4396_s1 + $0x98] sm:$0xff]  ;;  %v516_v21 = vpack.c.bf16 %v391_v13, %v390_v12 }
  0x48   : > { %3366 = vmatpush3.bf16.msra.mxu0 %v518_v57  ;;  %v436_v19 = vld [vmem:[%s4396_s1 + $0x190] sm:$0xff]  ;;  %v437_v20 = vld [vmem:[%s4396_s1 + $0x198] sm:$0xff]  ;;  %v532_v22 = vpack.c.bf16 %v423_v16, %v422_v14  ;;  %v523_v23 = vpack.c.bf16 %v405_v18, %v404_v17  ;;  %v402_v29 = vld [vmem:[%s4396_s1 + $0x80] sm:$0xff] }
  0x49   : > { %3478 = vmatpush3.bf16.msra.mxu1 %v534_v58  ;;  %3367 = vmatprep.subr.bf16.mxu0 %v525_v59  ;;  %v388_v24 = vld [vmem:[%s4396_s1 + $0x10] sm:$0xff]  ;;  %v389_v25 = vld [vmem:[%s4396_s1 + $0x18] sm:$0xff]  ;;  %v539_v27 = vpack.c.bf16 %v437_v20, %v436_v19  ;;  %v403_v30 = vld [vmem:[%s4396_s1 + $0x88] sm:$0xff] }
  0x4a   : > { %3479 = vmatprep.subr.bf16.mxu1 %v541_v63  ;;  %v420_v26 = vld [vmem:[%s4396_s1 + $0x110] sm:$0xff]  ;;  %v421_v28 = vld [vmem:[%s4396_s1 + $0x118] sm:$0xff]  ;;  %v434_v31 = vld [vmem:[%s4396_s1 + $0x180] sm:$0xff]  ;;  %v515_v33 = vpack.c.bf16 %v389_v25, %v388_v24  ;;  %v522_v35 = vpack.c.bf16 %v403_v30, %v402_v29 }
  0x4b   : > { %v435_v32 = vld [vmem:[%s4396_s1 + $0x188] sm:$0xff]  ;;  %v531_v34 = vpack.c.bf16 %v421_v28, %v420_v26  ;;  %v386_v36 = vld [vmem:[%s4396_s1] sm:$0xff]  ;;  %v480_v41 = vld [vmem:[%s4396_s1 + $0x2f0] sm:$0xff] }
  0x4c   : > { %3368 = vmatpush3.bf16.msra.mxu0 %v517_v9  ;;  %v387_v37 = vld [vmem:[%s4396_s1 + $0x8] sm:$0xff]  ;;  %v418_v38 = vld [vmem:[%s4396_s1 + $0x100] sm:$0xff]  ;;  %v538_v39 = vpack.c.bf16 %v435_v32, %v434_v31  ;;  %v481_v42 = vld [vmem:[%s4396_s1 + $0x2f8] sm:$0xff] }
  0x4d   : > { %3480 = vmatpush3.bf16.msra.mxu1 %v533_v10  ;;  %3369 = vmatprep.subr.bf16.mxu0 %v524_v11  ;;  %v419_v40 = vld [vmem:[%s4396_s1 + $0x108] sm:$0xff]  ;;  %v512_v43 = vld [vmem:[%s4396_s1 + $0x3f0] sm:$0xff]  ;;  %v513_v44 = vld [vmem:[%s4396_s1 + $0x3f8] sm:$0xff]  ;;  %v514_v45 = vpack.c.bf16 %v387_v37, %v386_v36  ;;  %v561_v48 = vpack.c.bf16 %v481_v42, %v480_v41 }
  0x4e   : > { %3481 = vmatprep.subr.bf16.mxu1 %v540_v15  ;;  %v4467_v46 = vld [vmem:[%s4374_s14 + $0x40] sm:$0xff]  ;;  %v530_v47 = vpack.c.bf16 %v419_v40, %v418_v38  ;;  %v464_v49 = vld [vmem:[%s4396_s1 + $0x270] sm:$0xff]  ;;  %v465_v50 = vld [vmem:[%s4396_s1 + $0x278] sm:$0xff]  ;;  %v577_v52 = vpack.c.bf16 %v513_v44, %v512_v43 }
  0x4f   : > { %v4472_v51 = vld [vmem:[%s4374_s14 + $0x60] sm:$0xff]  ;;  %v496_v53 = vld [vmem:[%s4396_s1 + $0x370] sm:$0xff]  ;;  %v497_v54 = vld [vmem:[%s4396_s1 + $0x378] sm:$0xff]  ;;  %v553_v61 = vpack.c.bf16 %v465_v50, %v464_v49 }
  0x50   : > { %3370 = vmatpush3.bf16.msra.mxu0 %v516_v21  ;;  %v4477_v55 = vld [vmem:[%s4374_s14 + $0x48] sm:$0xff]  ;;  %v478_v58 = vld [vmem:[%s4396_s1 + $0x2e0] sm:$0xff]  ;;  %v569_v0 = vpack.c.bf16 %v497_v54, %v496_v53  ;;  %v3235_v1 = vcombine.high %v4467_v46, %v4472_v51  ;;  %v476_v8 = vld [vmem:[%s4396_s1 + $0x2d0] sm:$0xff]  ;;  %v3234_v24 = vcombine.low %v4467_v46, %v4472_v51 }
  0x51   : > { %3482 = vmatpush3.bf16.msra.mxu1 %v532_v22  ;;  %3371 = vmatprep.subr.bf16.mxu0 %v523_v23  ;;  %v4482_v57 = vld [vmem:[%s4374_s14 + $0x68] sm:$0xff]  ;;  %v510_v62 = vld [vmem:[%s4396_s1 + $0x3e0] sm:$0xff]  ;;  %v477_v9 = vld [vmem:[%s4396_s1 + $0x2d8] sm:$0xff] }
  0x52   : > { %3483 = vmatprep.subr.bf16.mxu1 %v539_v27  ;;  %v479_v59 = vld [vmem:[%s4396_s1 + $0x2e8] sm:$0xff]  ;;  %v462_v2 = vld [vmem:[%s4396_s1 + $0x260] sm:$0xff]  ;;  %v3237_v3 = vcombine.high %v4477_v55, %v4482_v57  ;;  %v508_v11 = vld [vmem:[%s4396_s1 + $0x3d0] sm:$0xff]  ;;  %v559_v19 = vpack.c.bf16 %v477_v9, %v476_v8  ;;  %v3236_v28 = vcombine.low %v4477_v55, %v4482_v57 }
  0x53   : > { %v511_v63 = vld [vmem:[%s4396_s1 + $0x3e8] sm:$0xff]  ;;  %v494_v6 = vld [vmem:[%s4396_s1 + $0x360] sm:$0xff]  ;;  %v560_v5 = vpack.c.bf16 %v479_v59, %v478_v58  ;;  %v509_v12 = vld [vmem:[%s4396_s1 + $0x3d8] sm:$0xff] }
  0x54   : > { %3372 = vmatpush3.bf16.msra.mxu0 %v515_v33  ;;  %v463_v4 = vld [vmem:[%s4396_s1 + $0x268] sm:$0xff]  ;;  %v576_v10 = vpack.c.bf16 %v511_v63, %v510_v62  ;;  %v4503_v13 = vld [vmem:[%s4374_s14 + $0x80] sm:$0xff]  ;;  %v460_v20 = vld [vmem:[%s4396_s1 + $0x250] sm:$0xff]  ;;  %v575_v22 = vpack.c.bf16 %v509_v12, %v508_v11 }
  0x55   : > { %3484 = vmatpush3.bf16.msra.mxu1 %v531_v34  ;;  %3373 = vmatprep.subr.bf16.mxu0 %v522_v35  ;;  %v495_v7 = vld [vmem:[%s4396_s1 + $0x368] sm:$0xff]  ;;  %v552_v14 = vpack.c.bf16 %v463_v4, %v462_v2  ;;  %v4506_v15 = vld [vmem:[%s4374_s14 + $0xa0] sm:$0xff]  ;;  %v461_v21 = vld [vmem:[%s4396_s1 + $0x258] sm:$0xff] }
  0x56   : > { %3485 = vmatprep.subr.bf16.mxu1 %v538_v39  ;;  %v4509_v16 = vld [vmem:[%s4374_s14 + $0x88] sm:$0xff]  ;;  %v568_v18 = vpack.c.bf16 %v495_v7, %v494_v6  ;;  %v492_v23 = vld [vmem:[%s4396_s1 + $0x350] sm:$0xff]  ;;  %v493_v25 = vld [vmem:[%s4396_s1 + $0x358] sm:$0xff]  ;;  %v3243_v29 = vcombine.high %v4503_v13, %v4506_v15  ;;  %v551_v33 = vpack.c.bf16 %v461_v21, %v460_v20  ;;  %v3242_v55 = vcombine.low %v4503_v13, %v4506_v15 }
  0x57   : > { %v4512_v17 = vld [vmem:[%s4374_s14 + $0xa8] sm:$0xff]  ;;  %v474_v26 = vld [vmem:[%s4396_s1 + $0x2c0] sm:$0xff]  ;;  %v567_v34 = vpack.c.bf16 %v493_v25, %v492_v23  ;;  %v472_v41 = vld [vmem:[%s4396_s1 + $0x2b0] sm:$0xff] }
  0x58   : > { %3374 = vmatpush3.bf16.msra.mxu0 %v514_v45  ;;  %v475_v27 = vld [vmem:[%s4396_s1 + $0x2c8] sm:$0xff]  ;;  %v506_v30 = vld [vmem:[%s4396_s1 + $0x3c0] sm:$0xff]  ;;  %v3245_v32 = vcombine.high %v4509_v16, %v4512_v17  ;;  %v473_v42 = vld [vmem:[%s4396_s1 + $0x2b8] sm:$0xff] }
  0x59   : > { %3486 = vmatpush3.bf16.msra.mxu1 %v530_v47  ;;  %3583 = vmatprep.subr.bf16.mxu0 %v561_v48  ;;  %v507_v31 = vld [vmem:[%s4396_s1 + $0x3c8] sm:$0xff]  ;;  %v558_v35 = vpack.c.bf16 %v475_v27, %v474_v26  ;;  %v458_v36 = vld [vmem:[%s4396_s1 + $0x240] sm:$0xff]  ;;  %v504_v44 = vld [vmem:[%s4396_s1 + $0x3b0] sm:$0xff]  ;;  %v557_v51 = vpack.c.bf16 %v473_v42, %v472_v41 }
  0x5a   : > { %3695 = vmatprep.subr.bf16.mxu1 %v577_v52  ;;  %v459_v37 = vld [vmem:[%s4396_s1 + $0x248] sm:$0xff]  ;;  %v490_v38 = vld [vmem:[%s4396_s1 + $0x340] sm:$0xff]  ;;  %v574_v39 = vpack.c.bf16 %v507_v31, %v506_v30  ;;  %v505_v45 = vld [vmem:[%s4396_s1 + $0x3b8] sm:$0xff] }
  0x5b   : > { %1411 = vmatmul.mubr.bf16.vlgmr.msra.gmra.mxu0 %v3226_v56  ;;  %v491_v40 = vld [vmem:[%s4396_s1 + $0x348] sm:$0xff]  ;;  %v4537_v43 = vld [vmem:[%s4374_s14 + $0xc0] sm:$0xff]  ;;  %v550_v49 = vpack.c.bf16 %v459_v37, %v458_v36  ;;  %v456_v52 = vld [vmem:[%s4396_s1 + $0x230] sm:$0xff]  ;;  %v573_v56 = vpack.c.bf16 %v505_v45, %v504_v44 }
  0x5c   : > { %1572 = vmatmul.mubr.bf16.vlgmr.msra.gmra.mxu1 %v3228_v60  ;;  %3584 = vmatpush3.bf16.msra.mxu0 %v553_v61  ;;  %v4542_v46 = vld [vmem:[%s4374_s14 + $0xe0] sm:$0xff]  ;;  %v4545_v47 = vld [vmem:[%s4374_s14 + $0xc8] sm:$0xff]  ;;  %v566_v50 = vpack.c.bf16 %v491_v40, %v490_v38  ;;  %v457_v53 = vld [vmem:[%s4396_s1 + $0x238] sm:$0xff]  ;;  %v3244_v60 = vcombine.low %v4509_v16, %v4512_v17 }
  0x5d   : > { %3696 = vmatpush3.bf16.msra.mxu1 %v569_v0  ;;  %1418 = vmatprep.mubr.bf16.mxu0 %v3235_v1  ;;  %v4548_v48 = vld [vmem:[%s4374_s14 + $0xe8] sm:$0xff]  ;;  %v488_v54 = vld [vmem:[%s4396_s1 + $0x330] sm:$0xff]  ;;  %v489_v57 = vld [vmem:[%s4396_s1 + $0x338] sm:$0xff]  ;;  %v3251_v61 = vcombine.high %v4537_v43, %v4542_v46  ;;  %v549_v1 = vpack.c.bf16 %v457_v53, %v456_v52  ;;  %v3250_v23 = vcombine.low %v4537_v43, %v4542_v46 }
  0x5e   : > { %1579 = vmatprep.mubr.bf16.mxu1 %v3237_v3  ;;  %3585 = vmatprep.subr.bf16.mxu0 %v560_v5  ;;  %v470_v58 = vld [vmem:[%s4396_s1 + $0x2a0] sm:$0xff]  ;;  %v471_v59 = vld [vmem:[%s4396_s1 + $0x2a8] sm:$0xff]  ;;  %v3253_v0 = vcombine.high %v4545_v47, %v4548_v48  ;;  %v565_v2 = vpack.c.bf16 %v489_v57, %v488_v54  ;;  %v468_v9 = vld [vmem:[%s4396_s1 + $0x290] sm:$0xff] }
  0x5f   : > { %3697 = vmatprep.subr.bf16.mxu1 %v576_v10  ;;  %v502_v62 = vld [vmem:[%s4396_s1 + $0x3a0] sm:$0xff]  ;;  %v503_v63 = vld [vmem:[%s4396_s1 + $0x3a8] sm:$0xff]  ;;  %v556_v4 = vpack.c.bf16 %v471_v59, %v470_v58  ;;  %v469_v10 = vld [vmem:[%s4396_s1 + $0x298] sm:$0xff] }
  0x60   : > { %3586 = vmatpush3.bf16.msra.mxu0 %v552_v14  ;;  %v454_v6 = vld [vmem:[%s4396_s1 + $0x220] sm:$0xff]  ;;  %v455_v3 = vld [vmem:[%s4396_s1 + $0x228] sm:$0xff]  ;;  %v572_v7 = vpack.c.bf16 %v503_v63, %v502_v62  ;;  %v500_v12 = vld [vmem:[%s4396_s1 + $0x390] sm:$0xff] }
  0x61   : > { %3698 = vmatpush3.bf16.msra.mxu1 %v568_v18  ;;  %3587 = vmatprep.subr.bf16.mxu0 %v559_v19  ;;  %v486_v5 = vld [vmem:[%s4396_s1 + $0x320] sm:$0xff]  ;;  %v487_v8 = vld [vmem:[%s4396_s1 + $0x328] sm:$0xff]  ;;  %v501_v13 = vld [vmem:[%s4396_s1 + $0x398] sm:$0xff]  ;;  %v548_v17 = vpack.c.bf16 %v455_v3, %v454_v6  ;;  %v555_v19 = vpack.c.bf16 %v469_v10, %v468_v9 }
  0x62   : > { %3699 = vmatprep.subr.bf16.mxu1 %v575_v22  ;;  %v642_v11 = vld [vmem:[%s4374_s14 + $0x100] sm:$0xff]  ;;  %v643_v15 = vld [vmem:[%s4374_s14 + $0x108] sm:$0xff]  ;;  %v564_v18 = vpack.c.bf16 %v487_v8, %v486_v5  ;;  %v452_v20 = vld [vmem:[%s4396_s1 + $0x210] sm:$0xff] }
  0x63   : > { %1419 = vmatmul.mubr.bf16.gmra.mxu0 %v3234_v24  ;;  %v646_v14 = vld [vmem:[%s4374_s14 + $0x120] sm:$0xff]  ;;  %v647_v16 = vld [vmem:[%s4374_s14 + $0x128] sm:$0xff]  ;;  %v453_v21 = vld [vmem:[%s4396_s1 + $0x218] sm:$0xff]  ;;  %v571_v24 = vpack.c.bf16 %v501_v13, %v500_v12 }
  0x64   : > { %1580 = vmatmul.mubr.bf16.gmra.mxu1 %v3236_v28  ;;  %1426 = vmatprep.mubr.bf16.mxu0 %v3243_v29  ;;  %v484_v22 = vld [vmem:[%s4396_s1 + $0x310] sm:$0xff]  ;;  %v485_v25 = vld [vmem:[%s4396_s1 + $0x318] sm:$0xff]  ;;  %v466_v26 = vld [vmem:[%s4396_s1 + $0x280] sm:$0xff]  ;;  %v3252_v28 = vcombine.low %v4545_v47, %v4548_v48  ;;  %v3259_v29 = vcombine.high %v642_v11, %v646_v14  ;;  %v3258_v47 = vcombine.low %v642_v11, %v646_v14 }
  0x65   : > { %1587 = vmatprep.mubr.bf16.mxu1 %v3245_v32  ;;  %3588 = vmatpush3.bf16.msra.mxu0 %v551_v33  ;;  %v467_v27 = vld [vmem:[%s4396_s1 + $0x288] sm:$0xff]  ;;  %v498_v30 = vld [vmem:[%s4396_s1 + $0x380] sm:$0xff]  ;;  %v3261_v32 = vcombine.high %v643_v15, %v647_v16  ;;  %v547_v33 = vpack.c.bf16 %v453_v21, %v452_v20  ;;  %v3260_v48 = vcombine.low %v643_v15, %v647_v16 }
  0x66   : > { %3700 = vmatpush3.bf16.msra.mxu1 %v567_v34  ;;  %3589 = vmatprep.subr.bf16.mxu0 %v558_v35  ;;  %v499_v31 = vld [vmem:[%s4396_s1 + $0x388] sm:$0xff]  ;;  %v563_v34 = vpack.c.bf16 %v485_v25, %v484_v22  ;;  %v554_v35 = vpack.c.bf16 %v467_v27, %v466_v26  ;;  %v450_v36 = vld [vmem:[%s4396_s1 + $0x200] sm:$0xff] }
  0x67   : > { %3701 = vmatprep.subr.bf16.mxu1 %v574_v39  ;;  %v451_v37 = vld [vmem:[%s4396_s1 + $0x208] sm:$0xff]  ;;  %v570_v38 = vpack.c.bf16 %v499_v31, %v498_v30  ;;  %v482_v39 = vld [vmem:[%s4396_s1 + $0x300] sm:$0xff] }
  0x68   : > { %v483_v40 = vld [vmem:[%s4396_s1 + $0x308] sm:$0xff]  ;;  %v650_v41 = vld [vmem:[%s4374_s14 + $0x140] sm:$0xff]  ;;  %v546_v43 = vpack.c.bf16 %v451_v37, %v450_v36 }
  0x69   : > { %3590 = vmatpush3.bf16.msra.mxu0 %v550_v49  ;;  %v654_v42 = vld [vmem:[%s4374_s14 + $0x160] sm:$0xff]  ;;  %v651_v44 = vld [vmem:[%s4374_s14 + $0x148] sm:$0xff]  ;;  %v562_v46 = vpack.c.bf16 %v483_v40, %v482_v39 }
  0x6a   : > { %3702 = vmatpush3.bf16.msra.mxu1 %v566_v50  ;;  %3591 = vmatprep.subr.bf16.mxu0 %v557_v51  ;;  %v655_v45 = vld [vmem:[%s4374_s14 + $0x168] sm:$0xff]  ;;  %v3267_v49 = vcombine.high %v650_v41, %v654_v42  ;;  %v658_v51 = vld [vmem:[%s4374_s14 + $0x180] sm:$0xff] }
  0x6b   : > { %1427 = vmatmul.mubr.bf16.gmra.mxu0 %v3242_v55  ;;  %3703 = vmatprep.subr.bf16.mxu1 %v573_v56  ;;  %v3269_v50 = vcombine.high %v651_v44, %v655_v45  ;;  %v662_v52 = vld [vmem:[%s4374_s14 + $0x1a0] sm:$0xff]  ;;  %v659_v53 = vld [vmem:[%s4374_s14 + $0x188] sm:$0xff]  ;;  %v3266_v55 = vcombine.low %v650_v41, %v654_v42  ;;  %v3268_v56 = vcombine.low %v651_v44, %v655_v45 }
  0x6c   : > { %1588 = vmatmul.mubr.bf16.gmra.mxu1 %v3244_v60  ;;  %1434 = vmatprep.mubr.bf16.mxu0 %v3251_v61  ;;  %v663_v54 = vld [vmem:[%s4374_s14 + $0x1a8] sm:$0xff]  ;;  %v3275_v57 = vcombine.high %v658_v51, %v662_v52  ;;  %v666_v59 = vld [vmem:[%s4374_s14 + $0x1c0] sm:$0xff]  ;;  %v3274_v63 = vcombine.low %v658_v51, %v662_v52 }
  0x6d   : > { %1595 = vmatprep.mubr.bf16.mxu1 %v3253_v0  ;;  %3592 = vmatpush3.bf16.msra.mxu0 %v549_v1  ;;  %v3277_v58 = vcombine.high %v659_v53, %v663_v54  ;;  %v670_v60 = vld [vmem:[%s4374_s14 + $0x1e0] sm:$0xff]  ;;  %v667_v61 = vld [vmem:[%s4374_s14 + $0x1c8] sm:$0xff]  ;;  %v3276_v0 = vcombine.low %v659_v53, %v663_v54 }
  0x6e   : > { %3704 = vmatpush3.bf16.msra.mxu1 %v565_v2  ;;  %3593 = vmatprep.subr.bf16.mxu0 %v556_v4  ;;  %v671_v62 = vld [vmem:[%s4374_s14 + $0x1e8] sm:$0xff]  ;;  %v3283_v1 = vcombine.high %v666_v59, %v670_v60  ;;  %v674_v4 = vld [vmem:[%s4374_s14 + $0x200] sm:$0xff] }
  0x6f   : > { %3705 = vmatprep.subr.bf16.mxu1 %v572_v7  ;;  %v3285_v2 = vcombine.high %v667_v61, %v671_v62  ;;  %v678_v6 = vld [vmem:[%s4374_s14 + $0x220] sm:$0xff]  ;;  %v675_v3 = vld [vmem:[%s4374_s14 + $0x208] sm:$0xff]  ;;  %v3282_v7 = vcombine.low %v666_v59, %v670_v60  ;;  %v3284_v8 = vcombine.low %v667_v61, %v671_v62 }
  0x70   : > { %v679_v5 = vld [vmem:[%s4374_s14 + $0x228] sm:$0xff]  ;;  %v3291_v9 = vcombine.high %v674_v4, %v678_v6  ;;  %v682_v11 = vld [vmem:[%s4374_s14 + $0x240] sm:$0xff]  ;;  %v3290_v15 = vcombine.low %v674_v4, %v678_v6  ;;  %v612_v4 = vld [vmem:[%s4374_s14 + $0x10] sm:$0xff] }
  0x71   : > { %3594 = vmatpush3.bf16.msra.mxu0 %v548_v17  ;;  %v3293_v10 = vcombine.high %v675_v3, %v679_v5  ;;  %v686_v12 = vld [vmem:[%s4374_s14 + $0x260] sm:$0xff]  ;;  %v683_v13 = vld [vmem:[%s4374_s14 + $0x248] sm:$0xff]  ;;  %v3292_v16 = vcombine.low %v675_v3, %v679_v5  ;;  %v616_v6 = vld [vmem:[%s4374_s14 + $0x30] sm:$0xff] }
  0x72   : > { %3706 = vmatpush3.bf16.msra.mxu1 %v564_v18  ;;  %3595 = vmatprep.subr.bf16.mxu0 %v555_v19  ;;  %v687_v14 = vld [vmem:[%s4374_s14 + $0x268] sm:$0xff]  ;;  %v3299_v17 = vcombine.high %v682_v11, %v686_v12  ;;  %v690_v19 = vld [vmem:[%s4374_s14 + $0x280] sm:$0xff]  ;;  %v613_v3 = vld [vmem:[%s4374_s14 + $0x18] sm:$0xff] }
  0x73   : > { %1435 = vmatmul.mubr.bf16.gmra.mxu0 %v3250_v23  ;;  %3707 = vmatprep.subr.bf16.mxu1 %v571_v24  ;;  %v3301_v18 = vcombine.high %v683_v13, %v687_v14  ;;  %v694_v20 = vld [vmem:[%s4374_s14 + $0x2a0] sm:$0xff]  ;;  %v691_v21 = vld [vmem:[%s4374_s14 + $0x288] sm:$0xff]  ;;  %v3298_v23 = vcombine.low %v682_v11, %v686_v12  ;;  %v3300_v24 = vcombine.low %v683_v13, %v687_v14  ;;  %v617_v5 = vld [vmem:[%s4374_s14 + $0x38] sm:$0xff] }
  0x74   : > { %1596 = vmatmul.mubr.bf16.gmra.mxu1 %v3252_v28  ;;  %1442 = vmatprep.mubr.bf16.mxu0 %v3259_v29  ;;  %v695_v22 = vld [vmem:[%s4374_s14 + $0x2a8] sm:$0xff]  ;;  %v3307_v25 = vcombine.high %v690_v19, %v694_v20  ;;  %v698_v27 = vld [vmem:[%s4374_s14 + $0x2c0] sm:$0xff]  ;;  %v3306_v31 = vcombine.low %v690_v19, %v694_v20  ;;  %v620_v11 = vld [vmem:[%s4374_s14 + $0x50] sm:$0xff] }
  0x75   : > { %1603 = vmatprep.mubr.bf16.mxu1 %v3261_v32  ;;  %3596 = vmatpush3.bf16.msra.mxu0 %v547_v33  ;;  %v3309_v26 = vcombine.high %v691_v21, %v695_v22  ;;  %v702_v28 = vld [vmem:[%s4374_s14 + $0x2e0] sm:$0xff]  ;;  %v699_v29 = vld [vmem:[%s4374_s14 + $0x2c8] sm:$0xff]  ;;  %v3308_v32 = vcombine.low %v691_v21, %v695_v22  ;;  %v624_v12 = vld [vmem:[%s4374_s14 + $0x70] sm:$0xff] }
  0x76   : > { %3708 = vmatpush3.bf16.msra.mxu1 %v563_v34  ;;  %3597 = vmatprep.subr.bf16.mxu0 %v554_v35  ;;  %v703_v30 = vld [vmem:[%s4374_s14 + $0x2e8] sm:$0xff]  ;;  %v3315_v33 = vcombine.high %v698_v27, %v702_v28  ;;  %v706_v35 = vld [vmem:[%s4374_s14 + $0x300] sm:$0xff]  ;;  %v3314_v39 = vcombine.low %v698_v27, %v702_v28  ;;  %v621_v13 = vld [vmem:[%s4374_s14 + $0x58] sm:$0xff] }
  0x77   : > { %3709 = vmatprep.subr.bf16.mxu1 %v570_v38  ;;  %v3317_v34 = vcombine.high %v699_v29, %v703_v30  ;;  %v710_v36 = vld [vmem:[%s4374_s14 + $0x320] sm:$0xff]  ;;  %v707_v37 = vld [vmem:[%s4374_s14 + $0x308] sm:$0xff]  ;;  %v3316_v40 = vcombine.low %v699_v29, %v703_v30  ;;  %v625_v14 = vld [vmem:[%s4374_s14 + $0x78] sm:$0xff] }
  0x78   : > { %v711_v38 = vld [vmem:[%s4374_s14 + $0x328] sm:$0xff]  ;;  %v3323_v41 = vcombine.high %v706_v35, %v710_v36  ;;  %v718_v44 = vld [vmem:[%s4374_s14 + $0x360] sm:$0xff]  ;;  %v628_v19 = vld [vmem:[%s4374_s14 + $0x90] sm:$0xff] }
  0x79   : > { %3598 = vmatpush3.bf16.msra.mxu0 %v546_v43  ;;  %v3325_v42 = vcombine.high %v707_v37, %v711_v38  ;;  %v714_v43 = vld [vmem:[%s4374_s14 + $0x340] sm:$0xff]  ;;  %v715_v45 = vld [vmem:[%s4374_s14 + $0x348] sm:$0xff]  ;;  %v632_v20 = vld [vmem:[%s4374_s14 + $0xb0] sm:$0xff] }
  0x7a   : > { %3710 = vmatpush3.bf16.msra.mxu1 %v562_v46  ;;  %v719_v46 = vld [vmem:[%s4374_s14 + $0x368] sm:$0xff]  ;;  %v722_v51 = vld [vmem:[%s4374_s14 + $0x380] sm:$0xff]  ;;  %v629_v21 = vld [vmem:[%s4374_s14 + $0x98] sm:$0xff] }
  0x7b   : > { %1443 = vmatmul.mubr.bf16.gmra.mxu0 %v3258_v47  ;;  %v3322_v47 = vcombine.low %v706_v35, %v710_v36  ;;  %v726_v52 = vld [vmem:[%s4374_s14 + $0x3a0] sm:$0xff]  ;;  %v723_v53 = vld [vmem:[%s4374_s14 + $0x388] sm:$0xff]  ;;  %v633_v22 = vld [vmem:[%s4374_s14 + $0xb8] sm:$0xff] }
  0x7c   : > { %1604 = vmatmul.mubr.bf16.gmra.mxu1 %v3260_v48  ;;  %1450 = vmatprep.mubr.bf16.mxu0 %v3267_v49  ;;  %v3324_v48 = vcombine.low %v707_v37, %v711_v38  ;;  %v3331_v49 = vcombine.high %v714_v43, %v718_v44  ;;  %v727_v54 = vld [vmem:[%s4374_s14 + $0x3a8] sm:$0xff]  ;;  %v730_v59 = vld [vmem:[%s4374_s14 + $0x3c0] sm:$0xff]  ;;  %v636_v27 = vld [vmem:[%s4374_s14 + $0xd0] sm:$0xff] }
  0x7d   : > { %1611 = vmatprep.mubr.bf16.mxu1 %v3269_v50  ;;  %v3333_v50 = vcombine.high %v715_v45, %v719_v46  ;;  %v734_v60 = vld [vmem:[%s4374_s14 + $0x3e0] sm:$0xff]  ;;  %v731_v61 = vld [vmem:[%s4374_s14 + $0x3c8] sm:$0xff]  ;;  %v640_v28 = vld [vmem:[%s4374_s14 + $0xf0] sm:$0xff] }
  0x7e   : > { %v735_v62 = vld [vmem:[%s4374_s14 + $0x3e8] sm:$0xff]  ;;  %v637_v29 = vld [vmem:[%s4374_s14 + $0xd8] sm:$0xff]  ;;  %v644_v35 = vld [vmem:[%s4374_s14 + $0x110] sm:$0xff] }
  0x7f   : > { %v641_v30 = vld [vmem:[%s4374_s14 + $0xf8] sm:$0xff]  ;;  %v648_v36 = vld [vmem:[%s4374_s14 + $0x130] sm:$0xff] }
  0x80   : > { %v645_v37 = vld [vmem:[%s4374_s14 + $0x118] sm:$0xff] }
  0x81   : > { %v649_v38 = vld [vmem:[%s4374_s14 + $0x138] sm:$0xff] }
  0x83   : > { %1451 = vmatmul.mubr.bf16.gmra.mxu0 %v3266_v55  ;;  %v3330_v55 = vcombine.low %v714_v43, %v718_v44  ;;  %v652_v43 = vld [vmem:[%s4374_s14 + $0x150] sm:$0xff] }
  0x84   : > { %1612 = vmatmul.mubr.bf16.gmra.mxu1 %v3268_v56  ;;  %1458 = vmatprep.mubr.bf16.mxu0 %v3275_v57  ;;  %v3332_v56 = vcombine.low %v715_v45, %v719_v46  ;;  %v3339_v57 = vcombine.high %v722_v51, %v726_v52  ;;  %v656_v44 = vld [vmem:[%s4374_s14 + $0x170] sm:$0xff]  ;;  %v653_v45 = vld [vmem:[%s4374_s14 + $0x158] sm:$0xff] }
  0x85   : > { %1619 = vmatprep.mubr.bf16.mxu1 %v3277_v58  ;;  %v3341_v58 = vcombine.high %v723_v53, %v727_v54  ;;  %v657_v46 = vld [vmem:[%s4374_s14 + $0x178] sm:$0xff] }
  0x8b   : > { %1459 = vmatmul.mubr.bf16.gmra.mxu0 %v3274_v63  ;;  %v3338_v63 = vcombine.low %v722_v51, %v726_v52  ;;  %v660_v51 = vld [vmem:[%s4374_s14 + $0x190] sm:$0xff] }
  0x8c   : > { %1620 = vmatmul.mubr.bf16.gmra.mxu1 %v3276_v0  ;;  %1466 = vmatprep.mubr.bf16.mxu0 %v3283_v1  ;;  %v3340_v0 = vcombine.low %v723_v53, %v727_v54  ;;  %v3347_v1 = vcombine.high %v730_v59, %v734_v60  ;;  %v664_v52 = vld [vmem:[%s4374_s14 + $0x1b0] sm:$0xff]  ;;  %v661_v53 = vld [vmem:[%s4374_s14 + $0x198] sm:$0xff] }
  0x8d   : > { %1627 = vmatprep.mubr.bf16.mxu1 %v3285_v2  ;;  %v3349_v2 = vcombine.high %v731_v61, %v735_v62  ;;  %v665_v54 = vld [vmem:[%s4374_s14 + $0x1b8] sm:$0xff] }
  0x93   : > { %1467 = vmatmul.mubr.bf16.gmra.mxu0 %v3282_v7  ;;  %v3346_v7 = vcombine.low %v730_v59, %v734_v60  ;;  %v668_v59 = vld [vmem:[%s4374_s14 + $0x1d0] sm:$0xff] }
  0x94   : > { %1628 = vmatmul.mubr.bf16.gmra.mxu1 %v3284_v8  ;;  %1474 = vmatprep.mubr.bf16.mxu0 %v3291_v9  ;;  %v3348_v8 = vcombine.low %v731_v61, %v735_v62  ;;  %v3231_v9 = vcombine.high %v612_v4, %v616_v6  ;;  %v672_v60 = vld [vmem:[%s4374_s14 + $0x1f0] sm:$0xff]  ;;  %v669_v61 = vld [vmem:[%s4374_s14 + $0x1d8] sm:$0xff] }
  0x95   : > { %1635 = vmatprep.mubr.bf16.mxu1 %v3293_v10  ;;  %v3233_v10 = vcombine.high %v613_v3, %v617_v5  ;;  %v673_v62 = vld [vmem:[%s4374_s14 + $0x1f8] sm:$0xff] }
  0x9b   : > { %1475 = vmatmul.mubr.bf16.gmra.mxu0 %v3290_v15  ;;  %v3230_v15 = vcombine.low %v612_v4, %v616_v6  ;;  %v676_v4 = vld [vmem:[%s4374_s14 + $0x210] sm:$0xff] }
  0x9c   : > { %1636 = vmatmul.mubr.bf16.gmra.mxu1 %v3292_v16  ;;  %1482 = vmatprep.mubr.bf16.mxu0 %v3299_v17  ;;  %v3232_v16 = vcombine.low %v613_v3, %v617_v5  ;;  %v3239_v17 = vcombine.high %v620_v11, %v624_v12  ;;  %v680_v6 = vld [vmem:[%s4374_s14 + $0x230] sm:$0xff]  ;;  %v677_v3 = vld [vmem:[%s4374_s14 + $0x218] sm:$0xff] }
  0x9d   : > { %1643 = vmatprep.mubr.bf16.mxu1 %v3301_v18  ;;  %v3241_v18 = vcombine.high %v621_v13, %v625_v14  ;;  %v681_v5 = vld [vmem:[%s4374_s14 + $0x238] sm:$0xff] }
  0xa3   : > { %1483 = vmatmul.mubr.bf16.gmra.mxu0 %v3298_v23  ;;  %v3238_v23 = vcombine.low %v620_v11, %v624_v12  ;;  %v684_v11 = vld [vmem:[%s4374_s14 + $0x250] sm:$0xff] }
  0xa4   : > { %1644 = vmatmul.mubr.bf16.gmra.mxu1 %v3300_v24  ;;  %1490 = vmatprep.mubr.bf16.mxu0 %v3307_v25  ;;  %v3240_v24 = vcombine.low %v621_v13, %v625_v14  ;;  %v3247_v25 = vcombine.high %v628_v19, %v632_v20  ;;  %v688_v12 = vld [vmem:[%s4374_s14 + $0x270] sm:$0xff]  ;;  %v685_v13 = vld [vmem:[%s4374_s14 + $0x258] sm:$0xff] }
  0xa5   : > { %1651 = vmatprep.mubr.bf16.mxu1 %v3309_v26  ;;  %v3249_v26 = vcombine.high %v629_v21, %v633_v22  ;;  %v689_v14 = vld [vmem:[%s4374_s14 + $0x278] sm:$0xff] }
  0xab   : > { %1491 = vmatmul.mubr.bf16.gmra.mxu0 %v3306_v31  ;;  %v3246_v31 = vcombine.low %v628_v19, %v632_v20 }
  0xac   : > { %1652 = vmatmul.mubr.bf16.gmra.mxu1 %v3308_v32  ;;  %1498 = vmatprep.mubr.bf16.mxu0 %v3315_v33  ;;  %v3248_v32 = vcombine.low %v629_v21, %v633_v22  ;;  %v3255_v33 = vcombine.high %v636_v27, %v640_v28  ;;  %v692_v22 = vld [vmem:[%s4374_s14 + $0x290] sm:$0xff] }
  0xad   : > { %1659 = vmatprep.mubr.bf16.mxu1 %v3317_v34  ;;  %v3257_v34 = vcombine.high %v637_v29, %v641_v30 }
  0xb3   : > { %1499 = vmatmul.mubr.bf16.gmra.mxu0 %v3314_v39  ;;  %v3254_v39 = vcombine.low %v636_v27, %v640_v28  ;;  %v697_v27 = vld [vmem:[%s4374_s14 + $0x2b8] sm:$0xff] }
  0xb4   : > { %1660 = vmatmul.mubr.bf16.gmra.mxu1 %v3316_v40  ;;  %1506 = vmatprep.mubr.bf16.mxu0 %v3323_v41  ;;  %v3256_v40 = vcombine.low %v637_v29, %v641_v30  ;;  %v3263_v41 = vcombine.high %v644_v35, %v648_v36  ;;  %v3302_v30 = vcombine.low %v684_v11, %v688_v12 }
  0xb5   : > { %1667 = vmatprep.mubr.bf16.mxu1 %v3325_v42  ;;  %v3265_v42 = vcombine.high %v645_v37, %v649_v38 }
  0xbb   : > { %1507 = vmatmul.mubr.bf16.gmra.mxu0 %v3322_v47  ;;  %v3262_v47 = vcombine.low %v644_v35, %v648_v36 }
  0xbc   : > { %1668 = vmatmul.mubr.bf16.gmra.mxu1 %v3324_v48  ;;  %1514 = vmatprep.mubr.bf16.mxu0 %v3331_v49  ;;  %v3264_v48 = vcombine.low %v645_v37, %v649_v38  ;;  %v3271_v49 = vcombine.high %v652_v43, %v656_v44 }
  0xbd   : > { %1675 = vmatprep.mubr.bf16.mxu1 %v3333_v50  ;;  %v3273_v50 = vcombine.high %v653_v45, %v657_v46 }
  0xc3   : > { %1515 = vmatmul.mubr.bf16.gmra.mxu0 %v3330_v55  ;;  %v3270_v55 = vcombine.low %v652_v43, %v656_v44  ;;  %v700_v44 = vld [vmem:[%s4374_s14 + $0x2d0] sm:$0xff] }
  0xc4   : > { %1676 = vmatmul.mubr.bf16.gmra.mxu1 %v3332_v56  ;;  %1522 = vmatprep.mubr.bf16.mxu0 %v3339_v57  ;;  %v3272_v56 = vcombine.low %v653_v45, %v657_v46  ;;  %v3279_v57 = vcombine.high %v660_v51, %v664_v52  ;;  %v704_v45 = vld [vmem:[%s4374_s14 + $0x2f0] sm:$0xff] }
  0xc5   : > { %1683 = vmatprep.mubr.bf16.mxu1 %v3341_v58  ;;  %v3281_v58 = vcombine.high %v661_v53, %v665_v54 }
  0xcb   : > { %1523 = vmatmul.mubr.bf16.gmra.mxu0 %v3338_v63  ;;  %v3278_v63 = vcombine.low %v660_v51, %v664_v52 }
  0xcc   : > { %1684 = vmatmul.mubr.bf16.gmra.mxu1 %v3340_v0  ;;  %1530 = vmatprep.mubr.bf16.mxu0 %v3347_v1  ;;  %v3280_v0 = vcombine.low %v661_v53, %v665_v54  ;;  %v3287_v1 = vcombine.high %v668_v59, %v672_v60 }
  0xcd   : > { %1691 = vmatprep.mubr.bf16.mxu1 %v3349_v2  ;;  %v3289_v2 = vcombine.high %v669_v61, %v673_v62 }
  0xd3   : > { %1531 = vmatmul.mubr.bf16.gmra.mxu0 %v3346_v7  ;;  %v3286_v7 = vcombine.low %v668_v59, %v672_v60 }
  0xd4   : > { %1692 = vmatmul.mubr.bf16.gmra.mxu1 %v3348_v8  ;;  %1732 = vmatprep.mubr.bf16.mxu0 %v3231_v9  ;;  %v3288_v8 = vcombine.low %v669_v61, %v673_v62  ;;  %v3295_v9 = vcombine.high %v676_v4, %v680_v6 }
  0xd5   : > { %1893 = vmatprep.mubr.bf16.mxu1 %v3233_v10  ;;  %v3297_v10 = vcombine.high %v677_v3, %v681_v5 }
  0xdb   : > { %1733 = vmatmul.mubr.bf16.vlgmr.msra.gmra.mxu0 %v3230_v15  ;;  %v3294_v15 = vcombine.low %v676_v4, %v680_v6  ;;  %v712_v4 = vld [vmem:[%s4374_s14 + $0x330] sm:$0xff] }
  0xdc   : > { %1894 = vmatmul.mubr.bf16.vlgmr.msra.gmra.mxu1 %v3232_v16  ;;  %1740 = vmatprep.mubr.bf16.mxu0 %v3239_v17  ;;  %v3296_v16 = vcombine.low %v677_v3, %v681_v5  ;;  %v3303_v17 = vcombine.high %v684_v11, %v688_v12  ;;  %v709_v5 = vld [vmem:[%s4374_s14 + $0x318] sm:$0xff] }
  0xdd   : > { %1901 = vmatprep.mubr.bf16.mxu1 %v3241_v18  ;;  %v3305_v18 = vcombine.high %v685_v13, %v689_v14 }
  0xe3   : > { %1741 = vmatmul.mubr.bf16.gmra.mxu0 %v3238_v23  ;;  %v696_v23 = vld [vmem:[%s4374_s14 + $0x2b0] sm:$0xff] }
  0xe4   : > { %1902 = vmatmul.mubr.bf16.gmra.mxu1 %v3240_v24  ;;  %1748 = vmatprep.mubr.bf16.mxu0 %v3247_v25  ;;  %v3310_v52 = vcombine.low %v692_v22, %v696_v23 }
  0xe5   : > { %1909 = vmatprep.mubr.bf16.mxu1 %v3249_v26  ;;  %v693_v26 = vld [vmem:[%s4374_s14 + $0x298] sm:$0xff] }
  0xe6   : > { %v3313_v36 = vcombine.high %v693_v26, %v697_v27  ;;  %v3312_v54 = vcombine.low %v693_v26, %v697_v27 }
  0xeb   : > { %1749 = vmatmul.mubr.bf16.gmra.mxu0 %v3246_v31 }
  0xec   : > { %1910 = vmatmul.mubr.bf16.gmra.mxu1 %v3248_v32  ;;  %1756 = vmatprep.mubr.bf16.mxu0 %v3255_v33  ;;  %v3304_v32 = vcombine.low %v685_v13, %v689_v14  ;;  %v3311_v33 = vcombine.high %v692_v22, %v696_v23 }
  0xed   : > { %1917 = vmatprep.mubr.bf16.mxu1 %v3257_v34 }
  0xf3   : > { %1757 = vmatmul.mubr.bf16.gmra.mxu0 %v3254_v39 }
  0xf4   : > { %1918 = vmatmul.mubr.bf16.gmra.mxu1 %v3256_v40  ;;  %1764 = vmatprep.mubr.bf16.mxu0 %v3263_v41 }
  0xf5   : > { %1925 = vmatprep.mubr.bf16.mxu1 %v3265_v42 }
  0xfb   : > { %1765 = vmatmul.mubr.bf16.gmra.mxu0 %v3262_v47 }
  0xfc   : > { %1926 = vmatmul.mubr.bf16.gmra.mxu1 %v3264_v48  ;;  %1772 = vmatprep.mubr.bf16.mxu0 %v3271_v49  ;;  %v701_v48 = vld [vmem:[%s4374_s14 + $0x2d8] sm:$0xff] }
  0xfd   : > { %1933 = vmatprep.mubr.bf16.mxu1 %v3273_v50  ;;  %v705_v49 = vld [vmem:[%s4374_s14 + $0x2f8] sm:$0xff] }
  0xfe   : > { %v3320_v12 = vcombine.low %v701_v48, %v705_v49 }
 0x103   : > { %1773 = vmatmul.mubr.bf16.gmra.mxu0 %v3270_v55  ;;  %v3319_v55 = vcombine.high %v700_v44, %v704_v45 }
 0x104   : > { %1934 = vmatmul.mubr.bf16.gmra.mxu1 %v3272_v56  ;;  %1780 = vmatprep.mubr.bf16.mxu0 %v3279_v57 }
 0x105   : > { %1941 = vmatprep.mubr.bf16.mxu1 %v3281_v58  ;;  %v3321_v58 = vcombine.high %v701_v48, %v705_v49  ;;  %v724_v48 = vld [vmem:[%s4374_s14 + $0x390] sm:$0xff] }
 0x106   : > { %v728_v49 = vld [vmem:[%s4374_s14 + $0x3b0] sm:$0xff] }
 0x10b   : > { %1781 = vmatmul.mubr.bf16.gmra.mxu0 %v3278_v63 }
 0x10c   : > { %1942 = vmatmul.mubr.bf16.gmra.mxu1 %v3280_v0  ;;  %1788 = vmatprep.mubr.bf16.mxu0 %v3287_v1 }
 0x10d   : > { %1949 = vmatprep.mubr.bf16.mxu1 %v3289_v2  ;;  %v708_v2 = vld [vmem:[%s4374_s14 + $0x310] sm:$0xff] }
 0x10e   : > { %v3327_v13 = vcombine.high %v708_v2, %v712_v4 }
 0x113   : > { %1789 = vmatmul.mubr.bf16.gmra.mxu0 %v3286_v7  ;;  %v713_v7 = vld [vmem:[%s4374_s14 + $0x338] sm:$0xff] }
 0x114   : > { %1950 = vmatmul.mubr.bf16.gmra.mxu1 %v3288_v8  ;;  %1796 = vmatprep.mubr.bf16.mxu0 %v3295_v9 }
 0x115   : > { %1957 = vmatprep.mubr.bf16.mxu1 %v3297_v10  ;;  %v3318_v10 = vcombine.low %v700_v44, %v704_v45 }
 0x11b   : > { %v3375_v19 = vpop.f32.mrf.mxu0  ;;  %1797 = vmatmul.mubr.bf16.gmra.mxu0 %v3294_v15 }
 0x11c   : > { %v3487_v20 = vpop.f32.mrf.mxu1  ;;  %1958 = vmatmul.mubr.bf16.gmra.mxu1 %v3296_v16  ;;  %1804 = vmatprep.mubr.bf16.mxu0 %v3303_v17  ;;  %v3329_v16 = vcombine.high %v709_v5, %v713_v7 }
 0x11d   : > { %v3376_v21 = vpop.f32.mrf.mxu0  ;;  %1965 = vmatprep.mubr.bf16.mxu1 %v3305_v18 }
 0x11e   : > { %v3377_v24 = vadd.f32 %v3376_v21, %v3375_v19  ;;  %v3488_v25 = vpop.f32.mrf.mxu1 }
 0x11f   : > { %v3489_v28 = vadd.f32 %v3488_v25, %v3487_v20  ;;  %v3378_v29 = vpop.f32.mrf.mxu0  ;;  %v720_v25 = vld [vmem:[%s4374_s14 + $0x370] sm:$0xff] }
 0x120   : > { %v3490_v31 = vpop.f32.mrf.mxu1 }
 0x121   : > { %v4682_v34 = vadd.f32 %v3489_v28, %v3377_v24  ;;  %v3379_v35 = vpop.f32.mrf.mxu0  ;;  %v716_v24 = vld [vmem:[%s4374_s14 + $0x350] sm:$0xff]  ;;  %v717_v28 = vld [vmem:[%s4374_s14 + $0x358] sm:$0xff] }
 0x122   : > { %v3380_v37 = vadd.f32 %v3379_v35, %v3378_v29  ;;  %v3491_v38 = vpop.f32.mrf.mxu1  ;;  %v721_v29 = vld [vmem:[%s4374_s14 + $0x378] sm:$0xff]  ;;  %v3328_v35 = vcombine.low %v709_v5, %v713_v7 }
 0x123   : > { %v3492_v39 = vadd.f32 %v3491_v38, %v3490_v31  ;;  %v3381_v40 = vpop.f32.mrf.mxu0  ;;  %1805 = vmatmul.mubr.bf16.gmra.mxu0 %v3302_v30 }
 0x124   : > { %v3493_v41 = vpop.f32.mrf.mxu1  ;;  %1966 = vmatmul.mubr.bf16.gmra.mxu1 %v3304_v32  ;;  %1812 = vmatprep.mubr.bf16.mxu0 %v3311_v33  ;;  %v3326_v32 = vcombine.low %v708_v2, %v712_v4 }
 0x125   : > { %v4684_v42 = vadd.f32 %v3492_v39, %v3380_v37  ;;  %v3382_v43 = vpop.f32.mrf.mxu0  ;;  %1973 = vmatprep.mubr.bf16.mxu1 %v3313_v36  ;;  %v3335_v36 = vcombine.high %v716_v24, %v720_v25  ;;  %v3337_v39 = vcombine.high %v717_v28, %v721_v29 }
 0x126   : > { %v3383_v46 = vadd.f32 %v3382_v43, %v3381_v40  ;;  %v3494_v47 = vpop.f32.mrf.mxu1 }
 0x127   : > { %v3495_v50 = vadd.f32 %v3494_v47, %v3493_v41  ;;  %v3384_v51 = vpop.f32.mrf.mxu0 }
 0x128   : > { %v3496_v53 = vpop.f32.mrf.mxu1 }
 0x129   : > { %v4690_v56 = vadd.f32 %v3495_v50, %v3383_v46  ;;  %v3385_v57 = vpop.f32.mrf.mxu0 }
 0x12a   : > { %v3386_v59 = vadd.f32 %v3385_v57, %v3384_v51  ;;  %v3497_v60 = vpop.f32.mrf.mxu1  ;;  %v3334_v57 = vcombine.low %v716_v24, %v720_v25 }
 0x12b   : > { %v3498_v61 = vadd.f32 %v3497_v60, %v3496_v53  ;;  %v3387_v62 = vpop.f32.mrf.mxu0  ;;  %1813 = vmatmul.mubr.bf16.gmra.mxu0 %v3310_v52  ;;  %v725_v52 = vld [vmem:[%s4374_s14 + $0x398] sm:$0xff]  ;;  %v3343_v60 = vcombine.high %v724_v48, %v728_v49 }
 0x12c   : > { %v3499_v63 = vpop.f32.mrf.mxu1  ;;  %1974 = vmatmul.mubr.bf16.gmra.mxu1 %v3312_v54  ;;  %1820 = vmatprep.mubr.bf16.mxu0 %v3319_v55  ;;  %v729_v53 = vld [vmem:[%s4374_s14 + $0x3b8] sm:$0xff] }
 0x12d   : > { %v4692_v0 = vadd.f32 %v3498_v61, %v3386_v59  ;;  %v3388_v1 = vpop.f32.mrf.mxu0  ;;  %1981 = vmatprep.mubr.bf16.mxu1 %v3321_v58  ;;  %v3336_v59 = vcombine.low %v717_v28, %v721_v29 }
 0x12e   : > { %v3389_v6 = vadd.f32 %v3388_v1, %v3387_v62  ;;  %v3500_v3 = vpop.f32.mrf.mxu1 }
 0x12f   : > { %v3501_v8 = vadd.f32 %v3500_v3, %v3499_v63  ;;  %v3390_v9 = vpop.f32.mrf.mxu0  ;;  %v3345_v63 = vcombine.high %v725_v52, %v729_v53 }
 0x130   : > { %v3502_v11 = vpop.f32.mrf.mxu1 }
 0x131   : > { %v4698_v14 = vadd.f32 %v3501_v8, %v3389_v6  ;;  %v3391_v15 = vpop.f32.mrf.mxu0  ;;  %v732_v8 = vld [vmem:[%s4374_s14 + $0x3d0] sm:$0xff] }
 0x132   : > { %v3392_v17 = vadd.f32 %v3391_v15, %v3390_v9  ;;  %v3503_v18 = vpop.f32.mrf.mxu1  ;;  %v736_v9 = vld [vmem:[%s4374_s14 + $0x3f0] sm:$0xff] }
 0x133   : > { %v3504_v19 = vadd.f32 %v3503_v18, %v3502_v11  ;;  %v3393_v20 = vpop.f32.mrf.mxu0  ;;  %1821 = vmatmul.mubr.bf16.gmra.mxu0 %v3318_v10 }
 0x134   : > { %v3505_v21 = vpop.f32.mrf.mxu1  ;;  %1982 = vmatmul.mubr.bf16.gmra.mxu1 %v3320_v12  ;;  %1828 = vmatprep.mubr.bf16.mxu0 %v3327_v13  ;;  %v733_v12 = vld [vmem:[%s4374_s14 + $0x3d8] sm:$0xff] }
 0x135   : > { %v4700_v22 = vadd.f32 %v3504_v19, %v3392_v17  ;;  %v3394_v23 = vpop.f32.mrf.mxu0  ;;  %1989 = vmatprep.mubr.bf16.mxu1 %v3329_v16  ;;  %v737_v13 = vld [vmem:[%s4374_s14 + $0x3f8] sm:$0xff]  ;;  %v3342_v17 = vcombine.low %v724_v48, %v728_v49  ;;  %v3344_v19 = vcombine.low %v725_v52, %v729_v53 }
 0x136   : > { %v3395_v26 = vadd.f32 %v3394_v23, %v3393_v20  ;;  %v3506_v27 = vpop.f32.mrf.mxu1  ;;  %v3351_v20 = vcombine.high %v732_v8, %v736_v9  ;;  %v3353_v24 = vcombine.high %v733_v12, %v737_v13 }
 0x137   : > { %v3507_v30 = vadd.f32 %v3506_v27, %v3505_v21  ;;  %v3396_v31 = vpop.f32.mrf.mxu0 }
 0x138   : > { %v3508_v33 = vpop.f32.mrf.mxu1 }
 0x139   : > { %v4706_v37 = vadd.f32 %v3507_v30, %v3395_v26  ;;  %v3397_v38 = vpop.f32.mrf.mxu0 }
 0x13a   : > { %v3398_v40 = vadd.f32 %v3397_v38, %v3396_v31  ;;  %v3509_v41 = vpop.f32.mrf.mxu1  ;;  %v3350_v38 = vcombine.low %v732_v8, %v736_v9 }
 0x13b   : > { %v3510_v43 = vadd.f32 %v3509_v41, %v3508_v33  ;;  %v3399_v44 = vpop.f32.mrf.mxu0  ;;  %1829 = vmatmul.mubr.bf16.gmra.mxu0 %v3326_v32 }
 0x13c   : > { %v3511_v45 = vpop.f32.mrf.mxu1  ;;  %1990 = vmatmul.mubr.bf16.gmra.mxu1 %v3328_v35  ;;  %1836 = vmatprep.mubr.bf16.mxu0 %v3335_v36 }
 0x13d   : > { %v4708_v46 = vadd.f32 %v3510_v43, %v3398_v40  ;;  %v3400_v47 = vpop.f32.mrf.mxu0  ;;  %1997 = vmatprep.mubr.bf16.mxu1 %v3337_v39  ;;  %v3352_v40 = vcombine.low %v733_v12, %v737_v13 }
 0x13e   : > { %v3401_v50 = vadd.f32 %v3400_v47, %v3399_v44  ;;  %v3512_v51 = vpop.f32.mrf.mxu1 }
 0x13f   : > { %v3513_v54 = vadd.f32 %v3512_v51, %v3511_v45  ;;  %v3402_v55 = vpop.f32.mrf.mxu0 }
 0x140   : > { %v3514_v58 = vpop.f32.mrf.mxu1 }
 0x141   : > { %v4714_v61 = vadd.f32 %v3513_v54, %v3401_v50  ;;  %v3403_v62 = vpop.f32.mrf.mxu0 }
 0x142   : > { %v3404_v1 = vadd.f32 %v3403_v62, %v3402_v55  ;;  %v3515_v2 = vpop.f32.mrf.mxu1 }
 0x143   : > { %v3516_v4 = vadd.f32 %v3515_v2, %v3514_v58  ;;  %v3405_v6 = vpop.f32.mrf.mxu0  ;;  %1837 = vmatmul.mubr.bf16.gmra.mxu0 %v3334_v57 }
 0x144   : > { %v3517_v3 = vpop.f32.mrf.mxu1  ;;  %1998 = vmatmul.mubr.bf16.gmra.mxu1 %v3336_v59  ;;  %1844 = vmatprep.mubr.bf16.mxu0 %v3343_v60 }
 0x145   : > { %v4716_v5 = vadd.f32 %v3516_v4, %v3404_v1  ;;  %v3406_v7 = vpop.f32.mrf.mxu0  ;;  %2005 = vmatprep.mubr.bf16.mxu1 %v3345_v63 }
 0x146   : > { %v3407_v10 = vadd.f32 %v3406_v7, %v3405_v6  ;;  %v3518_v11 = vpop.f32.mrf.mxu1 }
 0x147   : > { %v3519_v15 = vadd.f32 %v3518_v11, %v3517_v3  ;;  %v3408_v16 = vpop.f32.mrf.mxu0 }
 0x148   : > { %v3520_v18 = vpop.f32.mrf.mxu1 }
 0x149   : > { %v4722_v21 = vadd.f32 %v3519_v15, %v3407_v10  ;;  %v3409_v23 = vpop.f32.mrf.mxu0 }
 0x14a   : > { %v3410_v25 = vadd.f32 %v3409_v23, %v3408_v16  ;;  %v3521_v26 = vpop.f32.mrf.mxu1 }
 0x14b   : > { %v3522_v27 = vadd.f32 %v3521_v26, %v3520_v18  ;;  %v3411_v28 = vpop.f32.mrf.mxu0  ;;  %1845 = vmatmul.mubr.bf16.gmra.mxu0 %v3342_v17 }
 0x14c   : > { %v3523_v29 = vpop.f32.mrf.mxu1  ;;  %2006 = vmatmul.mubr.bf16.gmra.mxu1 %v3344_v19  ;;  %1852 = vmatprep.mubr.bf16.mxu0 %v3351_v20 }
 0x14d   : > { %v4724_v30 = vadd.f32 %v3522_v27, %v3410_v25  ;;  %v3412_v31 = vpop.f32.mrf.mxu0  ;;  %2013 = vmatprep.mubr.bf16.mxu1 %v3353_v24 }
 0x14e   : > { %v3413_v32 = vadd.f32 %v3412_v31, %v3411_v28  ;;  %v3524_v33 = vpop.f32.mrf.mxu1 }
 0x14f   : > { %v3525_v35 = vadd.f32 %v3524_v33, %v3523_v29  ;;  %v3414_v36 = vpop.f32.mrf.mxu0 }
 0x150   : > { %v3526_v39 = vpop.f32.mrf.mxu1 }
 0x151   : > { %v4726_v41 = vadd.f32 %v3525_v35, %v3413_v32  ;;  %v3415_v43 = vpop.f32.mrf.mxu0 }
 0x152   : > { %v3416_v44 = vadd.f32 %v3415_v43, %v3414_v36  ;;  %v3527_v45 = vpop.f32.mrf.mxu1 }
 0x153   : > { %v3528_v47 = vadd.f32 %v3527_v45, %v3526_v39  ;;  %v3417_v48 = vpop.f32.mrf.mxu0  ;;  %1853 = vmatmul.mubr.bf16.gmra.mxu0 %v3350_v38 }
 0x154   : > { %v3529_v49 = vpop.f32.mrf.mxu1  ;;  %2014 = vmatmul.mubr.bf16.gmra.mxu1 %v3352_v40 }
 0x155   : > { %v4728_v50 = vadd.f32 %v3528_v47, %v3416_v44  ;;  %v3418_v51 = vpop.f32.mrf.mxu0 }
 0x156   : > { %v3419_v52 = vadd.f32 %v3418_v51, %v3417_v48  ;;  %v3530_v53 = vpop.f32.mrf.mxu1 }
 0x157   : > { %v3531_v54 = vadd.f32 %v3530_v53, %v3529_v49  ;;  %v3420_v55 = vpop.f32.mrf.mxu0 }
 0x158   : > { %v3532_v57 = vpop.f32.mrf.mxu1 }
 0x159   : > { %v4730_v58 = vadd.f32 %v3531_v54, %v3419_v52  ;;  %v3421_v59 = vpop.f32.mrf.mxu0 }
 0x15a   : > { %v3422_v60 = vadd.f32 %v3421_v59, %v3420_v55  ;;  %v3533_v62 = vpop.f32.mrf.mxu1 }
 0x15b   : > { %v3534_v63 = vadd.f32 %v3533_v62, %v3532_v57  ;;  %v3423_v1 = vpop.f32.mrf.mxu0 }
 0x15c   : > { %v3535_v2 = vpop.f32.mrf.mxu1 }
 0x15d   : > { %v4732_v4 = vadd.f32 %v3534_v63, %v3422_v60  ;;  %v3424_v6 = vpop.f32.mrf.mxu0 }
 0x15e   : > { %v3425_v3 = vadd.f32 %v3424_v6, %v3423_v1  ;;  %v3536_v7 = vpop.f32.mrf.mxu1 }
 0x15f   : > { %v3537_v8 = vadd.f32 %v3536_v7, %v3535_v2  ;;  %v3426_v9 = vpop.f32.mrf.mxu0 }
 0x160   : > { %v3538_v10 = vpop.f32.mrf.mxu1 }
 0x161   : > { %v4734_v11 = vadd.f32 %v3537_v8, %v3425_v3  ;;  %v3427_v12 = vpop.f32.mrf.mxu0 }
 0x162   : > { %v3428_v13 = vadd.f32 %v3427_v12, %v3426_v9  ;;  %v3539_v15 = vpop.f32.mrf.mxu1 }
 0x163   : > { %v3540_v16 = vadd.f32 %v3539_v15, %v3538_v10  ;;  %v3429_v17 = vpop.f32.mrf.mxu0 }
 0x164   : > { %v3541_v18 = vpop.f32.mrf.mxu1 }
 0x165   : > { %v4736_v19 = vadd.f32 %v3540_v16, %v3428_v13  ;;  %v3430_v20 = vpop.f32.mrf.mxu0 }
 0x166   : > { %v3431_v23 = vadd.f32 %v3430_v20, %v3429_v17  ;;  %v3542_v24 = vpop.f32.mrf.mxu1 }
 0x167   : > { %v3543_v25 = vadd.f32 %v3542_v24, %v3541_v18  ;;  %v3432_v26 = vpop.f32.mrf.mxu0 }
 0x168   : > { %v3544_v27 = vpop.f32.mrf.mxu1 }
 0x169   : > { %v4738_v28 = vadd.f32 %v3543_v25, %v3431_v23  ;;  %v3433_v29 = vpop.f32.mrf.mxu0 }
 0x16a   : > { %v3434_v31 = vadd.f32 %v3433_v29, %v3432_v26  ;;  %v3545_v32 = vpop.f32.mrf.mxu1 }
 0x16b   : > { %v3546_v33 = vadd.f32 %v3545_v32, %v3544_v27  ;;  %v3435_v35 = vpop.f32.mrf.mxu0 }
 0x16c   : > { %v3547_v36 = vpop.f32.mrf.mxu1 }
 0x16d   : > { %v4740_v38 = vadd.f32 %v3546_v33, %v3434_v31  ;;  %v3436_v39 = vpop.f32.mrf.mxu0 }
 0x16e   : > { %v3437_v40 = vadd.f32 %v3436_v39, %v3435_v35  ;;  %v3548_v43 = vpop.f32.mrf.mxu1 }
 0x16f   : > { %v3549_v44 = vadd.f32 %v3548_v43, %v3547_v36  ;;  %v3438_v45 = vpop.f32.mrf.mxu0 }
 0x170   : > { %v3550_v47 = vpop.f32.mrf.mxu1 }
 0x171   : > { %v4742_v48 = vadd.f32 %v3549_v44, %v3437_v40  ;;  %v3439_v49 = vpop.f32.mrf.mxu0 }
 0x172   : > { %v3440_v51 = vadd.f32 %v3439_v49, %v3438_v45  ;;  %v3551_v52 = vpop.f32.mrf.mxu1 }
 0x173   : > { %v3552_v53 = vadd.f32 %v3551_v52, %v3550_v47  ;;  %v3441_v54 = vpop.f32.mrf.mxu0 }
 0x174   : > { %v3553_v55 = vpop.f32.mrf.mxu1 }
 0x175   : > { %v4744_v57 = vadd.f32 %v3552_v53, %v3440_v51  ;;  %v3442_v59 = vpop.f32.mrf.mxu0 }
 0x176   : > { %v3443_v60 = vadd.f32 %v3442_v59, %v3441_v54  ;;  %v3554_v62 = vpop.f32.mrf.mxu1 }
 0x177   : > { %v3555_v63 = vadd.f32 %v3554_v62, %v3553_v55  ;;  %v3444_v1 = vpop.f32.mrf.mxu0 }
 0x178   : > { %v3556_v2 = vpop.f32.mrf.mxu1 }
 0x179   : > { %v4746_v6 = vadd.f32 %v3555_v63, %v3443_v60  ;;  %v3445_v3 = vpop.f32.mrf.mxu0 }
 0x17a   : > { %v3446_v7 = vadd.f32 %v3445_v3, %v3444_v1  ;;  %v3557_v8 = vpop.f32.mrf.mxu1 }
 0x17b   : > { %v3558_v9 = vadd.f32 %v3557_v8, %v3556_v2  ;;  %v3447_v10 = vpop.f32.mrf.mxu0 }
 0x17c   : > { %v3559_v12 = vpop.f32.mrf.mxu1 }
 0x17d   : > { %v4748_v13 = vadd.f32 %v3558_v9, %v3446_v7  ;;  %v3448_v15 = vpop.f32.mrf.mxu0 }
 0x17e   : > { %v3449_v16 = vadd.f32 %v3448_v15, %v3447_v10  ;;  %v3560_v17 = vpop.f32.mrf.mxu1 }
 0x17f   : > { %v3561_v18 = vadd.f32 %v3560_v17, %v3559_v12  ;;  %v3450_v20 = vpop.f32.mrf.mxu0 }
 0x180   : > { %v3562_v23 = vpop.f32.mrf.mxu1 }
 0x181   : > { %v4750_v24 = vadd.f32 %v3561_v18, %v3449_v16  ;;  %v3451_v25 = vpop.f32.mrf.mxu0 }
 0x182   : > { %v3452_v26 = vadd.f32 %v3451_v25, %v3450_v20  ;;  %v3563_v27 = vpop.f32.mrf.mxu1 }
 0x183   : > { %v3564_v29 = vadd.f32 %v3563_v27, %v3562_v23  ;;  %v3453_v31 = vpop.f32.mrf.mxu0 }
 0x184   : > { %v3565_v32 = vpop.f32.mrf.mxu1 }
 0x185   : > { %v4752_v33 = vadd.f32 %v3564_v29, %v3452_v26  ;;  %v3454_v35 = vpop.f32.mrf.mxu0 }
 0x186   : > { %v3455_v36 = vadd.f32 %v3454_v35, %v3453_v31  ;;  %v3566_v39 = vpop.f32.mrf.mxu1 }
 0x187   : > { %v3567_v40 = vadd.f32 %v3566_v39, %v3565_v32  ;;  %v3456_v43 = vpop.f32.mrf.mxu0 }
 0x188   : > { %v3568_v44 = vpop.f32.mrf.mxu1 }
 0x189   : > { %v4754_v45 = vadd.f32 %v3567_v40, %v3455_v36  ;;  %v3457_v47 = vpop.f32.mrf.mxu0 }
 0x18a   : > { %v3458_v49 = vadd.f32 %v3457_v47, %v3456_v43  ;;  %v3569_v51 = vpop.f32.mrf.mxu1 }
 0x18b   : > { %v3570_v52 = vadd.f32 %v3569_v51, %v3568_v44  ;;  %v3459_v53 = vpop.f32.mrf.mxu0 }
 0x18c   : > { %v3571_v54 = vpop.f32.mrf.mxu1 }
 0x18d   : > { %v4756_v55 = vadd.f32 %v3570_v52, %v3458_v49  ;;  %v3460_v59 = vpop.f32.mrf.mxu0 }
 0x18e   : > { %v3461_v60 = vadd.f32 %v3460_v59, %v3459_v53  ;;  %v3572_v62 = vpop.f32.mrf.mxu1 }
 0x18f   : > { %v3573_v63 = vadd.f32 %v3572_v62, %v3571_v54  ;;  %v3462_v1 = vpop.f32.mrf.mxu0  ;;  %v578_v54 = vld [vmem:[#allocation2 + $0xb0] sm:$0xff] }
 0x190   : > { %v3574_v2 = vpop.f32.mrf.mxu1 }
 0x191   : > { %v4758_v3 = vadd.f32 %v3573_v63, %v3461_v60  ;;  %v3463_v7 = vpop.f32.mrf.mxu0 }
 0x192   : > { %v3464_v8 = vadd.f32 %v3463_v7, %v3462_v1  ;;  %v3575_v9 = vpop.f32.mrf.mxu1 }
 0x193   : > { %v3576_v10 = vadd.f32 %v3575_v9, %v3574_v2  ;;  %v3465_v12 = vpop.f32.mrf.mxu0 }
 0x194   : > { %v3577_v15 = vpop.f32.mrf.mxu1 }
 0x195   : > { %v4760_v16 = vadd.f32 %v3576_v10, %v3464_v8  ;;  %v3466_v17 = vpop.f32.mrf.mxu0  ;;  %v579_v10 = vld [vmem:[#allocation2] sm:$0xff] }
 0x196   : > { %v3467_v18 = vadd.f32 %v3466_v17, %v3465_v12  ;;  %v3578_v20 = vpop.f32.mrf.mxu1 }
 0x197   : > { %v3579_v23 = vadd.f32 %v3578_v20, %v3577_v15  ;;  %v3468_v25 = vpop.f32.mrf.mxu0 }
 0x198   : > { %v3580_v26 = vpop.f32.mrf.mxu1 }
 0x199   : > { %v4762_v27 = vadd.f32 %v3579_v23, %v3467_v18  ;;  %v3469_v29 = vpop.f32.mrf.mxu0 }
 0x19a   : > { %v3470_v31 = vadd.f32 %v3469_v29, %v3468_v25  ;;  %v3581_v32 = vpop.f32.mrf.mxu1  ;;  %v580_v29 = vld [vmem:[#allocation2 + $0xd8] sm:$0xff] }
 0x19b   : > { %v3582_v35 = vadd.f32 %v3581_v32, %v3580_v26  ;;  %v3599_v36 = vpop.f32.mrf.mxu0 }
 0x19c   : > { %v3711_v39 = vpop.f32.mrf.mxu1 }
 0x19d   : > { %v4764_v40 = vadd.f32 %v3582_v35, %v3470_v31  ;;  %v3600_v43 = vpop.f32.mrf.mxu0 }
 0x19e   : > { %v3601_v44 = vadd.f32 %v3600_v43, %v3599_v36  ;;  %v3712_v47 = vpop.f32.mrf.mxu1 }
 0x19f   : > { %v3602_v49 = vpop.f32.mrf.mxu0  ;;  %v3713_v52 = vadd.f32 %v3712_v47, %v3711_v39 }
 0x1a0   : > { %v1735_v51 = vadd.f32 %v3601_v44, %v4682_v34  ;;  %v3714_v53 = vpop.f32.mrf.mxu1 }
 0x1a1   : > { %v3603_v59 = vpop.f32.mrf.mxu0 }
 0x1a2   : > { %v1896_v60 = vadd.f32 %v3713_v52, %v1735_v51  ;;  %v3604_v62 = vadd.f32 %v3603_v59, %v3602_v49  ;;  %v3715_v63 = vpop.f32.mrf.mxu1  ;;  %v581_v49 = vld [vmem:[#allocation2 + $0x18] sm:$0xff] }
 0x1a3   : > { %v3605_v1 = vpop.f32.mrf.mxu0  ;;  %v3716_v8 = vadd.f32 %v3715_v63, %v3714_v53 }
 0x1a4   : > { %v2022_v2 = vadd.f32 %v1896_v60, %v578_v54  ;;  %v1738_v7 = vadd.f32 %v3604_v62, %v4684_v42  ;;  %v3717_v9 = vpop.f32.mrf.mxu1 }
 0x1a5   : > { %v3606_v12 = vpop.f32.mrf.mxu0 }
 0x1a6   : > { %2054 = vst [vmem:[#allocation2 + $0xb0] sm:$0xff] %v2022_v2  ;;  %v1899_v15 = vadd.f32 %v3716_v8, %v1738_v7  ;;  %v3607_v17 = vadd.f32 %v3606_v12, %v3605_v1  ;;  %v3718_v18 = vpop.f32.mrf.mxu1  ;;  %v582_v1 = vld [vmem:[#allocation2 + $0x50] sm:$0xff] }
 0x1a7   : > { %v3608_v34 = vpop.f32.mrf.mxu0  ;;  %v3719_v25 = vadd.f32 %v3718_v18, %v3717_v9  ;;  %v583_v18 = vld [vmem:[#allocation2 + $0x68] sm:$0xff] }
 0x1a8   : > { %v2023_v20 = vadd.f32 %v1899_v15, %v579_v10  ;;  %v1743_v23 = vadd.f32 %v3607_v17, %v4690_v56  ;;  %v3720_v26 = vpop.f32.mrf.mxu1 }
 0x1a9   : > { %v3609_v31 = vpop.f32.mrf.mxu0 }
 0x1aa   : > { %2055 = vst [vmem:[#allocation2] sm:$0xff] %v2023_v20  ;;  %v1904_v32 = vadd.f32 %v3719_v25, %v1743_v23  ;;  %v3610_v35 = vadd.f32 %v3609_v31, %v3608_v34  ;;  %v3721_v42 = vpop.f32.mrf.mxu1 }
 0x1ab   : > { %v3611_v36 = vpop.f32.mrf.mxu0  ;;  %v3722_v44 = vadd.f32 %v3721_v42, %v3720_v26 }
 0x1ac   : > { %v2024_v39 = vadd.f32 %v1904_v32, %v580_v29  ;;  %v1746_v43 = vadd.f32 %v3610_v35, %v4692_v0  ;;  %v3723_v47 = vpop.f32.mrf.mxu1  ;;  %v584_v35 = vld [vmem:[#allocation2 + $0x30] sm:$0xff] }
 0x1ad   : > { %v3612_v51 = vpop.f32.mrf.mxu0 }
 0x1ae   : > { %2056 = vst [vmem:[#allocation2 + $0xd8] sm:$0xff] %v2024_v39  ;;  %v1907_v52 = vadd.f32 %v3722_v44, %v1746_v43  ;;  %v3613_v53 = vadd.f32 %v3612_v51, %v3611_v36  ;;  %v3724_v56 = vpop.f32.mrf.mxu1 }
 0x1af   : > { %v3614_v54 = vpop.f32.mrf.mxu0  ;;  %v3725_v62 = vadd.f32 %v3724_v56, %v3723_v47 }
 0x1b0   : > { %v2025_v59 = vadd.f32 %v1907_v52, %v581_v49  ;;  %v1751_v60 = vadd.f32 %v3613_v53, %v4698_v14  ;;  %v3726_v63 = vpop.f32.mrf.mxu1  ;;  %v585_v52 = vld [vmem:[#allocation2 + $0x48] sm:$0xff] }
 0x1b1   : > { %v3615_v2 = vpop.f32.mrf.mxu0 }
 0x1b2   : > { %2057 = vst [vmem:[#allocation2 + $0x18] sm:$0xff] %v2025_v59  ;;  %v1912_v7 = vadd.f32 %v3725_v62, %v1751_v60  ;;  %v3616_v8 = vadd.f32 %v3615_v2, %v3614_v54  ;;  %v3727_v0 = vpop.f32.mrf.mxu1  ;;  %v586_v2 = vld [vmem:[#allocation2 + $0x80] sm:$0xff] }
 0x1b3   : > { %v3617_v9 = vpop.f32.mrf.mxu0  ;;  %v3728_v15 = vadd.f32 %v3727_v0, %v3726_v63 }
 0x1b4   : > { %v2026_v10 = vadd.f32 %v1912_v7, %v582_v1  ;;  %v1754_v12 = vadd.f32 %v3616_v8, %v4700_v22  ;;  %v3729_v17 = vpop.f32.mrf.mxu1 }
 0x1b5   : > { %v3618_v34 = vpop.f32.mrf.mxu0 }
 0x1b6   : > { %2058 = vst [vmem:[#allocation2 + $0x50] sm:$0xff] %v2026_v10  ;;  %v1915_v20 = vadd.f32 %v3728_v15, %v1754_v12  ;;  %v3619_v23 = vadd.f32 %v3618_v34, %v3617_v9  ;;  %v3730_v14 = vpop.f32.mrf.mxu1 }
 0x1b7   : > { %v3620_v25 = vpop.f32.mrf.mxu0  ;;  %v3731_v31 = vadd.f32 %v3730_v14, %v3729_v17 }
 0x1b8   : > { %v2027_v26 = vadd.f32 %v1915_v20, %v583_v18  ;;  %v1759_v29 = vadd.f32 %v3619_v23, %v4706_v37  ;;  %v3732_v32 = vpop.f32.mrf.mxu1  ;;  %v587_v18 = vld [vmem:[#allocation2 + $0x88] sm:$0xff] }
 0x1b9   : > { %v3621_v42 = vpop.f32.mrf.mxu0 }
 0x1ba   : > { %2059 = vst [vmem:[#allocation2 + $0x68] sm:$0xff] %v2027_v26  ;;  %v1920_v36 = vadd.f32 %v3731_v31, %v1759_v29  ;;  %v3622_v39 = vadd.f32 %v3621_v42, %v3620_v25  ;;  %v3733_v22 = vpop.f32.mrf.mxu1 }
 0x1bb   : > { %v3623_v43 = vpop.f32.mrf.mxu0  ;;  %v3734_v49 = vadd.f32 %v3733_v22, %v3732_v32  ;;  %v588_v32 = vld [vmem:[#allocation2 + $0xe8] sm:$0xff] }
 0x1bc   : > { %v2028_v44 = vadd.f32 %v1920_v36, %v584_v35  ;;  %v1762_v47 = vadd.f32 %v3622_v39, %v4708_v46  ;;  %v3735_v51 = vpop.f32.mrf.mxu1 }
 0x1bd   : > { %v3624_v53 = vpop.f32.mrf.mxu0 }
 0x1be   : > { %2060 = vst [vmem:[#allocation2 + $0x30] sm:$0xff] %v2028_v44  ;;  %v1923_v56 = vadd.f32 %v3734_v49, %v1762_v47  ;;  %v3625_v54 = vadd.f32 %v3624_v53, %v3623_v43  ;;  %v3736_v37 = vpop.f32.mrf.mxu1  ;;  %v589_v49 = vld [vmem:[#allocation2 + $0xb8] sm:$0xff] }
 0x1bf   : > { %v3626_v59 = vpop.f32.mrf.mxu0  ;;  %v3737_v63 = vadd.f32 %v3736_v37, %v3735_v51 }
 0x1c0   : > { %v2029_v60 = vadd.f32 %v1923_v56, %v585_v52  ;;  %v1767_v62 = vadd.f32 %v3625_v54, %v4714_v61  ;;  %v3738_v1 = vpop.f32.mrf.mxu1 }
 0x1c1   : > { %v3627_v7 = vpop.f32.mrf.mxu0 }
 0x1c2   : > { %2061 = vst [vmem:[#allocation2 + $0x48] sm:$0xff] %v2029_v60  ;;  %v1928_v8 = vadd.f32 %v3737_v63, %v1767_v62  ;;  %v3628_v0 = vadd.f32 %v3627_v7, %v3626_v59  ;;  %v3739_v46 = vpop.f32.mrf.mxu1  ;;  %v590_v62 = vld [vmem:[#allocation2 + $0x60] sm:$0xff] }
 0x1c3   : > { %v3629_v9 = vpop.f32.mrf.mxu0  ;;  %v3740_v15 = vadd.f32 %v3739_v46, %v3738_v1 }
 0x1c4   : > { %v2030_v10 = vadd.f32 %v1928_v8, %v586_v2  ;;  %v1770_v12 = vadd.f32 %v3628_v0, %v4716_v5  ;;  %v3741_v17 = vpop.f32.mrf.mxu1 }
 0x1c5   : > { %v3630_v34 = vpop.f32.mrf.mxu0 }
 0x1c6   : > { %2062 = vst [vmem:[#allocation2 + $0x80] sm:$0xff] %v2030_v10  ;;  %v1931_v20 = vadd.f32 %v3740_v15, %v1770_v12  ;;  %v3631_v23 = vadd.f32 %v3630_v34, %v3629_v9  ;;  %v3742_v61 = vpop.f32.mrf.mxu1  ;;  %v591_v10 = vld [vmem:[#allocation2 + $0xf0] sm:$0xff] }
 0x1c7   : > { %v3632_v14 = vpop.f32.mrf.mxu0  ;;  %v3743_v29 = vadd.f32 %v3742_v61, %v3741_v17 }
 0x1c8   : > { %v2031_v25 = vadd.f32 %v1931_v20, %v587_v18  ;;  %v1775_v26 = vadd.f32 %v3631_v23, %v4722_v21  ;;  %v3744_v31 = vpop.f32.mrf.mxu1 }
 0x1c9   : > { %v3633_v35 = vpop.f32.mrf.mxu0 }
 0x1ca   : > { %2063 = vst [vmem:[#allocation2 + $0x88] sm:$0xff] %v2031_v25  ;;  %v1936_v42 = vadd.f32 %v3743_v29, %v1775_v26  ;;  %v3634_v36 = vadd.f32 %v3633_v35, %v3632_v14  ;;  %v3745_v5 = vpop.f32.mrf.mxu1  ;;  %v592_v14 = vld [vmem:[#allocation2 + $0x8] sm:$0xff] }
 0x1cb   : > { %v3635_v39 = vpop.f32.mrf.mxu0  ;;  %v3746_v44 = vadd.f32 %v3745_v5, %v3744_v31  ;;  %v593_v5 = vld [vmem:[#allocation2 + $0x78] sm:$0xff] }
 0x1cc   : > { %v2032_v22 = vadd.f32 %v1936_v42, %v588_v32  ;;  %v1778_v43 = vadd.f32 %v3634_v36, %v4724_v30  ;;  %v3747_v47 = vpop.f32.mrf.mxu1 }
 0x1cd   : > { %v3636_v51 = vpop.f32.mrf.mxu0 }
 0x1ce   : > { %2064 = vst [vmem:[#allocation2 + $0xe8] sm:$0xff] %v2032_v22  ;;  %v1939_v52 = vadd.f32 %v3746_v44, %v1778_v43  ;;  %v3637_v53 = vadd.f32 %v3636_v51, %v3635_v39  ;;  %v3748_v21 = vpop.f32.mrf.mxu1 }
 0x1cf   : > { %v3638_v56 = vpop.f32.mrf.mxu0  ;;  %v3749_v59 = vadd.f32 %v3748_v21, %v3747_v47 }
 0x1d0   : > { %v2033_v54 = vadd.f32 %v1939_v52, %v589_v49  ;;  %v1783_v37 = vadd.f32 %v3637_v53, %v4726_v41  ;;  %v3750_v60 = vpop.f32.mrf.mxu1  ;;  %v594_v53 = vld [vmem:[#allocation2 + $0x38] sm:$0xff] }
 0x1d1   : > { %v3639_v63 = vpop.f32.mrf.mxu0 }
 0x1d2   : > { %2065 = vst [vmem:[#allocation2 + $0xb8] sm:$0xff] %v2033_v54  ;;  %v1944_v1 = vadd.f32 %v3749_v59, %v1783_v37  ;;  %v3640_v2 = vadd.f32 %v3639_v63, %v3638_v56  ;;  %v3751_v30 = vpop.f32.mrf.mxu1 }
 0x1d3   : > { %v3641_v7 = vpop.f32.mrf.mxu0  ;;  %v3752_v46 = vadd.f32 %v3751_v30, %v3750_v60 }
 0x1d4   : > { %v2034_v8 = vadd.f32 %v1944_v1, %v590_v62  ;;  %v1786_v0 = vadd.f32 %v3640_v2, %v4728_v50  ;;  %v3753_v9 = vpop.f32.mrf.mxu1  ;;  %v595_v1 = vld [vmem:[#allocation2 + $0x58] sm:$0xff] }
 0x1d5   : > { %v3642_v12 = vpop.f32.mrf.mxu0 }
 0x1d6   : > { %2066 = vst [vmem:[#allocation2 + $0x60] sm:$0xff] %v2034_v8  ;;  %v1947_v15 = vadd.f32 %v3752_v46, %v1786_v0  ;;  %v3643_v17 = vadd.f32 %v3642_v12, %v3641_v7  ;;  %v3754_v41 = vpop.f32.mrf.mxu1  ;;  %v596_v12 = vld [vmem:[#allocation2 + $0x40] sm:$0xff] }
 0x1d7   : > { %v3644_v18 = vpop.f32.mrf.mxu0  ;;  %v3755_v23 = vadd.f32 %v3754_v41, %v3753_v9 }
 0x1d8   : > { %v2035_v34 = vadd.f32 %v1947_v15, %v591_v10  ;;  %v1791_v20 = vadd.f32 %v3643_v17, %v4730_v58  ;;  %v3756_v61 = vpop.f32.mrf.mxu1 }
 0x1d9   : > { %v3645_v25 = vpop.f32.mrf.mxu0 }
 0x1da   : > { %2067 = vst [vmem:[#allocation2 + $0xf0] sm:$0xff] %v2035_v34  ;;  %v1952_v26 = vadd.f32 %v3755_v23, %v1791_v20  ;;  %v3646_v29 = vadd.f32 %v3645_v25, %v3644_v18  ;;  %v3757_v50 = vpop.f32.mrf.mxu1 }
 0x1db   : > { %v3647_v31 = vpop.f32.mrf.mxu0  ;;  %v3758_v42 = vadd.f32 %v3757_v50, %v3756_v61 }
 0x1dc   : > { %v2036_v32 = vadd.f32 %v1952_v26, %v592_v14  ;;  %v1794_v35 = vadd.f32 %v3646_v29, %v4732_v4  ;;  %v3759_v36 = vpop.f32.mrf.mxu1  ;;  %v597_v14 = vld [vmem:[#allocation2 + $0xc8] sm:$0xff] }
 0x1dd   : > { %v3648_v39 = vpop.f32.mrf.mxu0 }
 0x1de   : > { %2068 = vst [vmem:[#allocation2 + $0x8] sm:$0xff] %v2036_v32  ;;  %v1955_v22 = vadd.f32 %v3758_v42, %v1794_v35  ;;  %v3649_v43 = vadd.f32 %v3648_v39, %v3647_v31  ;;  %v3760_v58 = vpop.f32.mrf.mxu1 }
 0x1df   : > { %v3650_v44 = vpop.f32.mrf.mxu0  ;;  %v3761_v51 = vadd.f32 %v3760_v58, %v3759_v36  ;;  %v598_v36 = vld [vmem:[#allocation2 + $0xe0] sm:$0xff] }
 0x1e0   : > { %v2037_v47 = vadd.f32 %v1955_v22, %v593_v5  ;;  %v1799_v49 = vadd.f32 %v3649_v43, %v4734_v11  ;;  %v3762_v52 = vpop.f32.mrf.mxu1 }
 0x1e1   : > { %v3651_v21 = vpop.f32.mrf.mxu0 }
 0x1e2   : > { %2069 = vst [vmem:[#allocation2 + $0x78] sm:$0xff] %v2037_v47  ;;  %v1960_v56 = vadd.f32 %v3761_v51, %v1799_v49  ;;  %v3652_v54 = vadd.f32 %v3651_v21, %v3650_v44  ;;  %v3763_v4 = vpop.f32.mrf.mxu1  ;;  %v599_v51 = vld [vmem:[#allocation2 + $0x90] sm:$0xff] }
 0x1e3   : > { %v3653_v37 = vpop.f32.mrf.mxu0  ;;  %v3764_v62 = vadd.f32 %v3763_v4, %v3762_v52 }
 0x1e4   : > { %v2038_v59 = vadd.f32 %v1960_v56, %v594_v53  ;;  %v1802_v60 = vadd.f32 %v3652_v54, %v4736_v19  ;;  %v3765_v63 = vpop.f32.mrf.mxu1 }
 0x1e5   : > { %v3654_v2 = vpop.f32.mrf.mxu0 }
 0x1e6   : > { %2070 = vst [vmem:[#allocation2 + $0x38] sm:$0xff] %v2038_v59  ;;  %v1963_v30 = vadd.f32 %v3764_v62, %v1802_v60  ;;  %v3655_v7 = vadd.f32 %v3654_v2, %v3653_v37  ;;  %v3766_v11 = vpop.f32.mrf.mxu1  ;;  %v600_v60 = vld [vmem:[#allocation2 + $0x70] sm:$0xff] }
 0x1e7   : > { %v3656_v8 = vpop.f32.mrf.mxu0  ;;  %v3767_v9 = vadd.f32 %v3766_v11, %v3765_v63 }
 0x1e8   : > { %v2039_v0 = vadd.f32 %v1963_v30, %v595_v1  ;;  %v1807_v46 = vadd.f32 %v3655_v7, %v4738_v28  ;;  %v3768_v10 = vpop.f32.mrf.mxu1 }
 0x1e9   : > { %v3657_v15 = vpop.f32.mrf.mxu0 }
 0x1ea   : > { %2071 = vst [vmem:[#allocation2 + $0x58] sm:$0xff] %v2039_v0  ;;  %v1968_v17 = vadd.f32 %v3767_v9, %v1807_v46  ;;  %v3658_v41 = vadd.f32 %v3657_v15, %v3656_v8  ;;  %v3769_v19 = vpop.f32.mrf.mxu1  ;;  %v601_v0 = vld [vmem:[#allocation2 + $0xc0] sm:$0xff] }
 0x1eb   : > { %v3659_v18 = vpop.f32.mrf.mxu0  ;;  %v3770_v23 = vadd.f32 %v3769_v19, %v3768_v10 }
 0x1ec   : > { %v2040_v34 = vadd.f32 %v1968_v17, %v596_v12  ;;  %v1810_v20 = vadd.f32 %v3658_v41, %v4740_v38  ;;  %v3771_v61 = vpop.f32.mrf.mxu1 }
 0x1ed   : > { %v3660_v25 = vpop.f32.mrf.mxu0 }
 0x1ee   : > { %2072 = vst [vmem:[#allocation2 + $0x40] sm:$0xff] %v2040_v34  ;;  %v1971_v26 = vadd.f32 %v3770_v23, %v1810_v20  ;;  %v3661_v29 = vadd.f32 %v3660_v25, %v3659_v18  ;;  %v3772_v28 = vpop.f32.mrf.mxu1  ;;  %v602_v18 = vld [vmem:[#allocation2 + $0xa8] sm:$0xff] }
 0x1ef   : > { %v3662_v50 = vpop.f32.mrf.mxu0  ;;  %v3773_v35 = vadd.f32 %v3772_v28, %v3771_v61  ;;  %v603_v28 = vld [vmem:[#allocation2 + $0xd0] sm:$0xff] }
 0x1f0   : > { %v2041_v31 = vadd.f32 %v1971_v26, %v597_v14  ;;  %v1815_v32 = vadd.f32 %v3661_v29, %v4742_v48  ;;  %v3774_v42 = vpop.f32.mrf.mxu1 }
 0x1f1   : > { %v3663_v5 = vpop.f32.mrf.mxu0 }
 0x1f2   : > { %2073 = vst [vmem:[#allocation2 + $0xc8] sm:$0xff] %v2041_v31  ;;  %v1976_v39 = vadd.f32 %v3773_v35, %v1815_v32  ;;  %v3664_v22 = vadd.f32 %v3663_v5, %v3662_v50  ;;  %v3775_v38 = vpop.f32.mrf.mxu1 }
 0x1f3   : > { %v3665_v43 = vpop.f32.mrf.mxu0  ;;  %v3776_v47 = vadd.f32 %v3775_v38, %v3774_v42 }
 0x1f4   : > { %v2042_v58 = vadd.f32 %v1976_v39, %v598_v36  ;;  %v1818_v44 = vadd.f32 %v3664_v22, %v4744_v57  ;;  %v3777_v49 = vpop.f32.mrf.mxu1  ;;  %v604_v22 = vld [vmem:[#allocation2 + $0x10] sm:$0xff] }
 0x1f5   : > { %v3666_v52 = vpop.f32.mrf.mxu0 }
 0x1f6   : > { %2074 = vst [vmem:[#allocation2 + $0xe0] sm:$0xff] %v2042_v58  ;;  %v1979_v53 = vadd.f32 %v3776_v47, %v1818_v44  ;;  %v3667_v21 = vadd.f32 %v3666_v52, %v3665_v43  ;;  %v3778_v48 = vpop.f32.mrf.mxu1 }
 0x1f7   : > { %v3668_v56 = vpop.f32.mrf.mxu0  ;;  %v3779_v37 = vadd.f32 %v3778_v48, %v3777_v49 }
 0x1f8   : > { %v2043_v54 = vadd.f32 %v1979_v53, %v599_v51  ;;  %v1823_v4 = vadd.f32 %v3667_v21, %v4746_v6  ;;  %v3780_v59 = vpop.f32.mrf.mxu1  ;;  %v605_v53 = vld [vmem:[#allocation2 + $0x28] sm:$0xff] }
 0x1f9   : > { %v3669_v62 = vpop.f32.mrf.mxu0 }
 0x1fa   : > { %2075 = vst [vmem:[#allocation2 + $0x90] sm:$0xff] %v2043_v54  ;;  %v1984_v63 = vadd.f32 %v3779_v37, %v1823_v4  ;;  %v3670_v1 = vadd.f32 %v3669_v62, %v3668_v56  ;;  %v3781_v57 = vpop.f32.mrf.mxu1  ;;  %v606_v62 = vld [vmem:[#allocation2 + $0xa0] sm:$0xff] }
 0x1fb   : > { %v3671_v2 = vpop.f32.mrf.mxu0  ;;  %v3782_v11 = vadd.f32 %v3781_v57, %v3780_v59 }
 0x1fc   : > { %v2044_v30 = vadd.f32 %v1984_v63, %v600_v60  ;;  %v1826_v7 = vadd.f32 %v3670_v1, %v4748_v13  ;;  %v3783_v8 = vpop.f32.mrf.mxu1 }
 0x1fd   : > { %v3672_v46 = vpop.f32.mrf.mxu0 }
 0x1fe   : > { %2076 = vst [vmem:[#allocation2 + $0x70] sm:$0xff] %v2044_v30  ;;  %v1987_v9 = vadd.f32 %v3782_v11, %v1826_v7  ;;  %v3673_v10 = vadd.f32 %v3672_v46, %v3671_v2  ;;  %v3784_v6 = vpop.f32.mrf.mxu1 }
 0x1ff   : > { %v3674_v12 = vpop.f32.mrf.mxu0  ;;  %v3785_v41 = vadd.f32 %v3784_v6, %v3783_v8 }
 0x200   : > { %v2045_v15 = vadd.f32 %v1987_v9, %v601_v0  ;;  %v1831_v17 = vadd.f32 %v3673_v10, %v4750_v24  ;;  %v3786_v19 = vpop.f32.mrf.mxu1  ;;  %v607_v0 = vld [vmem:[#allocation2 + $0xf8] sm:$0xff] }
 0x201   : > { %v3675_v34 = vpop.f32.mrf.mxu0 }
 0x202   : > { %2077 = vst [vmem:[#allocation2 + $0xc0] sm:$0xff] %v2045_v15  ;;  %v1992_v20 = vadd.f32 %v3785_v41, %v1831_v17  ;;  %v3676_v23 = vadd.f32 %v3675_v34, %v3674_v12  ;;  %v3787_v13 = vpop.f32.mrf.mxu1 }
 0x203   : > { %v3677_v61 = vpop.f32.mrf.mxu0  ;;  %v3788_v26 = vadd.f32 %v3787_v13, %v3786_v19  ;;  %v608_v19 = vld [vmem:[#allocation2 + $0x20] sm:$0xff] }
 0x204   : > { %v2046_v14 = vadd.f32 %v1992_v20, %v602_v18  ;;  %v1834_v25 = vadd.f32 %v3676_v23, %v4752_v33  ;;  %v3789_v29 = vpop.f32.mrf.mxu1 }
 0x205   : > { %v3678_v50 = vpop.f32.mrf.mxu0 }
 0x206   : > { %2078 = vst [vmem:[#allocation2 + $0xa8] sm:$0xff] %v2046_v14  ;;  %v1995_v31 = vadd.f32 %v3788_v26, %v1834_v25  ;;  %v3679_v32 = vadd.f32 %v3678_v50, %v3677_v61  ;;  %v3790_v24 = vpop.f32.mrf.mxu1  ;;  %v609_v14 = vld [vmem:[#allocation2 + $0x98] sm:$0xff] }
 0x207   : > { %v3680_v35 = vpop.f32.mrf.mxu0  ;;  %v3791_v5 = vadd.f32 %v3790_v24, %v3789_v29 }
 0x208   : > { %v2047_v42 = vadd.f32 %v1995_v31, %v603_v28  ;;  %v1839_v36 = vadd.f32 %v3679_v32, %v4754_v45  ;;  %v3792_v39 = vpop.f32.mrf.mxu1 }
 0x209   : > { %v3681_v38 = vpop.f32.mrf.mxu0 }
 0x20a   : > { %2079 = vst [vmem:[#allocation2 + $0xd0] sm:$0xff] %v2047_v42  ;;  %v2000_v43 = vadd.f32 %v3791_v5, %v1839_v36  ;;  %v3682_v58 = vadd.f32 %v3681_v38, %v3680_v35  ;;  %v3793_v33 = vpop.f32.mrf.mxu1 }
 0x20b   : > { %v3683_v44 = vpop.f32.mrf.mxu0  ;;  %v3794_v51 = vadd.f32 %v3793_v33, %v3792_v39 }
 0x20c   : > { %v2048_v47 = vadd.f32 %v2000_v43, %v604_v22  ;;  %v1842_v49 = vadd.f32 %v3682_v58, %v4756_v55  ;;  %v3795_v52 = vpop.f32.mrf.mxu1 }
 0x20d   : > { %v3684_v21 = vpop.f32.mrf.mxu0 }
 0x20e   : > { %2080 = vst [vmem:[#allocation2 + $0x10] sm:$0xff] %v2048_v47  ;;  %v2003_v48 = vadd.f32 %v3794_v51, %v1842_v49  ;;  %v3685_v56 = vadd.f32 %v3684_v21, %v3683_v44  ;;  %v3796_v45 = vpop.f32.mrf.mxu1 }
 0x20f   : > { %v3686_v54 = vpop.f32.mrf.mxu0  ;;  %v3797_v59 = vadd.f32 %v3796_v45, %v3795_v52 }
 0x210   : > { %v2049_v4 = vadd.f32 %v2003_v48, %v605_v53  ;;  %v1847_v37 = vadd.f32 %v3685_v56, %v4758_v3  ;;  %v3798_v60 = vpop.f32.mrf.mxu1 }
 0x211   : > { %v3687_v63 = vpop.f32.mrf.mxu0 }
 0x212   : > { %2081 = vst [vmem:[#allocation2 + $0x28] sm:$0xff] %v2049_v4  ;;  %v2008_v1 = vadd.f32 %v3797_v59, %v1847_v37  ;;  %v3688_v57 = vadd.f32 %v3687_v63, %v3686_v54  ;;  %v3799_v55 = vpop.f32.mrf.mxu1 }
 0x213   : > { %v3689_v2 = vpop.f32.mrf.mxu0  ;;  %v3800_v11 = vadd.f32 %v3799_v55, %v3798_v60 }
 0x214   : > { %v2050_v30 = vadd.f32 %v2008_v1, %v606_v62  ;;  %v1850_v7 = vadd.f32 %v3688_v57, %v4760_v16  ;;  %v3801_v8 = vpop.f32.mrf.mxu1 }
 0x215   : > { %v3690_v46 = vpop.f32.mrf.mxu0 }
 0x216   : > { %2082 = vst [vmem:[#allocation2 + $0xa0] sm:$0xff] %v2050_v30  ;;  %v2011_v9 = vadd.f32 %v3800_v11, %v1850_v7  ;;  %v3691_v10 = vadd.f32 %v3690_v46, %v3689_v2  ;;  %v3802_v3 = vpop.f32.mrf.mxu1 }
 0x217   : > { %v3692_v6 = vpop.f32.mrf.mxu0  ;;  %v3803_v17 = vadd.f32 %v3802_v3, %v3801_v8 }
 0x218   : > { %v2051_v12 = vadd.f32 %v2011_v9, %v607_v0  ;;  %v1855_v15 = vadd.f32 %v3691_v10, %v4762_v27  ;;  %v3804_v41 = vpop.f32.mrf.mxu1 }
 0x219   : > { %v3693_v18 = vpop.f32.mrf.mxu0 }
 0x21a   : > { %2083 = vst [vmem:[#allocation2 + $0xf8] sm:$0xff] %v2051_v12  ;;  %v2016_v34 = vadd.f32 %v3803_v17, %v1855_v15  ;;  %v3694_v20 = vadd.f32 %v3693_v18, %v3692_v6  ;;  %v3805_v16 = vpop.f32.mrf.mxu1 }
 0x21b   : > { %v3806_v61 = vadd.f32 %v3805_v16, %v3804_v41 }
 0x21c   : > { %v2052_v23 = vadd.f32 %v2016_v34, %v608_v19  ;;  %v1858_v13 = vadd.f32 %v3694_v20, %v4764_v40 }
 0x21e   : > { %2084 = vst [vmem:[#allocation2 + $0x20] sm:$0xff] %v2052_v23  ;;  %v2019_v25 = vadd.f32 %v3806_v61, %v1858_v13 }
 0x220   : > { %v2053_v26 = vadd.f32 %v2019_v25, %v609_v14 }
 0x222   : > { %2085 = vst [vmem:[#allocation2 + $0x98] sm:$0xff] %v2053_v26 }
 0x223 PF: > { %v2237_v27 = vld [vmem:[%s5434_s5 + $0x78] sm:$0xff]  ;;  %v2236_v29 = vld [vmem:[%s5434_s5 + $0x70] sm:$0xff]  ;;  %s3354_s25 = sshll.u32 %s4258_s19, 8  ;;  %s2123_s26 = sld [smem:[#allocation6]]  ;;  %v2235_v40 = vld [vmem:[%s5434_s5 + $0x68] sm:$0xff] }
 0x224   : > { %3903 = vmatprep.subr.mxu0 %v2237_v27  ;;  %s4811_s11 = scalar_lea.vmem %s5433_s4, %s3354_s25  ;;  %v2234_v28 = vld [vmem:[%s5434_s5 + $0x60] sm:$0xff]  ;;  %v2233_v50 = vld [vmem:[%s5434_s5 + $0x58] sm:$0xff]  ;;  %v2232_v32 = vld [vmem:[%s5434_s5 + $0x50] sm:$0xff] }
 0x225   : > { %3904 = vmatpush3.msra.mxu0 %v2237_v27  ;;  %v2091_v31 = vld [vmem:[%s4811_s11] sm:$0xff]  ;;  %v2124_v24 = vld [vmem:[#allocation2 + $0xb0] sm:$0xff]  ;;  %v2231_v36 = vld [vmem:[%s5434_s5 + $0x48] sm:$0xff] }
 0x226   : > { %3905 = vmatprep.subr.mxu0 %v2236_v29  ;;  %v2230_v39 = vld [vmem:[%s5434_s5 + $0x40] sm:$0xff]  ;;  %v2229_v22 = vld [vmem:[%s5434_s5 + $0x38] sm:$0xff]  ;;  %v2228_v38 = vld [vmem:[%s5434_s5 + $0x30] sm:$0xff] }
 0x227   : > { %3906 = vmatpush3.msra.mxu0 %v2236_v29  ;;  %v2227_v43 = vld [vmem:[%s5434_s5 + $0x28] sm:$0xff]  ;;  %v2226_v58 = vld [vmem:[%s5434_s5 + $0x20] sm:$0xff]  ;;  %v2114_v33 = vld [vmem:[%s4811_s11 + $0xb8] sm:$0xff] }
 0x228   : > { %3907 = vmatprep.subr.mxu0 %v2235_v40  ;;  %v2225_v44 = vld [vmem:[%s5434_s5 + $0x18] sm:$0xff]  ;;  %v2115_v49 = vld [vmem:[%s4811_s11 + $0xc0] sm:$0xff]  ;;  %v2092_v51 = vld [vmem:[%s4811_s11 + $0x8] sm:$0xff] }
 0x229   : > { %3908 = vmatpush3.msra.mxu0 %v2235_v40  ;;  %s2156_s15 = sadd.f32 1.0, %s2123_s26  ;;  %v2116_v53 = vld [vmem:[%s4811_s11 + $0xc8] sm:$0xff]  ;;  %v2117_v21 = vld [vmem:[%s4811_s11 + $0xd0] sm:$0xff]  ;;  %v2118_v54 = vld [vmem:[%s4811_s11 + $0xd8] sm:$0xff] }
 0x22a   : > { %3909 = vmatprep.subr.mxu0 %v2234_v28  ;;  %v2093_v48 = vld [vmem:[%s4811_s11 + $0x10] sm:$0xff]  ;;  %v2119_v59 = vld [vmem:[%s4811_s11 + $0xe0] sm:$0xff]  ;;  %v2120_v60 = vld [vmem:[%s4811_s11 + $0xe8] sm:$0xff] }
 0x22b   : > { %3910 = vmatpush3.msra.mxu0 %v2234_v28  ;;  %v4823_v35 = vstv %s2156_s15  ;;  %v2224_v4 = vld [vmem:[%s5434_s5 + $0x10] sm:$0xff]  ;;  %v2223_v62 = vld [vmem:[%s5434_s5 + $0x8] sm:$0xff]  ;;  %v2125_v63 = vld [vmem:[#allocation2] sm:$0xff] }
 0x22c   : > { %3911 = vmatprep.subr.mxu0 %v2233_v50  ;;  %v2158_v42 = vmul.f32 %v4823_v35, %v2091_v31  ;;  %v4849_v47 = vmul.f32 %v4823_v35, %v2114_v33  ;;  %v4854_v52 = vmul.f32 %v4823_v35, %v2115_v49  ;;  %v4860_v56 = vmul.f32 %v4823_v35, %v2116_v53  ;;  %v2121_v2 = vld [vmem:[%s4811_s11 + $0xf0] sm:$0xff]  ;;  %v2094_v7 = vld [vmem:[%s4811_s11 + $0x18] sm:$0xff]  ;;  %v2095_v9 = vld [vmem:[%s4811_s11 + $0x20] sm:$0xff] }
 0x22d   : > { %3912 = vmatpush3.msra.mxu0 %v2233_v50  ;;  %v4863_v45 = vmul.f32 %v4823_v35, %v2117_v21  ;;  %v4870_v37 = vmul.f32 %v4823_v35, %v2118_v54  ;;  %v2159_v1 = vmul.f32 %v4823_v35, %v2092_v51  ;;  %v4879_v57 = vmul.f32 %v4823_v35, %v2119_v59  ;;  %v2122_v8 = vld [vmem:[%s4811_s11 + $0xf8] sm:$0xff]  ;;  %v2516_v3 = vld [vmem:[%s5436_s7 + $0x70] sm:$0xff]  ;;  %v2222_v6 = vld [vmem:[%s5434_s5] sm:$0xff] }
 0x22e   : > { %3913 = vmatprep.subr.mxu0 %v2232_v32  ;;  %v2190_v5 = vadd.f32 %v2158_v42, %v2124_v24  ;;  %v4882_v55 = vmul.f32 %v4823_v35, %v2120_v60  ;;  %v2160_v30 = vmul.f32 %v4823_v35, %v2093_v48  ;;  %v4888_v11 = vmul.f32 %v4823_v35, %v2121_v2  ;;  %v2517_v0 = vld [vmem:[%s5436_s7 + $0x78] sm:$0xff]  ;;  %v2515_v12 = vld [vmem:[%s5436_s7 + $0x68] sm:$0xff]  ;;  %v2514_v20 = vld [vmem:[%s5436_s7 + $0x60] sm:$0xff] }
 0x22f   : > { %3914 = vmatpush3.msra.mxu0 %v2232_v32  ;;  %v2126_v46 = vld [vmem:[#allocation2 + $0xd8] sm:$0xff]  ;;  %v4896_v10 = vmul.f32 %v4823_v35, %v2122_v8  ;;  %3983 = vmatprep.subr.mxu1 %v2517_v0  ;;  %v2191_v15 = vadd.f32 %v2159_v1, %v2125_v63  ;;  %v2161_v17 = vmul.f32 %v4823_v35, %v2094_v7  ;;  %v2096_v34 = vld [vmem:[%s4811_s11 + $0x28] sm:$0xff]  ;;  %v2128_v16 = vld [vmem:[#allocation2 + $0x50] sm:$0xff] }
 0x230   : > { %3915 = vmatprep.subr.mxu0 %v2231_v36  ;;  %3935 = vmatprep.mubr.f32.mxu0 %v2190_v5  ;;  %v2192_v41 = vadd.f32 %v2160_v30, %v2126_v46  ;;  %v2127_v19 = vld [vmem:[#allocation2 + $0x18] sm:$0xff]  ;;  %v2162_v18 = vmul.f32 %v4823_v35, %v2095_v9  ;;  %v2097_v23 = vld [vmem:[%s4811_s11 + $0x30] sm:$0xff]  ;;  %v2163_v14 = vmul.f32 %v4823_v35, %v2096_v34  ;;  %v2129_v26 = vld [vmem:[#allocation2 + $0x68] sm:$0xff] }
 0x231   : > { %3916 = vmatpush3.msra.mxu0 %v2231_v36  ;;  %3984 = vmatpush3.msra.mxu1 %v2517_v0  ;;  %v2513_v13 = vld [vmem:[%s5436_s7 + $0x58] sm:$0xff]  ;;  %v2193_v61 = vadd.f32 %v2161_v17, %v2127_v19  ;;  %v2164_v27 = vmul.f32 %v4823_v35, %v2097_v23  ;;  %v2512_v40 = vld [vmem:[%s5436_s7 + $0x50] sm:$0xff]  ;;  %v2099_v50 = vld [vmem:[%s4811_s11 + $0x40] sm:$0xff] }
 0x232   : > { %3917 = vmatprep.subr.mxu0 %v2230_v39  ;;  %3985 = vmatprep.subr.mxu1 %v2516_v3  ;;  %v2194_v25 = vadd.f32 %v2162_v18, %v2128_v16  ;;  %v2098_v29 = vld [vmem:[%s4811_s11 + $0x38] sm:$0xff]  ;;  %v2130_v28 = vld [vmem:[#allocation2 + $0x30] sm:$0xff]  ;;  %v2511_v31 = vld [vmem:[%s5436_s7 + $0x48] sm:$0xff]  ;;  %v2195_v32 = vadd.f32 %v2163_v14, %v2129_v26  ;;  %v2166_v5 = vmul.f32 %v4823_v35, %v2099_v50 }
 0x233   : > { %3918 = vmatpush3.msra.mxu0 %v2230_v39  ;;  %3986 = vmatpush3.msra.mxu1 %v2516_v3  ;;  %v2165_v24 = vmul.f32 %v4823_v35, %v2098_v29  ;;  %v2196_v42 = vadd.f32 %v2164_v27, %v2130_v28  ;;  %v2131_v36 = vld [vmem:[#allocation2 + $0x48] sm:$0xff]  ;;  %v2102_v21 = vld [vmem:[%s4811_s11 + $0x58] sm:$0xff]  ;;  %v2508_v48 = vld [vmem:[%s5436_s7 + $0x30] sm:$0xff] }
 0x234   : > { %3919 = vmatprep.subr.mxu0 %v2229_v22  ;;  %3987 = vmatprep.subr.mxu1 %v2515_v12  ;;  %v2100_v39 = vld [vmem:[%s4811_s11 + $0x48] sm:$0xff]  ;;  %v2135_v1 = vld [vmem:[#allocation2 + $0xb8] sm:$0xff]  ;;  %v2506_v7 = vld [vmem:[%s5436_s7 + $0x20] sm:$0xff] }
 0x235   : > { %3920 = vmatpush3.msra.mxu0 %v2229_v22  ;;  %3988 = vmatpush3.msra.mxu1 %v2515_v12  ;;  %v2510_v22 = vld [vmem:[%s5436_s7 + $0x40] sm:$0xff]  ;;  %v2197_v33 = vadd.f32 %v2165_v24, %v2131_v36  ;;  %v2133_v51 = vld [vmem:[#allocation2 + $0x88] sm:$0xff]  ;;  %v2105_v0 = vld [vmem:[%s4811_s11 + $0x70] sm:$0xff] }
 0x236   : > { %3921 = vmatprep.subr.mxu0 %v2228_v38  ;;  %3989 = vmatprep.subr.mxu1 %v2514_v20  ;;  %v2134_v54 = vld [vmem:[#allocation2 + $0xe8] sm:$0xff]  ;;  %v2136_v8 = vld [vmem:[#allocation2 + $0x60] sm:$0xff]  ;;  %v2172_v12 = vmul.f32 %v4823_v35, %v2105_v0  ;;  %v2141_v27 = vld [vmem:[#allocation2 + $0x58] sm:$0xff] }
 0x237   : > { %3922 = vmatpush3.msra.mxu0 %v2228_v38  ;;  %3990 = vmatpush3.msra.mxu1 %v2514_v20  ;;  %v2132_v38 = vld [vmem:[#allocation2 + $0x80] sm:$0xff]  ;;  %v2507_v59 = vld [vmem:[%s5436_s7 + $0x28] sm:$0xff]  ;;  %v2139_v20 = vld [vmem:[#allocation2 + $0x78] sm:$0xff] }
 0x238   : > { %3923 = vmatprep.subr.mxu0 %v2227_v43  ;;  %3991 = vmatprep.subr.mxu1 %v2513_v13  ;;  %v2198_v49 = vadd.f32 %v2166_v5, %v2132_v38  ;;  %v2104_v30 = vld [vmem:[%s4811_s11 + $0x68] sm:$0xff]  ;;  %v2142_v28 = vld [vmem:[#allocation2 + $0x40] sm:$0xff] }
 0x239   : > { %3924 = vmatpush3.msra.mxu0 %v2227_v43  ;;  %3992 = vmatpush3.msra.mxu1 %v2513_v13  ;;  %v2101_v43 = vld [vmem:[%s4811_s11 + $0x50] sm:$0xff]  ;;  %v2171_v9 = vmul.f32 %v4823_v35, %v2104_v30  ;;  %v2138_v17 = vld [vmem:[#allocation2 + $0x8] sm:$0xff]  ;;  %v2140_v13 = vld [vmem:[#allocation2 + $0x38] sm:$0xff] }
 0x23a   : > { %3925 = vmatprep.subr.mxu0 %v2226_v58  ;;  %3993 = vmatprep.subr.mxu1 %v2512_v40  ;;  %v2168_v53 = vmul.f32 %v4823_v35, %v2101_v43  ;;  %v2204_v34 = vadd.f32 %v2172_v12, %v2138_v17  ;;  %v2108_v23 = vld [vmem:[%s4811_s11 + $0x88] sm:$0xff]  ;;  %v2111_v50 = vld [vmem:[%s4811_s11 + $0xa0] sm:$0xff] }
 0x23b   : > { %3926 = vmatpush3.msra.mxu0 %v2226_v58  ;;  %3994 = vmatpush3.msra.mxu1 %v2512_v40  ;;  %v2509_v58 = vld [vmem:[%s5436_s7 + $0x38] sm:$0xff]  ;;  %v2178_v36 = vmul.f32 %v4823_v35, %v2111_v50  ;;  %v2112_v5 = vld [vmem:[%s4811_s11 + $0xa8] sm:$0xff] }
 0x23c   : > { %3927 = vmatprep.subr.mxu0 %v2225_v44  ;;  %3995 = vmatprep.subr.mxu1 %v2511_v31  ;;  %v2200_v63 = vadd.f32 %v2168_v53, %v2134_v54  ;;  %v2110_v40 = vld [vmem:[%s4811_s11 + $0x98] sm:$0xff]  ;;  %v2179_v43 = vmul.f32 %v4823_v35, %v2112_v5 }
 0x23d   : > { %3928 = vmatpush3.msra.mxu0 %v2225_v44  ;;  %3996 = vmatpush3.msra.mxu1 %v2511_v31  ;;  %v2167_v44 = vmul.f32 %v4823_v35, %v2100_v39  ;;  %v2144_v39 = vld [vmem:[#allocation2 + $0xe0] sm:$0xff] }
 0x23e   : > { %3929 = vmatprep.subr.mxu0 %v2224_v4  ;;  %3997 = vmatprep.subr.mxu1 %v2510_v22 }
 0x23f   : > { %3930 = vmatpush3.msra.mxu0 %v2224_v4  ;;  %3998 = vmatpush3.msra.mxu1 %v2510_v22  ;;  %v2103_v4 = vld [vmem:[%s4811_s11 + $0x60] sm:$0xff]  ;;  %v2199_v60 = vadd.f32 %v2167_v44, %v2133_v51  ;;  %v2113_v22 = vld [vmem:[%s4811_s11 + $0xb0] sm:$0xff] }
 0x240   : > { %3931 = vmatprep.subr.mxu0 %v2223_v62  ;;  %3999 = vmatprep.subr.mxu1 %v2509_v58  ;;  %v2170_v2 = vmul.f32 %v4823_v35, %v2103_v4  ;;  %v2180_v44 = vmul.f32 %v4823_v35, %v2113_v22 }
 0x241   : > { %3932 = vmatpush3.msra.mxu0 %v2223_v62  ;;  %4000 = vmatpush3.msra.mxu1 %v2509_v58  ;;  %v2169_v62 = vmul.f32 %v4823_v35, %v2102_v21  ;;  %v2210_v58 = vadd.f32 %v2178_v36, %v2144_v39  ;;  %v2147_v21 = vld [vmem:[#allocation2 + $0xc0] sm:$0xff] }
 0x242   : > { %3933 = vmatprep.subr.mxu0 %v2222_v6  ;;  %4001 = vmatprep.subr.mxu1 %v2508_v48  ;;  %v2202_v3 = vadd.f32 %v2170_v2, %v2136_v8  ;;  %v2213_v54 = vadd.f32 %v4849_v47, %v2147_v21  ;;  %v2153_v47 = vld [vmem:[#allocation2 + $0xf8] sm:$0xff] }
 0x243   : > { %3934 = vmatpush3.msra.mxu0 %v2222_v6  ;;  %4002 = vmatpush3.msra.mxu1 %v2508_v48  ;;  %v2201_v46 = vadd.f32 %v2169_v62, %v2135_v1  ;;  %v2137_v6 = vld [vmem:[#allocation2 + $0xf0] sm:$0xff]  ;;  %v2148_v48 = vld [vmem:[#allocation2 + $0xa8] sm:$0xff]  ;;  %v2152_v1 = vld [vmem:[#allocation2 + $0xa0] sm:$0xff] }
 0x244   : > { %3936 = vmatmul.mubr.f32.vlgmr.msra.gmra.mxu0 %v2191_v15  ;;  %4003 = vmatprep.subr.mxu1 %v2507_v59  ;;  %v2106_v15 = vld [vmem:[%s4811_s11 + $0x78] sm:$0xff]  ;;  %v2203_v19 = vadd.f32 %v2171_v9, %v2137_v6  ;;  %v2214_v4 = vadd.f32 %v4854_v52, %v2148_v48  ;;  %v2218_v30 = vadd.f32 %v4879_v57, %v2152_v1  ;;  %v2504_v57 = vld [vmem:[%s5436_s7 + $0x10] sm:$0xff] }
 0x245   : > { %3938 = vmatprep.mubr.f32.mxu0 %v2192_v41  ;;  %4004 = vmatpush3.msra.mxu1 %v2507_v59  ;;  %v2107_v41 = vld [vmem:[%s4811_s11 + $0x80] sm:$0xff]  ;;  %v2173_v18 = vmul.f32 %v4823_v35, %v2106_v15  ;;  %v2149_v59 = vld [vmem:[#allocation2 + $0xd0] sm:$0xff]  ;;  %v2219_v52 = vadd.f32 %v4882_v55, %v2153_v47  ;;  %v2503_v55 = vld [vmem:[%s5436_s7 + $0x8] sm:$0xff] }
 0x246   : > { %4005 = vmatprep.subr.mxu1 %v2506_v7  ;;  %v2174_v16 = vmul.f32 %v4823_v35, %v2107_v41  ;;  %v2215_v62 = vadd.f32 %v4860_v56, %v2149_v59  ;;  %v2155_v56 = vld [vmem:[#allocation2 + $0x98] sm:$0xff] }
 0x247   : > { %4006 = vmatpush3.msra.mxu1 %v2506_v7  ;;  %v2205_v14 = vadd.f32 %v2173_v18, %v2139_v20  ;;  %v2154_v7 = vld [vmem:[#allocation2 + $0x20] sm:$0xff] }
 0x248   : > { %3939 = vmatmul.mubr.f32.gmra.mxu0 %v2193_v61  ;;  %v2109_v61 = vld [vmem:[%s4811_s11 + $0x90] sm:$0xff]  ;;  %v2206_v26 = vadd.f32 %v2174_v16, %v2140_v13  ;;  %v2220_v8 = vadd.f32 %v4888_v11, %v2154_v7  ;;  %v2502_v11 = vld [vmem:[%s5436_s7] sm:$0xff] }
 0x249   : > { %3941 = vmatprep.mubr.f32.mxu0 %v2194_v25  ;;  %v2175_v25 = vmul.f32 %v4823_v35, %v2108_v23  ;;  %v2176_v29 = vmul.f32 %v4823_v35, %v2109_v61 }
 0x24b   : > { %v2207_v31 = vadd.f32 %v2175_v25, %v2141_v27  ;;  %v2208_v24 = vadd.f32 %v2176_v29, %v2142_v28 }
 0x24c   : > { %3942 = vmatmul.mubr.f32.gmra.mxu0 %v2195_v32  ;;  %v2177_v32 = vmul.f32 %v4823_v35, %v2110_v40 }
 0x24d   : > { %3944 = vmatprep.mubr.f32.mxu0 %v2196_v42  ;;  %v2143_v42 = vld [vmem:[#allocation2 + $0xc8] sm:$0xff] }
 0x24e   : > { %v2209_v38 = vadd.f32 %v2177_v32, %v2143_v42 }
 0x250   : > { %3945 = vmatmul.mubr.f32.gmra.mxu0 %v2197_v33  ;;  %v2145_v33 = vld [vmem:[#allocation2 + $0x90] sm:$0xff] }
 0x251   : > { %3947 = vmatprep.mubr.f32.mxu0 %v2198_v49  ;;  %v2146_v49 = vld [vmem:[#allocation2 + $0x70] sm:$0xff]  ;;  %v2211_v51 = vadd.f32 %v2179_v43, %v2145_v33 }
 0x252   : > { %v2212_v53 = vadd.f32 %v2180_v44, %v2146_v49 }
 0x254   : > { %3948 = vmatmul.mubr.f32.gmra.mxu0 %v2199_v60  ;;  %v2150_v60 = vld [vmem:[#allocation2 + $0x10] sm:$0xff] }
 0x255   : > { %3950 = vmatprep.mubr.f32.mxu0 %v2200_v63  ;;  %v2216_v35 = vadd.f32 %v4863_v45, %v2150_v60  ;;  %v2151_v63 = vld [vmem:[#allocation2 + $0x28] sm:$0xff]  ;;  %v2221_v45 = vadd.f32 %v4896_v10, %v2155_v56  ;;  %v4996_v10 = vld [vmem:[%s5435_s6] ss:$0 sm:$0xff] }
 0x256   : > { %v2217_v2 = vadd.f32 %v4870_v37, %v2151_v63  ;;  %v2505_v37 = vld [vmem:[%s5436_s7 + $0x18] sm:$0xff] }
 0x257   : > { %4007 = vmatprep.subr.mxu1 %v2505_v37 }
 0x258   : > { %3951 = vmatmul.mubr.f32.gmra.mxu0 %v2201_v46  ;;  %4008 = vmatpush3.msra.mxu1 %v2505_v37 }
 0x259   : > { %3953 = vmatprep.mubr.f32.mxu0 %v2202_v3  ;;  %4009 = vmatprep.subr.mxu1 %v2504_v57 }
 0x25a   : > { %4010 = vmatpush3.msra.mxu1 %v2504_v57 }
 0x25b   : > { %4011 = vmatprep.subr.mxu1 %v2503_v55 }
 0x25c   : > { %3954 = vmatmul.mubr.f32.gmra.mxu0 %v2203_v19  ;;  %4012 = vmatpush3.msra.mxu1 %v2503_v55 }
 0x25d   : > { %3956 = vmatprep.mubr.f32.mxu0 %v2204_v34  ;;  %4013 = vmatprep.subr.mxu1 %v2502_v11 }
 0x25e   : > { %4014 = vmatpush3.msra.mxu1 %v2502_v11 }
 0x260   : > { %3957 = vmatmul.mubr.f32.gmra.mxu0 %v2205_v14 }
 0x261   : > { %3959 = vmatprep.mubr.f32.mxu0 %v2206_v26 }
 0x264   : > { %3960 = vmatmul.mubr.f32.gmra.mxu0 %v2207_v31 }
 0x265   : > { %3962 = vmatprep.mubr.f32.mxu0 %v2208_v24 }
 0x268   : > { %3963 = vmatmul.mubr.f32.gmra.mxu0 %v2209_v38 }
 0x269   : > { %3965 = vmatprep.mubr.f32.mxu0 %v2210_v58 }
 0x26c   : > { %3966 = vmatmul.mubr.f32.gmra.mxu0 %v2211_v51 }
 0x26d   : > { %3968 = vmatprep.mubr.f32.mxu0 %v2212_v53 }
 0x270   : > { %3969 = vmatmul.mubr.f32.gmra.mxu0 %v2213_v54 }
 0x271   : > { %3971 = vmatprep.mubr.f32.mxu0 %v2214_v4 }
 0x274   : > { %3972 = vmatmul.mubr.f32.gmra.mxu0 %v2215_v62 }
 0x275   : > { %3974 = vmatprep.mubr.f32.mxu0 %v2216_v35 }
 0x278   : > { %3975 = vmatmul.mubr.f32.gmra.mxu0 %v2217_v2 }
 0x279   : > { %3977 = vmatprep.mubr.f32.mxu0 %v2218_v30 }
 0x27c   : > { %3978 = vmatmul.mubr.f32.gmra.mxu0 %v2219_v52 }
 0x27d   : > { %3980 = vmatprep.mubr.f32.mxu0 %v2220_v8 }
 0x280   : > { %3981 = vmatmul.mubr.f32.gmra.mxu0 %v2221_v45 }
 0x304   : > { %v3937_v0 = vpop.f32.mrf.mxu0 }
 0x305   : > { %v2317_v46 = vadd.f32 %v3937_v0, %v4996_v10 }
 0x306   : > { %v2311_v9 = vpop.f32.mrf.mxu0 }
 0x307   : > { %v2312_v3 = vadd.f32 %v4996_v10, %v2311_v9  ;;  %v2471_v15 = vmax.f32 %v2317_v46, 0.0 }
 0x308   : > { %v3940_v6 = vpop.f32.mrf.mxu0 }
 0x309   : > { %v2470_v12 = vmax.f32 %v2312_v3, 0.0  ;;  %v2327_v17 = vadd.f32 %v3940_v6, %v4996_v10 }
 0x30a   : > { %v2321_v41 = vpop.f32.mrf.mxu0 }
 0x30b   : > { %v2322_v19 = vadd.f32 %v4996_v10, %v2321_v41  ;;  %4015 = vmatprep.mubr.f32.mxu1 %v2470_v12  ;;  %v2473_v16 = vmax.f32 %v2327_v17, 0.0 }
 0x30c   : > { %v3943_v18 = vpop.f32.mrf.mxu0  ;;  %4016 = vmatmul.mubr.f32.vlgmr.msra.gmra.mxu1 %v2471_v15 }
 0x30d   : > { %v2472_v34 = vmax.f32 %v2322_v19, 0.0  ;;  %v2337_v20 = vadd.f32 %v3943_v18, %v4996_v10 }
 0x30e   : > { %v2331_v23 = vpop.f32.mrf.mxu0 }
 0x30f   : > { %v2332_v13 = vadd.f32 %v4996_v10, %v2331_v23  ;;  %4018 = vmatprep.mubr.f32.mxu1 %v2472_v34  ;;  %v2475_v61 = vmax.f32 %v2337_v20, 0.0 }
 0x310   : > { %v3946_v14 = vpop.f32.mrf.mxu0  ;;  %4019 = vmatmul.mubr.f32.gmra.mxu1 %v2473_v16 }
 0x311   : > { %v2474_v25 = vmax.f32 %v2332_v13, 0.0  ;;  %v2347_v26 = vadd.f32 %v3946_v14, %v4996_v10 }
 0x312   : > { %v2341_v27 = vpop.f32.mrf.mxu0 }
 0x313   : > { %v2342_v29 = vadd.f32 %v4996_v10, %v2341_v27  ;;  %4021 = vmatprep.mubr.f32.mxu1 %v2474_v25  ;;  %v2477_v40 = vmax.f32 %v2347_v26, 0.0 }
 0x314   : > { %v3949_v28 = vpop.f32.mrf.mxu0  ;;  %4022 = vmatmul.mubr.f32.gmra.mxu1 %v2475_v61 }
 0x315   : > { %v2476_v50 = vmax.f32 %v2342_v29, 0.0  ;;  %v2357_v31 = vadd.f32 %v3949_v28, %v4996_v10 }
 0x316   : > { %v2351_v32 = vpop.f32.mrf.mxu0 }
 0x317   : > { %v2352_v24 = vadd.f32 %v4996_v10, %v2351_v32  ;;  %4024 = vmatprep.mubr.f32.mxu1 %v2476_v50  ;;  %v2479_v42 = vmax.f32 %v2357_v31, 0.0 }
 0x318   : > { %v3952_v36 = vpop.f32.mrf.mxu0  ;;  %4025 = vmatmul.mubr.f32.gmra.mxu1 %v2477_v40 }
 0x319   : > { %v2478_v5 = vmax.f32 %v2352_v24, 0.0  ;;  %v2367_v39 = vadd.f32 %v3952_v36, %v4996_v10 }
 0x31a   : > { %v2361_v22 = vpop.f32.mrf.mxu0 }
 0x31b   : > { %v2362_v38 = vadd.f32 %v4996_v10, %v2361_v22  ;;  %4027 = vmatprep.mubr.f32.mxu1 %v2478_v5  ;;  %v2481_v43 = vmax.f32 %v2367_v39, 0.0 }
 0x31c   : > { %v3955_v58 = vpop.f32.mrf.mxu0  ;;  %4028 = vmatmul.mubr.f32.gmra.mxu1 %v2479_v42 }
 0x31d   : > { %v2480_v33 = vmax.f32 %v2362_v38, 0.0  ;;  %v2377_v44 = vadd.f32 %v3955_v58, %v4996_v10  ;;  %v2750_v38 = vlaneseq  ;;  %v5035_v58 = vld [vmem:[%s5437_s8] ss:$0 sm:$0xff] }
 0x31e   : > { %v2371_v49 = vpop.f32.mrf.mxu0 }
 0x31f   : > { %v2372_v51 = vadd.f32 %v4996_v10, %v2371_v49  ;;  %4030 = vmatprep.mubr.f32.mxu1 %v2480_v33  ;;  %v2483_v53 = vmax.f32 %v2377_v44, 0.0 }
 0x320   : > { %v3958_v21 = vpop.f32.mrf.mxu0  ;;  %4031 = vmatmul.mubr.f32.gmra.mxu1 %v2481_v43  ;;  %v5030_v43 = vand.u32 127, %v2750_v38 }
 0x321   : > { %v2482_v48 = vmax.f32 %v2372_v51, 0.0  ;;  %v2387_v54 = vadd.f32 %v3958_v21, %v4996_v10 }
 0x322   : > { %v2381_v4 = vpop.f32.mrf.mxu0  ;;  %vm2752_vm0 = vcmp.lt.s32.totalorder %v5030_v43, 7 }
 0x323   : > { %v2382_v59 = vadd.f32 %v4996_v10, %v2381_v4  ;;  %4033 = vmatprep.mubr.f32.mxu1 %v2482_v48  ;;  %v2485_v60 = vmax.f32 %v2387_v54, 0.0 }
 0x324   : > { %v3961_v62 = vpop.f32.mrf.mxu0  ;;  %4034 = vmatmul.mubr.f32.gmra.mxu1 %v2483_v53 }
 0x325   : > { %v2484_v35 = vmax.f32 %v2382_v59, 0.0  ;;  %v2397_v63 = vadd.f32 %v3961_v62, %v4996_v10 }
 0x326   : > { %v2391_v1 = vpop.f32.mrf.mxu0 }
 0x327   : > { %v2392_v2 = vadd.f32 %v4996_v10, %v2391_v1  ;;  %4036 = vmatprep.mubr.f32.mxu1 %v2484_v35  ;;  %v2487_v30 = vmax.f32 %v2397_v63, 0.0 }
 0x328   : > { %v3964_v47 = vpop.f32.mrf.mxu0  ;;  %4037 = vmatmul.mubr.f32.gmra.mxu1 %v2485_v60 }
 0x329   : > { %v2486_v7 = vmax.f32 %v2392_v2, 0.0  ;;  %v2407_v52 = vadd.f32 %v3964_v47, %v4996_v10 }
 0x32a   : > { %v2401_v8 = vpop.f32.mrf.mxu0 }
 0x32b   : > { %v2402_v56 = vadd.f32 %v4996_v10, %v2401_v8  ;;  %4039 = vmatprep.mubr.f32.mxu1 %v2486_v7  ;;  %v2489_v45 = vmax.f32 %v2407_v52, 0.0 }
 0x32c   : > { %v3967_v37 = vpop.f32.mrf.mxu0  ;;  %4040 = vmatmul.mubr.f32.gmra.mxu1 %v2487_v30 }
 0x32d   : > { %v2488_v57 = vmax.f32 %v2402_v56, 0.0  ;;  %v2417_v55 = vadd.f32 %v3967_v37, %v4996_v10 }
 0x32e   : > { %v2411_v11 = vpop.f32.mrf.mxu0 }
 0x32f   : > { %v2412_v0 = vadd.f32 %v4996_v10, %v2411_v11  ;;  %4042 = vmatprep.mubr.f32.mxu1 %v2488_v57  ;;  %v2491_v46 = vmax.f32 %v2417_v55, 0.0 }
 0x330   : > { %v3970_v9 = vpop.f32.mrf.mxu0  ;;  %4043 = vmatmul.mubr.f32.gmra.mxu1 %v2489_v45 }
 0x331   : > { %v2490_v3 = vmax.f32 %v2412_v0, 0.0  ;;  %v2427_v6 = vadd.f32 %v3970_v9, %v4996_v10 }
 0x332   : > { %v2421_v12 = vpop.f32.mrf.mxu0 }
 0x333   : > { %v2422_v15 = vadd.f32 %v4996_v10, %v2421_v12  ;;  %4045 = vmatprep.mubr.f32.mxu1 %v2490_v3  ;;  %v2493_v17 = vmax.f32 %v2427_v6, 0.0 }
 0x334   : > { %v3973_v41 = vpop.f32.mrf.mxu0  ;;  %4046 = vmatmul.mubr.f32.gmra.mxu1 %v2491_v46 }
 0x335   : > { %v2492_v19 = vmax.f32 %v2422_v15, 0.0  ;;  %v2437_v18 = vadd.f32 %v3973_v41, %v4996_v10 }
 0x336   : > { %v2431_v34 = vpop.f32.mrf.mxu0 }
 0x337   : > { %v2432_v20 = vadd.f32 %v4996_v10, %v2431_v34  ;;  %4048 = vmatprep.mubr.f32.mxu1 %v2492_v19  ;;  %v2495_v16 = vmax.f32 %v2437_v18, 0.0 }
 0x338   : > { %v3976_v23 = vpop.f32.mrf.mxu0  ;;  %4049 = vmatmul.mubr.f32.gmra.mxu1 %v2493_v17 }
 0x339   : > { %v2494_v13 = vmax.f32 %v2432_v20, 0.0  ;;  %v2447_v61 = vadd.f32 %v3976_v23, %v4996_v10 }
 0x33a   : > { %v2441_v14 = vpop.f32.mrf.mxu0 }
 0x33b   : > { %v2442_v25 = vadd.f32 %v4996_v10, %v2441_v14  ;;  %4051 = vmatprep.mubr.f32.mxu1 %v2494_v13  ;;  %v2497_v26 = vmax.f32 %v2447_v61, 0.0 }
 0x33c   : > { %v3979_v27 = vpop.f32.mrf.mxu0  ;;  %4052 = vmatmul.mubr.f32.gmra.mxu1 %v2495_v16 }
 0x33d   : > { %v2496_v29 = vmax.f32 %v2442_v25, 0.0  ;;  %v2457_v40 = vadd.f32 %v3979_v27, %v4996_v10 }
 0x33e   : > { %v2451_v28 = vpop.f32.mrf.mxu0 }
 0x33f   : > { %v2452_v50 = vadd.f32 %v4996_v10, %v2451_v28  ;;  %4054 = vmatprep.mubr.f32.mxu1 %v2496_v29  ;;  %v2499_v31 = vmax.f32 %v2457_v40, 0.0 }
 0x340   : > { %v3982_v32 = vpop.f32.mrf.mxu0  ;;  %4055 = vmatmul.mubr.f32.gmra.mxu1 %v2497_v26 }
 0x341   : > { %v2498_v24 = vmax.f32 %v2452_v50, 0.0  ;;  %v2467_v42 = vadd.f32 %v3982_v32, %v4996_v10 }
 0x342   : > { %v2461_v36 = vpop.f32.mrf.mxu0 }
 0x343   : > { %v2462_v5 = vadd.f32 %v4996_v10, %v2461_v36  ;;  %4057 = vmatprep.mubr.f32.mxu1 %v2498_v24  ;;  %v2501_v39 = vmax.f32 %v2467_v42, 0.0 }
 0x344   : > { %4058 = vmatmul.mubr.f32.gmra.mxu1 %v2499_v31 }
 0x345   : > { %v2500_v22 = vmax.f32 %v2462_v5, 0.0 }
 0x347   : > { %4060 = vmatprep.mubr.f32.mxu1 %v2500_v22 }
 0x348   : > { %4061 = vmatmul.mubr.f32.gmra.mxu1 %v2501_v39 }
 0x3cc   : > { %v4017_v33 = vpop.f32.mrf.mxu1 }
 0x3cd   : > { %v2597_v44 = vadd.f32 %v4017_v33, %v5035_v58 }
 0x3ce   : > { %v2591_v10 = vpop.f32.mrf.mxu1 }
 0x3cf   : > { %v2592_v49 = vadd.f32 %v5035_v58, %v2591_v10  ;;  %v5042_v51 = vsel %vm2752_vm0, %v2597_v44, -1e+30 }
 0x3d0   : > { %2787 = vmax.xlane.f32.xlu0 %v5042_v51  ;;  %v4020_v53 = vpop.f32.mrf.mxu1 }
 0x3d1   : > { %v2607_v21 = vadd.f32 %v4020_v53, %v5035_v58  ;;  %v5053_v59 = vsel %vm2752_vm0, %v2592_v49, -1e+30 }
 0x3d2   : > { %v2601_v48 = vpop.f32.mrf.mxu1 }
 0x3d3   : > { %v2602_v54 = vadd.f32 %v5035_v58, %v2601_v48  ;;  %v5049_v4 = vsel %vm2752_vm0, %v2607_v21, -1e+30 }
 0x3d4   : > { %2791 = vmax.xlane.f32.xlu1 %v5049_v4  ;;  %v4023_v60 = vpop.f32.mrf.mxu1  ;;  %2785 = vmax.xlane.f32.xlu0 %v5053_v59 }
 0x3d5   : > { %v2617_v35 = vadd.f32 %v4023_v60, %v5035_v58  ;;  %v5061_v1 = vsel %vm2752_vm0, %v2602_v54, -1e+30 }
 0x3d6   : > { %v2611_v62 = vpop.f32.mrf.mxu1 }
 0x3d7   : > { %v2612_v63 = vadd.f32 %v5035_v58, %v2611_v62  ;;  %v5073_v8 = vsel %vm2752_vm0, %v2617_v35, -1e+30 }
 0x3d8   : > { %v4026_v2 = vpop.f32.mrf.mxu1  ;;  %2789 = vmax.xlane.f32.xlu1 %v5061_v1 }
 0x3d9   : > { %v5066_v30 = vsel %vm2752_vm0, %v2612_v63, -1e+30  ;;  %v2627_v7 = vadd.f32 %v4026_v2, %v5035_v58 }
 0x3da   : > { %v2621_v47 = vpop.f32.mrf.mxu1  ;;  %2793 = vmax.xlane.f32.xlu0 %v5066_v30 }
 0x3db   : > { %v2622_v52 = vadd.f32 %v5035_v58, %v2621_v47  ;;  %v5085_v11 = vsel %vm2752_vm0, %v2627_v7, -1e+30 }
 0x3dc   : > { %v4029_v56 = vpop.f32.mrf.mxu1  ;;  %2795 = vmax.xlane.f32.xlu1 %v5073_v8 }
 0x3dd   : > { %v5078_v45 = vsel %vm2752_vm0, %v2622_v52, -1e+30  ;;  %v2637_v57 = vadd.f32 %v4029_v56, %v5035_v58 }
 0x3de   : > { %v2631_v37 = vpop.f32.mrf.mxu1  ;;  %2797 = vmax.xlane.f32.xlu0 %v5078_v45 }
 0x3df   : > { %v2632_v55 = vadd.f32 %v5035_v58, %v2631_v37  ;;  %v5097_v12 = vsel %vm2752_vm0, %v2637_v57, -1e+30 }
 0x3e0   : > { %v4032_v0 = vpop.f32.mrf.mxu1  ;;  %2799 = vmax.xlane.f32.xlu1 %v5085_v11 }
 0x3e1   : > { %v5090_v46 = vsel %vm2752_vm0, %v2632_v55, -1e+30  ;;  %v2647_v3 = vadd.f32 %v4032_v0, %v5035_v58 }
 0x3e2   : > { %v2641_v9 = vpop.f32.mrf.mxu1  ;;  %2801 = vmax.xlane.f32.xlu0 %v5090_v46 }
 0x3e3   : > { %v2642_v6 = vadd.f32 %v5035_v58, %v2641_v9  ;;  %v5109_v34 = vsel %vm2752_vm0, %v2647_v3, -1e+30 }
 0x3e4   : > { %v4035_v15 = vpop.f32.mrf.mxu1  ;;  %2803 = vmax.xlane.f32.xlu1 %v5097_v12 }
 0x3e5   : > { %v5102_v17 = vsel %vm2752_vm0, %v2642_v6, -1e+30  ;;  %v2657_v19 = vadd.f32 %v4035_v15, %v5035_v58 }
 0x3e6   : > { %v2651_v41 = vpop.f32.mrf.mxu1  ;;  %2805 = vmax.xlane.f32.xlu0 %v5102_v17 }
 0x3e7   : > { %v2652_v18 = vadd.f32 %v5035_v58, %v2651_v41  ;;  %v5121_v14 = vsel %vm2752_vm0, %v2657_v19, -1e+30 }
 0x3e8   : > { %v4038_v20 = vpop.f32.mrf.mxu1  ;;  %2807 = vmax.xlane.f32.xlu1 %v5109_v34 }
 0x3e9   : > { %v5114_v16 = vsel %vm2752_vm0, %v2652_v18, -1e+30  ;;  %v2667_v13 = vadd.f32 %v4038_v20, %v5035_v58 }
 0x3ea   : > { %v2661_v23 = vpop.f32.mrf.mxu1  ;;  %2809 = vmax.xlane.f32.xlu0 %v5114_v16 }
 0x3eb   : > { %v2662_v61 = vadd.f32 %v5035_v58, %v2661_v23  ;;  %v5133_v28 = vsel %vm2752_vm0, %v2667_v13, -1e+30 }
 0x3ec   : > { %v4041_v25 = vpop.f32.mrf.mxu1  ;;  %2811 = vmax.xlane.f32.xlu1 %v5121_v14 }
 0x3ed   : > { %v5126_v26 = vsel %vm2752_vm0, %v2662_v61, -1e+30  ;;  %v2677_v29 = vadd.f32 %v4041_v25, %v5035_v58 }
 0x3ee   : > { %v2671_v27 = vpop.f32.mrf.mxu1  ;;  %2813 = vmax.xlane.f32.xlu0 %v5126_v26 }
 0x3ef   : > { %v2672_v40 = vadd.f32 %v5035_v58, %v2671_v27  ;;  %v5145_v36 = vsel %vm2752_vm0, %v2677_v29, -1e+30 }
 0x3f0   : > { %v4044_v50 = vpop.f32.mrf.mxu1  ;;  %2815 = vmax.xlane.f32.xlu1 %v5133_v28 }
 0x3f1   : > { %v5138_v31 = vsel %vm2752_vm0, %v2672_v40, -1e+30  ;;  %v2687_v24 = vadd.f32 %v4044_v50, %v5035_v58 }
 0x3f2   : > { %v2681_v32 = vpop.f32.mrf.mxu1  ;;  %2817 = vmax.xlane.f32.xlu0 %v5138_v31 }
 0x3f3   : > { %v2682_v42 = vadd.f32 %v5035_v58, %v2681_v32  ;;  %v5157_v44 = vsel %vm2752_vm0, %v2687_v24, -1e+30 }
 0x3f4   : > { %v4047_v5 = vpop.f32.mrf.mxu1  ;;  %2819 = vmax.xlane.f32.xlu1 %v5145_v36 }
 0x3f5   : > { %v5150_v39 = vsel %vm2752_vm0, %v2682_v42, -1e+30  ;;  %v2697_v38 = vadd.f32 %v4047_v5, %v5035_v58 }
 0x3f6   : > { %v2691_v22 = vpop.f32.mrf.mxu1  ;;  %2821 = vmax.xlane.f32.xlu0 %v5150_v39 }
 0x3f7   : > { %v2692_v33 = vadd.f32 %v5035_v58, %v2691_v22  ;;  %v5169_v54 = vsel %vm2752_vm0, %v2697_v38, -1e+30 }
 0x3f8   : > { %v4050_v10 = vpop.f32.mrf.mxu1  ;;  %2823 = vmax.xlane.f32.xlu1 %v5157_v44 }
 0x3f9   : > { %v5162_v49 = vsel %vm2752_vm0, %v2692_v33, -1e+30  ;;  %v2707_v21 = vadd.f32 %v4050_v10, %v5035_v58 }
 0x3fa   : > { %v2701_v53 = vpop.f32.mrf.mxu1  ;;  %2825 = vmax.xlane.f32.xlu0 %v5162_v49 }
 0x3fb   : > { %v2702_v48 = vadd.f32 %v5035_v58, %v2701_v53  ;;  %v5181_v47 = vsel %vm2752_vm0, %v2707_v21, -1e+30 }
 0x3fc   : > { %v4053_v60 = vpop.f32.mrf.mxu1  ;;  %2827 = vmax.xlane.f32.xlu1 %v5169_v54 }
 0x3fd   : > { %v5174_v62 = vsel %vm2752_vm0, %v2702_v48, -1e+30  ;;  %v2717_v63 = vadd.f32 %v4053_v60, %v5035_v58 }
 0x3fe   : > { %v2711_v35 = vpop.f32.mrf.mxu1  ;;  %2829 = vmax.xlane.f32.xlu0 %v5174_v62 }
 0x3ff   : > { %v2712_v2 = vadd.f32 %v5035_v58, %v2711_v35  ;;  %v5193_v55 = vsel %vm2752_vm0, %v2717_v63, -1e+30 }
 0x400   : > { %v4056_v7 = vpop.f32.mrf.mxu1  ;;  %2831 = vmax.xlane.f32.xlu1 %v5181_v47 }
 0x401   : > { %v5186_v52 = vsel %vm2752_vm0, %v2712_v2, -1e+30  ;;  %v2727_v37 = vadd.f32 %v4056_v7, %v5035_v58 }
 0x402   : > { %v2721_v56 = vpop.f32.mrf.mxu1  ;;  %2833 = vmax.xlane.f32.xlu0 %v5186_v52 }
 0x403   : > { %v2722_v57 = vadd.f32 %v5035_v58, %v2721_v56  ;;  %v5205_v41 = vsel %vm2752_vm0, %v2727_v37, -1e+30 }
 0x404   : > { %v4059_v0 = vpop.f32.mrf.mxu1  ;;  %2835 = vmax.xlane.f32.xlu1 %v5193_v55 }
 0x405   : > { %v5198_v9 = vsel %vm2752_vm0, %v2722_v57, -1e+30  ;;  %v2737_v6 = vadd.f32 %v4059_v0, %v5035_v58 }
 0x406   : > { %v2731_v3 = vpop.f32.mrf.mxu1  ;;  %2837 = vmax.xlane.f32.xlu0 %v5198_v9 }
 0x407   : > { %v2732_v15 = vadd.f32 %v5035_v58, %v2731_v3  ;;  %v5217_v61 = vsel %vm2752_vm0, %v2737_v6, -1e+30 }
 0x408   : > { %v4062_v19 = vpop.f32.mrf.mxu1  ;;  %2839 = vmax.xlane.f32.xlu1 %v5205_v41 }
 0x409   : > { %v2747_v18 = vadd.f32 %v4062_v19, %v5035_v58  ;;  %v5211_v20 = vsel %vm2752_vm0, %v2732_v15, -1e+30 }
 0x40a   : > { %v2741_v23 = vpop.f32.mrf.mxu1  ;;  %2841 = vmax.xlane.f32.xlu0 %v5211_v20 }
 0x40b   : > { %v2742_v13 = vadd.f32 %v5035_v58, %v2741_v23  ;;  %v5221_v25 = vsel %vm2752_vm0, %v2747_v18, -1e+30 }
 0x40c   : > { %2843 = vmax.xlane.f32.xlu1 %v5217_v61 }
 0x40d   : > { %v5226_v27 = vsel %vm2752_vm0, %v2742_v13, -1e+30 }
 0x40e   : > { %2845 = vmax.xlane.f32.xlu0 %v5226_v27 }
 0x410   : > { %2847 = vmax.xlane.f32.xlu1 %v5221_v25 }
 0x459   : > { %v2788_v29 = vpop.xlane.xlu0 %2787 }
 0x45a   : > { %v5231_v58 = vsub.f32 %v5042_v51, %v2788_v29 }
 0x45c   : > { %v2883_v40 = vmul.f32 1.442695, %v5231_v58 }
 0x45d   : > { %v2792_v50 = vpop.xlane.xlu1 %2791  ;;  %v2786_v32 = vpop.xlane.xlu0 %2785 }
 0x45e   : > { %4090 = vpow2.f32 %v2883_v40  ;;  %v5235_v24 = vsub.f32 %v5049_v4, %v2792_v50  ;;  %v5238_v43 = vsub.f32 %v5053_v59, %v2786_v32 }
 0x460   : > { %v2887_v42 = vmul.f32 1.442695, %v5235_v24  ;;  %v2881_v5 = vmul.f32 1.442695, %v5238_v43 }
 0x461   : > { %v2790_v22 = vpop.xlane.xlu1 %2789 }
 0x462   : > { %4092 = vpow2.f32 %v2887_v42  ;;  %v5243_v51 = vsub.f32 %v5061_v1, %v2790_v22 }
 0x463   : > { %4094 = vpow2.f32 %v2881_v5  ;;  %v2794_v38 = vpop.xlane.xlu0 %2793 }
 0x464   : > { %v2885_v33 = vmul.f32 1.442695, %v5243_v51  ;;  %v5247_v10 = vsub.f32 %v5066_v30, %v2794_v38 }
 0x465   : > { %v2796_v4 = vpop.xlane.xlu1 %2795 }
 0x466   : > { %4096 = vpow2.f32 %v2885_v33  ;;  %v5250_v59 = vsub.f32 %v5073_v8, %v2796_v4  ;;  %v2889_v53 = vmul.f32 1.442695, %v5247_v10 }
 0x467   : > { %v2798_v21 = vpop.xlane.xlu0 %2797 }
 0x468   : > { %v2891_v48 = vmul.f32 1.442695, %v5250_v59  ;;  %v5255_v1 = vsub.f32 %v5078_v45, %v2798_v21 }
 0x469   : > { %v2800_v60 = vpop.xlane.xlu1 %2799 }
 0x46a   : > { %4098 = vpow2.f32 %v2891_v48  ;;  %v5258_v35 = vsub.f32 %v5085_v11, %v2800_v60  ;;  %v2893_v63 = vmul.f32 1.442695, %v5255_v1 }
 0x46b   : > { %v4091_v30 = vpop.eup %4090  ;;  %4100 = vpow2.f32 %v2889_v53  ;;  %v2802_v2 = vpop.xlane.xlu0 %2801 }
 0x46c   : > { %v2895_v8 = vmul.f32 1.442695, %v5258_v35  ;;  %v5263_v7 = vsub.f32 %v5090_v46, %v2802_v2  ;;  %2947 = vadd.xlane.f32.xlu1 %v4091_v30 }
 0x46d   : > { %v2804_v56 = vpop.xlane.xlu1 %2803 }
 0x46e   : > { %4102 = vpow2.f32 %v2895_v8  ;;  %v5266_v45 = vsub.f32 %v5097_v12, %v2804_v56  ;;  %v2897_v11 = vmul.f32 1.442695, %v5263_v7 }
 0x46f   : > { %v4093_v37 = vpop.eup %4092  ;;  %4104 = vpow2.f32 %v2893_v63  ;;  %v2806_v57 = vpop.xlane.xlu0 %2805 }
 0x470   : > { %v4095_v0 = vpop.eup %4094  ;;  %v2899_v3 = vmul.f32 1.442695, %v5266_v45  ;;  %v5271_v6 = vsub.f32 %v5102_v17, %v2806_v57  ;;  %2951 = vadd.xlane.f32.xlu1 %v4093_v37 }
 0x471   : > { %2945 = vadd.xlane.f32.xlu0 %v4095_v0  ;;  %v2808_v46 = vpop.xlane.xlu1 %2807 }
 0x472   : > { %4106 = vpow2.f32 %v2899_v3  ;;  %v5274_v15 = vsub.f32 %v5109_v34, %v2808_v46  ;;  %v2901_v19 = vmul.f32 1.442695, %v5271_v6 }
 0x473   : > { %v4097_v12 = vpop.eup %4096  ;;  %4108 = vpow2.f32 %v2897_v11  ;;  %v2810_v18 = vpop.xlane.xlu0 %2809 }
 0x474   : > { %v2903_v23 = vmul.f32 1.442695, %v5274_v15  ;;  %v5279_v13 = vsub.f32 %v5114_v16, %v2810_v18 }
 0x475   : > { %2949 = vadd.xlane.f32.xlu0 %v4097_v12  ;;  %v2812_v17 = vpop.xlane.xlu1 %2811 }
 0x476   : > { %4110 = vpow2.f32 %v2903_v23  ;;  %v5282_v29 = vsub.f32 %v5121_v14, %v2812_v17  ;;  %v2905_v34 = vmul.f32 1.442695, %v5279_v13 }
 0x477   : > { %v4099_v40 = vpop.eup %4098  ;;  %4112 = vpow2.f32 %v2901_v19  ;;  %v2814_v50 = vpop.xlane.xlu0 %2813 }
 0x478   : > { %v4101_v32 = vpop.eup %4100  ;;  %v2907_v42 = vmul.f32 1.442695, %v5282_v29  ;;  %v5287_v5 = vsub.f32 %v5126_v26, %v2814_v50  ;;  %2955 = vadd.xlane.f32.xlu1 %v4099_v40 }
 0x479   : > { %2953 = vadd.xlane.f32.xlu0 %v4101_v32  ;;  %v2816_v16 = vpop.xlane.xlu1 %2815 }
 0x47a   : > { %4114 = vpow2.f32 %v2907_v42  ;;  %v5290_v22 = vsub.f32 %v5133_v28, %v2816_v16  ;;  %v2909_v38 = vmul.f32 1.442695, %v5287_v5 }
 0x47b   : > { %v4103_v14 = vpop.eup %4102  ;;  %4116 = vpow2.f32 %v2905_v34  ;;  %v2818_v33 = vpop.xlane.xlu0 %2817 }
 0x47c   : > { %v4105_v4 = vpop.eup %4104  ;;  %v2911_v53 = vmul.f32 1.442695, %v5290_v22  ;;  %v5295_v21 = vsub.f32 %v5138_v31, %v2818_v33  ;;  %2959 = vadd.xlane.f32.xlu1 %v4103_v14 }
 0x47d   : > { %2957 = vadd.xlane.f32.xlu0 %v4105_v4  ;;  %v2820_v26 = vpop.xlane.xlu1 %2819 }
 0x47e   : > { %4118 = vpow2.f32 %v2911_v53  ;;  %v5298_v48 = vsub.f32 %v5145_v36, %v2820_v26  ;;  %v2913_v60 = vmul.f32 1.442695, %v5295_v21 }
 0x47f   : > { %v4107_v28 = vpop.eup %4106  ;;  %4120 = vpow2.f32 %v2909_v38  ;;  %v2822_v30 = vpop.xlane.xlu0 %2821 }
 0x480   : > { %v4109_v63 = vpop.eup %4108  ;;  %v2915_v2 = vmul.f32 1.442695, %v5298_v48  ;;  %v5303_v8 = vsub.f32 %v5150_v39, %v2822_v30  ;;  %2963 = vadd.xlane.f32.xlu1 %v4107_v28 }
 0x481   : > { %2961 = vadd.xlane.f32.xlu0 %v4109_v63  ;;  %v2824_v31 = vpop.xlane.xlu1 %2823 }
 0x482   : > { %4122 = vpow2.f32 %v2915_v2  ;;  %v5306_v56 = vsub.f32 %v5157_v44, %v2824_v31  ;;  %v2917_v37 = vmul.f32 1.442695, %v5303_v8 }
 0x483   : > { %v4111_v36 = vpop.eup %4110  ;;  %4124 = vpow2.f32 %v2913_v60  ;;  %v2826_v11 = vpop.xlane.xlu0 %2825 }
 0x484   : > { %v4113_v57 = vpop.eup %4112  ;;  %v2919_v0 = vmul.f32 1.442695, %v5306_v56  ;;  %v5311_v3 = vsub.f32 %v5162_v49, %v2826_v11  ;;  %2967 = vadd.xlane.f32.xlu1 %v4111_v36 }
 0x485   : > { %2965 = vadd.xlane.f32.xlu0 %v4113_v57  ;;  %v2828_v39 = vpop.xlane.xlu1 %2827 }
 0x486   : > { %4126 = vpow2.f32 %v2919_v0  ;;  %v5314_v46 = vsub.f32 %v5169_v54, %v2828_v39  ;;  %v2921_v12 = vmul.f32 1.442695, %v5311_v3 }
 0x487   : > { %v4115_v44 = vpop.eup %4114  ;;  %4128 = vpow2.f32 %v2917_v37  ;;  %v2830_v19 = vpop.xlane.xlu0 %2829 }
 0x488   : > { %v4117_v18 = vpop.eup %4116  ;;  %v2923_v23 = vmul.f32 1.442695, %v5314_v46  ;;  %v5319_v17 = vsub.f32 %v5174_v62, %v2830_v19  ;;  %2971 = vadd.xlane.f32.xlu1 %v4115_v44 }
 0x489   : > { %2969 = vadd.xlane.f32.xlu0 %v4117_v18  ;;  %v2832_v49 = vpop.xlane.xlu1 %2831 }
 0x48a   : > { %4130 = vpow2.f32 %v2923_v23  ;;  %v5322_v40 = vsub.f32 %v5181_v47, %v2832_v49  ;;  %v2925_v34 = vmul.f32 1.442695, %v5319_v17 }
 0x48b   : > { %v4119_v54 = vpop.eup %4118  ;;  %4132 = vpow2.f32 %v2921_v12  ;;  %v2834_v50 = vpop.xlane.xlu0 %2833 }
 0x48c   : > { %v4121_v32 = vpop.eup %4120  ;;  %v2927_v42 = vmul.f32 1.442695, %v5322_v40  ;;  %v5327_v16 = vsub.f32 %v5186_v52, %v2834_v50  ;;  %2975 = vadd.xlane.f32.xlu1 %v4119_v54 }
 0x48d   : > { %2973 = vadd.xlane.f32.xlu0 %v4121_v32  ;;  %v2836_v62 = vpop.xlane.xlu1 %2835 }
 0x48e   : > { %4134 = vpow2.f32 %v2927_v42  ;;  %v5330_v14 = vsub.f32 %v5193_v55, %v2836_v62  ;;  %v2929_v38 = vmul.f32 1.442695, %v5327_v16 }
 0x48f   : > { %v4123_v47 = vpop.eup %4122  ;;  %4136 = vpow2.f32 %v2925_v34  ;;  %v2838_v33 = vpop.xlane.xlu0 %2837 }
 0x490   : > { %v4125_v4 = vpop.eup %4124  ;;  %v2931_v53 = vmul.f32 1.442695, %v5330_v14  ;;  %v5335_v26 = vsub.f32 %v5198_v9, %v2838_v33  ;;  %2979 = vadd.xlane.f32.xlu1 %v4123_v47 }
 0x491   : > { %2977 = vadd.xlane.f32.xlu0 %v4125_v4  ;;  %v2840_v52 = vpop.xlane.xlu1 %2839 }
 0x492   : > { %4138 = vpow2.f32 %v2931_v53  ;;  %v5338_v28 = vsub.f32 %v5205_v41, %v2840_v52  ;;  %v2933_v60 = vmul.f32 1.442695, %v5335_v26 }
 0x493   : > { %v4127_v55 = vpop.eup %4126  ;;  %4140 = vpow2.f32 %v2929_v38  ;;  %v2842_v30 = vpop.xlane.xlu0 %2841 }
 0x494   : > { %v4129_v63 = vpop.eup %4128  ;;  %v2935_v2 = vmul.f32 1.442695, %v5338_v28  ;;  %v5343_v31 = vsub.f32 %v5211_v20, %v2842_v30  ;;  %2983 = vadd.xlane.f32.xlu1 %v4127_v55 }
 0x495   : > { %2981 = vadd.xlane.f32.xlu0 %v4129_v63  ;;  %v2844_v9 = vpop.xlane.xlu1 %2843 }
 0x496   : > { %4142 = vpow2.f32 %v2935_v2  ;;  %v5346_v36 = vsub.f32 %v5217_v61, %v2844_v9  ;;  %v2937_v37 = vmul.f32 1.442695, %v5343_v31 }
 0x497   : > { %v4131_v41 = vpop.eup %4130  ;;  %4144 = vpow2.f32 %v2933_v60  ;;  %v2846_v11 = vpop.xlane.xlu0 %2845 }
 0x498   : > { %v4133_v57 = vpop.eup %4132  ;;  %v2939_v0 = vmul.f32 1.442695, %v5346_v36  ;;  %v5351_v39 = vsub.f32 %v5226_v27, %v2846_v11  ;;  %2987 = vadd.xlane.f32.xlu1 %v4131_v41 }
 0x499   : > { %2985 = vadd.xlane.f32.xlu0 %v4133_v57  ;;  %v2848_v20 = vpop.xlane.xlu1 %2847 }
 0x49a   : > { %4146 = vpow2.f32 %v2939_v0  ;;  %v5354_v44 = vsub.f32 %v5221_v25, %v2848_v20  ;;  %v2941_v12 = vmul.f32 1.442695, %v5351_v39 }
 0x49b   : > { %v4135_v61 = vpop.eup %4134  ;;  %4148 = vpow2.f32 %v2937_v37 }
 0x49c   : > { %v4137_v19 = vpop.eup %4136  ;;  %v2943_v18 = vmul.f32 1.442695, %v5354_v44  ;;  %2991 = vadd.xlane.f32.xlu1 %v4135_v61 }
 0x49d   : > { %2989 = vadd.xlane.f32.xlu0 %v4137_v19 }
 0x49e   : > { %4150 = vpow2.f32 %v2943_v18 }
 0x49f   : > { %v4139_v23 = vpop.eup %4138  ;;  %4152 = vpow2.f32 %v2941_v12 }
 0x4a0   : > { %v4141_v27 = vpop.eup %4140  ;;  %2995 = vadd.xlane.f32.xlu1 %v4139_v23 }
 0x4a1   : > { %2993 = vadd.xlane.f32.xlu0 %v4141_v27 }
 0x4a3   : > { %v4143_v49 = vpop.eup %4142 }
 0x4a4   : > { %v4145_v54 = vpop.eup %4144  ;;  %2999 = vadd.xlane.f32.xlu1 %v4143_v49 }
 0x4a5   : > { %2997 = vadd.xlane.f32.xlu0 %v4145_v54 }
 0x4a7   : > { %v4147_v25 = vpop.eup %4146 }
 0x4a8   : > { %v4149_v34 = vpop.eup %4148  ;;  %3003 = vadd.xlane.f32.xlu1 %v4147_v25 }
 0x4a9   : > { %3001 = vadd.xlane.f32.xlu0 %v4149_v34 }
 0x4ab   : > { %v4151_v50 = vpop.eup %4150 }
 0x4ac   : > { %v4153_v32 = vpop.eup %4152  ;;  %3007 = vadd.xlane.f32.xlu1 %v4151_v50 }
 0x4ad   : > { %3005 = vadd.xlane.f32.xlu0 %v4153_v32 }
 0x4f5   : > { %v2948_v42 = vpop.xlane.xlu1 %2947 }
 0x4f6   : > { %4154 = vlog2.f32 %v2948_v42 }
 0x4f9   : > { %v2952_v62 = vpop.xlane.xlu1 %2951 }
 0x4fa   : > { %4156 = vlog2.f32 %v2952_v62  ;;  %v2946_v47 = vpop.xlane.xlu0 %2945 }
 0x4fb   : > { %4158 = vlog2.f32 %v2946_v47 }
 0x4fe   : > { %v2950_v38 = vpop.xlane.xlu0 %2949 }
 0x4ff   : > { %4160 = vlog2.f32 %v2950_v38 }
 0x501   : > { %v2956_v33 = vpop.xlane.xlu1 %2955 }
 0x502   : > { %4162 = vlog2.f32 %v2956_v33  ;;  %v2954_v4 = vpop.xlane.xlu0 %2953 }
 0x503   : > { %v4155_v53 = vpop.eup %4154  ;;  %4164 = vlog2.f32 %v2954_v4 }
 0x504   : > { %v3012_v52 = vmul.f32 0.6931472, %v4155_v53 }
 0x505   : > { %v2960_v55 = vpop.xlane.xlu1 %2959 }
 0x506   : > { %v3074_v60 = vsub.f32 %v5231_v58, %v3012_v52  ;;  %4166 = vlog2.f32 %v2960_v55  ;;  %v2958_v30 = vpop.xlane.xlu0 %2957 }
 0x507   : > { %v4157_v63 = vpop.eup %4156  ;;  %4168 = vlog2.f32 %v2958_v30 }
 0x508   : > { %v4159_v2 = vpop.eup %4158  ;;  %3106 = vst [vmem:[%s4369_s30 + $0x8] sm:$0xff] %v3074_v60  ;;  %v3016_v9 = vmul.f32 0.6931472, %v4157_v63 }
 0x509   : > { %v3010_v41 = vmul.f32 0.6931472, %v4159_v2  ;;  %v2964_v37 = vpop.xlane.xlu1 %2963 }
 0x50a   : > { %v3076_v11 = vsub.f32 %v5235_v24, %v3016_v9  ;;  %4170 = vlog2.f32 %v2964_v37  ;;  %v2962_v57 = vpop.xlane.xlu0 %2961 }
 0x50b   : > { %v3073_v0 = vsub.f32 %v5238_v43, %v3010_v41  ;;  %4172 = vlog2.f32 %v2962_v57 }
 0x50c   : > { %v4161_v58 = vpop.eup %4160  ;;  %3108 = vst [vmem:[%s4369_s30 + $0x18] sm:$0xff] %v3076_v11 }
 0x50d   : > { %3105 = vst [vmem:[%s4369_s30] sm:$0xff] %v3073_v0  ;;  %v3014_v20 = vmul.f32 0.6931472, %v4161_v58  ;;  %v2968_v61 = vpop.xlane.xlu1 %2967 }
 0x50e   : > { %4174 = vlog2.f32 %v2968_v61  ;;  %v2966_v12 = vpop.xlane.xlu0 %2965 }
 0x50f   : > { %v4163_v19 = vpop.eup %4162  ;;  %v3075_v18 = vsub.f32 %v5243_v51, %v3014_v20  ;;  %4176 = vlog2.f32 %v2966_v12 }
 0x510   : > { %v4165_v24 = vpop.eup %4164  ;;  %v3020_v23 = vmul.f32 0.6931472, %v4163_v19 }
 0x511   : > { %3107 = vst [vmem:[%s4369_s30 + $0x10] sm:$0xff] %v3075_v18  ;;  %v3018_v27 = vmul.f32 0.6931472, %v4165_v24  ;;  %v2972_v49 = vpop.xlane.xlu1 %2971 }
 0x512   : > { %v3078_v43 = vsub.f32 %v5250_v59, %v3020_v23  ;;  %4178 = vlog2.f32 %v2972_v49  ;;  %v2970_v54 = vpop.xlane.xlu0 %2969 }
 0x513   : > { %v4167_v25 = vpop.eup %4166  ;;  %v3077_v34 = vsub.f32 %v5247_v10, %v3018_v27  ;;  %4180 = vlog2.f32 %v2970_v54 }
 0x514   : > { %v4169_v50 = vpop.eup %4168  ;;  %3110 = vst [vmem:[%s4369_s30 + $0x28] sm:$0xff] %v3078_v43  ;;  %v3024_v51 = vmul.f32 0.6931472, %v4167_v25 }
 0x515   : > { %3109 = vst [vmem:[%s4369_s30 + $0x20] sm:$0xff] %v3077_v34  ;;  %v3022_v32 = vmul.f32 0.6931472, %v4169_v50  ;;  %v2976_v42 = vpop.xlane.xlu1 %2975 }
 0x516   : > { %v3080_v62 = vsub.f32 %v5258_v35, %v3024_v51  ;;  %4182 = vlog2.f32 %v2976_v42  ;;  %v2974_v47 = vpop.xlane.xlu0 %2973 }
 0x517   : > { %v4171_v38 = vpop.eup %4170  ;;  %v3079_v59 = vsub.f32 %v5255_v1, %v3022_v32  ;;  %4184 = vlog2.f32 %v2974_v47 }
 0x518   : > { %v4173_v33 = vpop.eup %4172  ;;  %3112 = vst [vmem:[%s4369_s30 + $0x38] sm:$0xff] %v3080_v62  ;;  %v3028_v10 = vmul.f32 0.6931472, %v4171_v38 }
 0x519   : > { %3111 = vst [vmem:[%s4369_s30 + $0x30] sm:$0xff] %v3079_v59  ;;  %v3026_v4 = vmul.f32 0.6931472, %v4173_v33  ;;  %v2980_v53 = vpop.xlane.xlu1 %2979 }
 0x51a   : > { %v3082_v52 = vsub.f32 %v5266_v45, %v3028_v10  ;;  %4186 = vlog2.f32 %v2980_v53  ;;  %v2978_v55 = vpop.xlane.xlu0 %2977 }
 0x51b   : > { %v4175_v60 = vpop.eup %4174  ;;  %v3081_v35 = vsub.f32 %v5263_v7, %v3026_v4  ;;  %4188 = vlog2.f32 %v2978_v55 }
 0x51c   : > { %v4177_v30 = vpop.eup %4176  ;;  %3114 = vst [vmem:[%s4369_s30 + $0x48] sm:$0xff] %v3082_v52  ;;  %v3032_v1 = vmul.f32 0.6931472, %v4175_v60 }
 0x51d   : > { %3113 = vst [vmem:[%s4369_s30 + $0x40] sm:$0xff] %v3081_v35  ;;  %v3030_v63 = vmul.f32 0.6931472, %v4177_v30  ;;  %v2984_v2 = vpop.xlane.xlu1 %2983 }
 0x51e   : > { %v3084_v9 = vsub.f32 %v5274_v15, %v3032_v1  ;;  %4190 = vlog2.f32 %v2984_v2  ;;  %v2982_v41 = vpop.xlane.xlu0 %2981 }
 0x51f   : > { %v4179_v37 = vpop.eup %4178  ;;  %v3083_v45 = vsub.f32 %v5271_v6, %v3030_v63  ;;  %4192 = vlog2.f32 %v2982_v41 }
 0x520   : > { %v4181_v11 = vpop.eup %4180  ;;  %3116 = vst [vmem:[%s4369_s30 + $0x58] sm:$0xff] %v3084_v9  ;;  %v3036_v7 = vmul.f32 0.6931472, %v4179_v37 }
 0x521   : > { %3115 = vst [vmem:[%s4369_s30 + $0x50] sm:$0xff] %v3083_v45  ;;  %v3034_v57 = vmul.f32 0.6931472, %v4181_v11  ;;  %v2988_v0 = vpop.xlane.xlu1 %2987 }
 0x522   : > { %v3086_v58 = vsub.f32 %v5282_v29, %v3036_v7  ;;  %4194 = vlog2.f32 %v2988_v0  ;;  %v2986_v20 = vpop.xlane.xlu0 %2985 }
 0x523   : > { %v4183_v61 = vpop.eup %4182  ;;  %v3085_v15 = vsub.f32 %v5279_v13, %v3034_v57  ;;  %4196 = vlog2.f32 %v2986_v20 }
 0x524   : > { %v4185_v12 = vpop.eup %4184  ;;  %3118 = vst [vmem:[%s4369_s30 + $0x68] sm:$0xff] %v3086_v58  ;;  %v3040_v6 = vmul.f32 0.6931472, %v4183_v61 }
 0x525   : > { %3117 = vst [vmem:[%s4369_s30 + $0x60] sm:$0xff] %v3085_v15  ;;  %v3038_v19 = vmul.f32 0.6931472, %v4185_v12  ;;  %v2992_v18 = vpop.xlane.xlu1 %2991 }
 0x526   : > { %v3088_v24 = vsub.f32 %v5290_v22, %v3040_v6  ;;  %4198 = vlog2.f32 %v2992_v18  ;;  %v2990_v23 = vpop.xlane.xlu0 %2989 }
 0x527   : > { %v4187_v27 = vpop.eup %4186  ;;  %v3087_v29 = vsub.f32 %v5287_v5, %v3038_v19  ;;  %4200 = vlog2.f32 %v2990_v23 }
 0x528   : > { %v4189_v49 = vpop.eup %4188  ;;  %3120 = vst [vmem:[%s4369_s30 + $0x78] sm:$0xff] %v3088_v24  ;;  %v3044_v13 = vmul.f32 0.6931472, %v4187_v27 }
 0x529   : > { %3119 = vst [vmem:[%s4369_s30 + $0x70] sm:$0xff] %v3087_v29  ;;  %v3042_v43 = vmul.f32 0.6931472, %v4189_v49  ;;  %v2996_v54 = vpop.xlane.xlu1 %2995 }
 0x52a   : > { %v3090_v25 = vsub.f32 %v5298_v48, %v3044_v13  ;;  %4202 = vlog2.f32 %v2996_v54  ;;  %v2994_v34 = vpop.xlane.xlu0 %2993 }
 0x52b   : > { %v4191_v50 = vpop.eup %4190  ;;  %v3089_v22 = vsub.f32 %v5295_v21, %v3042_v43  ;;  %4204 = vlog2.f32 %v2994_v34 }
 0x52c   : > { %v4193_v51 = vpop.eup %4192  ;;  %3122 = vst [vmem:[%s4369_s30 + $0x88] sm:$0xff] %v3090_v25  ;;  %v3048_v5 = vmul.f32 0.6931472, %v4191_v50 }
 0x52d   : > { %3121 = vst [vmem:[%s4369_s30 + $0x80] sm:$0xff] %v3089_v22  ;;  %v3046_v32 = vmul.f32 0.6931472, %v4193_v51  ;;  %v3000_v42 = vpop.xlane.xlu1 %2999 }
 0x52e   : > { %v3092_v62 = vsub.f32 %v5306_v56, %v3048_v5  ;;  %4206 = vlog2.f32 %v3000_v42  ;;  %v2998_v47 = vpop.xlane.xlu0 %2997 }
 0x52f   : > { %v4195_v38 = vpop.eup %4194  ;;  %v3091_v48 = vsub.f32 %v5303_v8, %v3046_v32  ;;  %4208 = vlog2.f32 %v2998_v47 }
 0x530   : > { %v4197_v59 = vpop.eup %4196  ;;  %3124 = vst [vmem:[%s4369_s30 + $0x98] sm:$0xff] %v3092_v62  ;;  %v3052_v21 = vmul.f32 0.6931472, %v4195_v38 }
 0x531   : > { %3123 = vst [vmem:[%s4369_s30 + $0x90] sm:$0xff] %v3091_v48  ;;  %v3050_v33 = vmul.f32 0.6931472, %v4197_v59  ;;  %v3004_v10 = vpop.xlane.xlu1 %3003 }
 0x532   : > { %v3094_v4 = vsub.f32 %v5314_v46, %v3052_v21  ;;  %4210 = vlog2.f32 %v3004_v10  ;;  %v3002_v53 = vpop.xlane.xlu0 %3001 }
 0x533   : > { %v4199_v52 = vpop.eup %4198  ;;  %v3093_v56 = vsub.f32 %v5311_v3, %v3050_v33  ;;  %4212 = vlog2.f32 %v3002_v53 }
 0x534   : > { %v4201_v55 = vpop.eup %4200  ;;  %3126 = vst [vmem:[%s4369_s30 + $0xa8] sm:$0xff] %v3094_v4  ;;  %v3056_v8 = vmul.f32 0.6931472, %v4199_v52 }
 0x535   : > { %3125 = vst [vmem:[%s4369_s30 + $0xa0] sm:$0xff] %v3093_v56  ;;  %v3054_v60 = vmul.f32 0.6931472, %v4201_v55  ;;  %v3008_v35 = vpop.xlane.xlu1 %3007 }
 0x536   : > { %v3096_v30 = vsub.f32 %v5322_v40, %v3056_v8  ;;  %4214 = vlog2.f32 %v3008_v35  ;;  %v3006_v46 = vpop.xlane.xlu0 %3005 }
 0x537   : > { %v4203_v1 = vpop.eup %4202  ;;  %v3095_v63 = vsub.f32 %v5319_v17, %v3054_v60  ;;  %4216 = vlog2.f32 %v3006_v46 }
 0x538   : > { %v4205_v2 = vpop.eup %4204  ;;  %3128 = vst [vmem:[%s4369_s30 + $0xb8] sm:$0xff] %v3096_v30  ;;  %v3060_v3 = vmul.f32 0.6931472, %v4203_v1 }
 0x539   : > { %3127 = vst [vmem:[%s4369_s30 + $0xb0] sm:$0xff] %v3095_v63  ;;  %v3058_v9 = vmul.f32 0.6931472, %v4205_v2 }
 0x53a   : > { %v3098_v41 = vsub.f32 %v5330_v14, %v3060_v3 }
 0x53b   : > { %v4207_v37 = vpop.eup %4206  ;;  %v3097_v45 = vsub.f32 %v5327_v16, %v3058_v9 }
 0x53c   : > { %v4209_v40 = vpop.eup %4208  ;;  %3130 = vst [vmem:[%s4369_s30 + $0xc8] sm:$0xff] %v3098_v41  ;;  %v3064_v11 = vmul.f32 0.6931472, %v4207_v37 }
 0x53d   : > { %3129 = vst [vmem:[%s4369_s30 + $0xc0] sm:$0xff] %v3097_v45  ;;  %v3062_v17 = vmul.f32 0.6931472, %v4209_v40 }
 0x53e   : > { %v3100_v7 = vsub.f32 %v5338_v28, %v3064_v11 }
 0x53f   : > { %v4211_v57 = vpop.eup %4210  ;;  %v3099_v0 = vsub.f32 %v5335_v26, %v3062_v17 }
 0x540   : > { %v4213_v58 = vpop.eup %4212  ;;  %3132 = vst [vmem:[%s4369_s30 + $0xd8] sm:$0xff] %v3100_v7  ;;  %v3068_v14 = vmul.f32 0.6931472, %v4211_v57 }
 0x541   : > { %3131 = vst [vmem:[%s4369_s30 + $0xd0] sm:$0xff] %v3099_v0  ;;  %v3066_v20 = vmul.f32 0.6931472, %v4213_v58 }
 0x542   : > { %v3102_v16 = vsub.f32 %v5346_v36, %v3068_v14 }
 0x543   : > { %v4215_v61 = vpop.eup %4214  ;;  %v3101_v15 = vsub.f32 %v5343_v31, %v3066_v20 }
 0x544   : > { %v4217_v12 = vpop.eup %4216  ;;  %3134 = vst [vmem:[%s4369_s30 + $0xe8] sm:$0xff] %v3102_v16  ;;  %v3072_v6 = vmul.f32 0.6931472, %v4215_v61 }
 0x545   : > { %3133 = vst [vmem:[%s4369_s30 + $0xe0] sm:$0xff] %v3101_v15  ;;  %v3070_v28 = vmul.f32 0.6931472, %v4217_v12 }
 0x546   : > { %v3104_v19 = vsub.f32 %v5354_v44, %v3072_v6 }
 0x547   : > { %v3103_v26 = vsub.f32 %v5351_v39, %v3070_v28 }
 0x548   : > { %3136 = vst [vmem:[%s4369_s30 + $0xf8] sm:$0xff] %v3104_v19 }
 0x549   : > { %3135 = vst [vmem:[%s4369_s30 + $0xf0] sm:$0xff] %v3103_v26 }
 0x54a PF: > { %s30_s21 = sadd.s32 1, %s4266_s21   ;;  %s5442_s19 = smov %s4262_s20 }
 0x54b   : > { %p27_p3 = scmp.ge.s32.totalorder %s30_s21, 6   ;;  %s5443_s20 = smov %s5445_s2 }
 0x54d   :  { %29 = sbr.rel (!%p27_p3) target bundleno = 27 (0x1b), region = 92 }

</bundles_post_ra>
